<compile_context>
chip_gen: v7x
topology: tpu7x:2x2x1
jax: 0.10.0
libtpu: 0.0.40
codegen_flags: <defaults>
</compile_context>

<pallas_src>
import functools

import jax
import jax.numpy as jnp
from jax.experimental import pallas as pl
from jax.experimental.pallas import tpu as pltpu


def _tiny_uwcnn_kernel(x_ref, w1_ref, b1_ref, w2_ref, b2_ref, w3_ref, b3_ref,
                       w4a_ref, w4b_ref, w4c_ref, w4d_ref, b4_ref,
                       o_ref, h1_ref, h2_ref, h3_ref, *, W, Wp, Q):
    """One image per grid step.

    x_ref  : (3, S)   flattened zero-padded image, S = (H+3)*(W+2)
    wN_ref : (9, Cout, Cin) per-tap matrices, tap index t = 3*dy + dx
    bN_ref : (Cout, 1)
    o_ref  : (3, Q)   flattened output in padded-width coords, Q = H*(W+2)
    hN_ref : (16, S)  scratch: zero-padded conv activations
    """
    # Tap (dy, dx) of a 3x3 "same" conv reads the padded-flat array at offset
    # dy*Wp + dx relative to output position q = h*Wp + w.
    offs = [dy * Wp + dx for dy in range(3) for dx in range(3)]

    # Lanes with (q mod Wp) >= W are row-seam junk; they must be zero before an
    # activation is reused as the next conv's padded input (they land exactly
    # on the zero border of the padded layout).
    col = jax.lax.broadcasted_iota(jnp.int32, (1, Q), 1) % Wp
    valid = col < W

    def conv(src_ref, w_ref, acc=None):
        # sum_t  W_t @ src[:, off_t : off_t + Q]  ->  (Cout, Q) f32
        for t, off in enumerate(offs):
            part = jnp.dot(w_ref[t], src_ref[:, off:off + Q],
                           preferred_element_type=jnp.float32)
            acc = part if acc is None else acc + part
        return acc

    def relu_mask_store(h_ref, pre):
        h = jnp.where(valid, jnp.maximum(pre, 0.0), 0.0)
        h_ref[...] = jnp.zeros_like(h_ref)        # zero padding border
        h_ref[:, Wp + 1:Wp + 1 + Q] = h           # interior starts at row 1, col 1

    relu_mask_store(h1_ref, conv(x_ref, w1_ref) + b1_ref[...])
    relu_mask_store(h2_ref, conv(h1_ref, w2_ref) + b2_ref[...])
    relu_mask_store(h3_ref, conv(h2_ref, w3_ref) + b3_ref[...])

    # conv4 over concat([h1, h2, h3, x]) expressed as partial sums (no concat).
    y = conv(h1_ref, w4a_ref)
    y = conv(h2_ref, w4b_ref, y)
    y = conv(h3_ref, w4c_ref, y)
    y = conv(x_ref, w4d_ref, y)
    y = y + b4_ref[...] + x_ref[:, Wp + 1:Wp + 1 + Q]   # bias + residual
    o_ref[...] = y.astype(o_ref.dtype)


def tiny_uwcnn(x_nchw, params):
    """x_nchw: (N, 3, H, W) float32 -> (N, 3, H, W) float32."""
    N, C, H, W = x_nchw.shape
    assert C == 3
    Wp = W + 2                 # padded width (1 column each side)
    S = (H + 3) * Wp           # 1 top pad row + H rows + 2 bottom pad rows
    Q = H * Wp                 # output length in padded-width coordinates

    w1, b1, w2, b2, w3, b3, w4, b4 = params

    def taps(w):               # (Cout, Cin, 3, 3) -> (9, Cout, Cin)
        co, ci = w.shape[:2]
        return jnp.transpose(w.reshape(co, ci, 9), (2, 0, 1))

    w1t, w2t, w3t = taps(w1), taps(w2), taps(w3)
    w4a, w4b = taps(w4[:, 0:16]), taps(w4[:, 16:32])
    w4c, w4d = taps(w4[:, 32:48]), taps(w4[:, 48:51])
    b1c, b2c = b1.reshape(-1, 1), b2.reshape(-1, 1)
    b3c, b4c = b3.reshape(-1, 1), b4.reshape(-1, 1)

    # Cheap 3-channel pad; the reshape to (N, C, S) is contiguous (free).
    x_flat = jnp.pad(x_nchw, ((0, 0), (0, 0), (1, 2), (1, 1))).reshape(N, C, S)

    kernel = functools.partial(_tiny_uwcnn_kernel, W=W, Wp=Wp, Q=Q)
    resident = lambda a: pl.BlockSpec(a.shape, lambda n: (0,) * a.ndim)

    out_flat = pl.pallas_call(
        kernel,
        out_shape=jax.ShapeDtypeStruct((N, C, Q), jnp.float32),
        grid_spec=pltpu.PrefetchScalarGridSpec(
            num_scalar_prefetch=0,
            grid=(N,),
            in_specs=[
                pl.BlockSpec((None, C, S), lambda n: (n, 0, 0)),   # image n
                resident(w1t), resident(b1c),
                resident(w2t), resident(b2c),
                resident(w3t), resident(b3c),
                resident(w4a), resident(w4b), resident(w4c), resident(w4d),
                resident(b4c),
            ],
            out_specs=pl.BlockSpec((None, C, Q), lambda n: (n, 0, 0)),
            scratch_shapes=[pltpu.VMEM((16, S), jnp.float32)] * 3,
        ),
        compiler_params=pltpu.CompilerParams(
            dimension_semantics=("parallel",)),
    )(x_flat, w1t, b1c, w2t, b2c, w3t, b3c, w4a, w4b, w4c, w4d, b4c)

    # (N, 3, H*(W+2)) -> (N, 3, H, W): drop the row-seam junk columns.
    return out_flat.reshape(N, C, H, Wp)[:, :, :, :W]


def init_params(key):
    """Deterministic synthetic weights with the nn.Conv2d shapes (OIHW)."""
    ks = jax.random.split(key, 8)
    mk = lambda k, shape, s=0.1: (s * jax.random.normal(k, shape)).astype(jnp.float32)
    w1 = mk(ks[0], (16, 3, 3, 3));  b1 = mk(ks[1], (16,))
    w2 = mk(ks[2], (16, 16, 3, 3)); b2 = mk(ks[3], (16,))
    w3 = mk(ks[4], (16, 16, 3, 3)); b3 = mk(ks[5], (16,))
    w4 = mk(ks[6], (3, 51, 3, 3));  b4 = mk(ks[7], (3,))
    return (w1, b1, w2, b2, w3, b3, w4, b4)


def _conv3x3_same_ref(x, w, b):
    """Pure-JAX 3x3 same-padding conv (NCHW / OIHW), tap-decomposed."""
    N, Cin, H, W = x.shape
    xp = jnp.pad(x, ((0, 0), (0, 0), (1, 1), (1, 1)))
    out = jnp.broadcast_to(b.reshape(1, -1, 1, 1).astype(jnp.float32),
                           (N, w.shape[0], H, W))
    for dy in range(3):
        for dx in range(3):
            out = out + jnp.einsum('oi,nihw->nohw', w[:, :, dy, dx],
                                   xp[:, :, dy:dy + H, dx:dx + W])
    return out


def _reference(x, params):
    """Pure-JAX reference matching the PyTorch forward semantics."""
    w1, b1, w2, b2, w3, b3, w4, b4 = params
    h1 = jnp.maximum(_conv3x3_same_ref(x, w1, b1), 0.0)
    h2 = jnp.maximum(_conv3x3_same_ref(h1, w2, b2), 0.0)
    h3 = jnp.maximum(_conv3x3_same_ref(h2, w3, b3), 0.0)
    cat = jnp.concatenate([h1, h2, h3, x], axis=1)
    return x + _conv3x3_same_ref(cat, w4, b4)


if __name__ == "__main__":
    key = jax.random.PRNGKey(0)
    kx, kp = jax.random.split(key)

    # batch=2, channels=3 (fixed by the module), spatial=16
    x = jax.random.uniform(kx, (2, 3, 16, 16), dtype=jnp.float32)
    params = init_params(kp)

    out = jax.block_until_ready(tiny_uwcnn(x, params))
    ref = _reference(x, params)

    assert out.shape == x.shape
    # Tolerance absorbs MXU low-precision-pass rounding on f32 matmuls; any
    # indexing/padding bug would show up as O(0.1-1) errors across many pixels.
    max_err = float(jnp.max(jnp.abs(out - ref)))
    assert jnp.allclose(out, ref, atol=1e-2, rtol=1e-2), max_err

    print("KERNEL_OK")
</pallas_src>

<mosaic_0001>
module attributes {stable_mosaic.version = 11 : i64} {
  func.func @_tiny_uwcnn_kernel(%arg0: i32, %arg1: memref<1x3x342xf32, #tpu.memory_space<vmem>>, %arg2: memref<9x16x3xf32, #tpu.memory_space<vmem>>, %arg3: memref<16x1xf32, #tpu.memory_space<vmem>>, %arg4: memref<9x16x16xf32, #tpu.memory_space<vmem>>, %arg5: memref<16x1xf32, #tpu.memory_space<vmem>>, %arg6: memref<9x16x16xf32, #tpu.memory_space<vmem>>, %arg7: memref<16x1xf32, #tpu.memory_space<vmem>>, %arg8: memref<9x3x16xf32, #tpu.memory_space<vmem>>, %arg9: memref<9x3x16xf32, #tpu.memory_space<vmem>>, %arg10: memref<9x3x16xf32, #tpu.memory_space<vmem>>, %arg11: memref<9x3x3xf32, #tpu.memory_space<vmem>>, %arg12: memref<3x1xf32, #tpu.memory_space<vmem>>, %arg13: memref<1x3x288xf32, #tpu.memory_space<vmem>>, %arg14: memref<16x342xf32, #tpu.memory_space<vmem>>, %arg15: memref<16x342xf32, #tpu.memory_space<vmem>>, %arg16: memref<16x342xf32, #tpu.memory_space<vmem>>) attributes {dimension_semantics = [#tpu.dimension_semantics<parallel>], iteration_bounds = array<i64: 2>, scalar_prefetch = 0 : i64, scratch_operands = 3 : i64, tpu.core_type = #tpu.core_type<tc>, window_params = [{transform_indices = @transform_0, window_bounds = array<i64: 1, 3, 342>}, {pipeline_mode = #tpu.pipeline_mode<synchronous>, transform_indices = @transform_1, window_bounds = array<i64: 9, 16, 3>}, {pipeline_mode = #tpu.pipeline_mode<synchronous>, transform_indices = @transform_2, window_bounds = array<i64: 16, 1>}, {pipeline_mode = #tpu.pipeline_mode<synchronous>, transform_indices = @transform_3, window_bounds = array<i64: 9, 16, 16>}, {pipeline_mode = #tpu.pipeline_mode<synchronous>, transform_indices = @transform_4, window_bounds = array<i64: 16, 1>}, {pipeline_mode = #tpu.pipeline_mode<synchronous>, transform_indices = @transform_5, window_bounds = array<i64: 9, 16, 16>}, {pipeline_mode = #tpu.pipeline_mode<synchronous>, transform_indices = @transform_6, window_bounds = array<i64: 16, 1>}, {pipeline_mode = #tpu.pipeline_mode<synchronous>, transform_indices = @transform_7, window_bounds = array<i64: 9, 3, 16>}, {pipeline_mode = #tpu.pipeline_mode<synchronous>, transform_indices = @transform_8, window_bounds = array<i64: 9, 3, 16>}, {pipeline_mode = #tpu.pipeline_mode<synchronous>, transform_indices = @transform_9, window_bounds = array<i64: 9, 3, 16>}, {pipeline_mode = #tpu.pipeline_mode<synchronous>, transform_indices = @transform_10, window_bounds = array<i64: 9, 3, 3>}, {pipeline_mode = #tpu.pipeline_mode<synchronous>, transform_indices = @transform_11, window_bounds = array<i64: 3, 1>}, {transform_indices = @transform_12, window_bounds = array<i64: 1, 3, 288>}]} {
    %0 = tpu.iota {dimensions = array<i32: 1>} : vector<1x288xi32>
    %c18_i32 = arith.constant 18 : i32
    %c0_i32 = arith.constant 0 : i32
    %1 = arith.cmpi eq, %c18_i32, %c0_i32 : i32
    %c1_i32 = arith.constant 1 : i32
    %2 = arith.select %1, %c1_i32, %c18_i32 : i32
    %3 = vector.broadcast %2 : i32 to vector<1x288xi32>
    %4 = arith.remsi %0, %3 : vector<1x288xi32>
    %c0_i32_0 = arith.constant 0 : i32
    %5 = vector.broadcast %c0_i32_0 : i32 to vector<1x288xi32>
    %6 = arith.cmpi ne, %4, %5 : vector<1x288xi32>
    %c0_i32_1 = arith.constant 0 : i32
    %7 = vector.broadcast %c0_i32_1 : i32 to vector<1x288xi32>
    %8 = arith.cmpi slt, %4, %7 : vector<1x288xi32>
    %c0_i32_2 = arith.constant 0 : i32
    %9 = arith.cmpi slt, %2, %c0_i32_2 : i32
    %10 = vector.broadcast %9 : i1 to vector<1x288xi1>
    %11 = vector.broadcast %10 : vector<1x288xi1> to vector<1x288xi1>
    %12 = arith.xori %8, %11 : vector<1x288xi1>
    %13 = arith.andi %12, %6 : vector<1x288xi1>
    %14 = vector.broadcast %2 : i32 to vector<1x288xi32>
    %15 = arith.addi %4, %14 : vector<1x288xi32>
    %16 = arith.select %13, %15, %4 : vector<1x288xi1>, vector<1x288xi32>
    %c16_i32 = arith.constant 16 : i32
    %17 = vector.broadcast %c16_i32 : i32 to vector<1x288xi32>
    %18 = arith.cmpi slt, %16, %17 : vector<1x288xi32>
    %c0 = arith.constant 0 : index
    %c0_3 = arith.constant 0 : index
    %c0_4 = arith.constant 0 : index
    %19 = vector.load %arg2[%c0, %c0_3, %c0_4] : memref<9x16x3xf32, #tpu.memory_space<vmem>>, vector<1x16x3xf32>
    %20 = vector.shape_cast %19 : vector<1x16x3xf32> to vector<16x3xf32>
    %c0_5 = arith.constant 0 : index
    %c0_6 = arith.constant 0 : index
    %c0_7 = arith.constant 0 : index
    %21 = vector.load %arg1[%c0_5, %c0_6, %c0_7] : memref<1x3x342xf32, #tpu.memory_space<vmem>>, vector<1x3x288xf32>
    %22 = vector.shape_cast %21 : vector<1x3x288xf32> to vector<3x288xf32>
    %cst = arith.constant dense<0.000000e+00> : vector<16x288xf32>
    %23 = tpu.matmul %20, %22, %cst {dimension_numbers = #tpu.dot_dimension_numbers<[1], [0], [0], [1], [0, 0, 1, 1], [], []>} : vector<16x3xf32>, vector<3x288xf32>, vector<16x288xf32> -> vector<16x288xf32>
    %c1 = arith.constant 1 : index
    %c0_8 = arith.constant 0 : index
    %c0_9 = arith.constant 0 : index
    %24 = vector.load %arg2[%c1, %c0_8, %c0_9] : memref<9x16x3xf32, #tpu.memory_space<vmem>>, vector<1x16x3xf32>
    %25 = vector.shape_cast %24 : vector<1x16x3xf32> to vector<16x3xf32>
    %c0_10 = arith.constant 0 : index
    %c0_11 = arith.constant 0 : index
    %c1_12 = arith.constant 1 : index
    %26 = vector.load %arg1[%c0_10, %c0_11, %c1_12] : memref<1x3x342xf32, #tpu.memory_space<vmem>>, vector<1x3x288xf32>
    %27 = vector.shape_cast %26 : vector<1x3x288xf32> to vector<3x288xf32>
    %cst_13 = arith.constant dense<0.000000e+00> : vector<16x288xf32>
    %28 = tpu.matmul %25, %27, %cst_13 {dimension_numbers = #tpu.dot_dimension_numbers<[1], [0], [0], [1], [0, 0, 1, 1], [], []>} : vector<16x3xf32>, vector<3x288xf32>, vector<16x288xf32> -> vector<16x288xf32>
    %29 = arith.addf %23, %28 : vector<16x288xf32>
    %c2 = arith.constant 2 : index
    %c0_14 = arith.constant 0 : index
    %c0_15 = arith.constant 0 : index
    %30 = vector.load %arg2[%c2, %c0_14, %c0_15] : memref<9x16x3xf32, #tpu.memory_space<vmem>>, vector<1x16x3xf32>
    %31 = vector.shape_cast %30 : vector<1x16x3xf32> to vector<16x3xf32>
    %c0_16 = arith.constant 0 : index
    %c0_17 = arith.constant 0 : index
    %c2_18 = arith.constant 2 : index
    %32 = vector.load %arg1[%c0_16, %c0_17, %c2_18] : memref<1x3x342xf32, #tpu.memory_space<vmem>>, vector<1x3x288xf32>
    %33 = vector.shape_cast %32 : vector<1x3x288xf32> to vector<3x288xf32>
    %cst_19 = arith.constant dense<0.000000e+00> : vector<16x288xf32>
    %34 = tpu.matmul %31, %33, %cst_19 {dimension_numbers = #tpu.dot_dimension_numbers<[1], [0], [0], [1], [0, 0, 1, 1], [], []>} : vector<16x3xf32>, vector<3x288xf32>, vector<16x288xf32> -> vector<16x288xf32>
    %35 = arith.addf %29, %34 : vector<16x288xf32>
    %c3 = arith.constant 3 : index
    %c0_20 = arith.constant 0 : index
    %c0_21 = arith.constant 0 : index
    %36 = vector.load %arg2[%c3, %c0_20, %c0_21] : memref<9x16x3xf32, #tpu.memory_space<vmem>>, vector<1x16x3xf32>
    %37 = vector.shape_cast %36 : vector<1x16x3xf32> to vector<16x3xf32>
    %c0_22 = arith.constant 0 : index
    %c0_23 = arith.constant 0 : index
    %c18 = arith.constant 18 : index
    %38 = vector.load %arg1[%c0_22, %c0_23, %c18] : memref<1x3x342xf32, #tpu.memory_space<vmem>>, vector<1x3x288xf32>
    %39 = vector.shape_cast %38 : vector<1x3x288xf32> to vector<3x288xf32>
    %cst_24 = arith.constant dense<0.000000e+00> : vector<16x288xf32>
    %40 = tpu.matmul %37, %39, %cst_24 {dimension_numbers = #tpu.dot_dimension_numbers<[1], [0], [0], [1], [0, 0, 1, 1], [], []>} : vector<16x3xf32>, vector<3x288xf32>, vector<16x288xf32> -> vector<16x288xf32>
    %41 = arith.addf %35, %40 : vector<16x288xf32>
    %c4 = arith.constant 4 : index
    %c0_25 = arith.constant 0 : index
    %c0_26 = arith.constant 0 : index
    %42 = vector.load %arg2[%c4, %c0_25, %c0_26] : memref<9x16x3xf32, #tpu.memory_space<vmem>>, vector<1x16x3xf32>
    %43 = vector.shape_cast %42 : vector<1x16x3xf32> to vector<16x3xf32>
    %c0_27 = arith.constant 0 : index
    %c0_28 = arith.constant 0 : index
    %c19 = arith.constant 19 : index
    %44 = vector.load %arg1[%c0_27, %c0_28, %c19] : memref<1x3x342xf32, #tpu.memory_space<vmem>>, vector<1x3x288xf32>
    %45 = vector.shape_cast %44 : vector<1x3x288xf32> to vector<3x288xf32>
    %cst_29 = arith.constant dense<0.000000e+00> : vector<16x288xf32>
    %46 = tpu.matmul %43, %45, %cst_29 {dimension_numbers = #tpu.dot_dimension_numbers<[1], [0], [0], [1], [0, 0, 1, 1], [], []>} : vector<16x3xf32>, vector<3x288xf32>, vector<16x288xf32> -> vector<16x288xf32>
    %47 = arith.addf %41, %46 : vector<16x288xf32>
    %c5 = arith.constant 5 : index
    %c0_30 = arith.constant 0 : index
    %c0_31 = arith.constant 0 : index
    %48 = vector.load %arg2[%c5, %c0_30, %c0_31] : memref<9x16x3xf32, #tpu.memory_space<vmem>>, vector<1x16x3xf32>
    %49 = vector.shape_cast %48 : vector<1x16x3xf32> to vector<16x3xf32>
    %c0_32 = arith.constant 0 : index
    %c0_33 = arith.constant 0 : index
    %c20 = arith.constant 20 : index
    %50 = vector.load %arg1[%c0_32, %c0_33, %c20] : memref<1x3x342xf32, #tpu.memory_space<vmem>>, vector<1x3x288xf32>
    %51 = vector.shape_cast %50 : vector<1x3x288xf32> to vector<3x288xf32>
    %cst_34 = arith.constant dense<0.000000e+00> : vector<16x288xf32>
    %52 = tpu.matmul %49, %51, %cst_34 {dimension_numbers = #tpu.dot_dimension_numbers<[1], [0], [0], [1], [0, 0, 1, 1], [], []>} : vector<16x3xf32>, vector<3x288xf32>, vector<16x288xf32> -> vector<16x288xf32>
    %53 = arith.addf %47, %52 : vector<16x288xf32>
    %c6 = arith.constant 6 : index
    %c0_35 = arith.constant 0 : index
    %c0_36 = arith.constant 0 : index
    %54 = vector.load %arg2[%c6, %c0_35, %c0_36] : memref<9x16x3xf32, #tpu.memory_space<vmem>>, vector<1x16x3xf32>
    %55 = vector.shape_cast %54 : vector<1x16x3xf32> to vector<16x3xf32>
    %c0_37 = arith.constant 0 : index
    %c0_38 = arith.constant 0 : index
    %c36 = arith.constant 36 : index
    %56 = vector.load %arg1[%c0_37, %c0_38, %c36] : memref<1x3x342xf32, #tpu.memory_space<vmem>>, vector<1x3x288xf32>
    %57 = vector.shape_cast %56 : vector<1x3x288xf32> to vector<3x288xf32>
    %cst_39 = arith.constant dense<0.000000e+00> : vector<16x288xf32>
    %58 = tpu.matmul %55, %57, %cst_39 {dimension_numbers = #tpu.dot_dimension_numbers<[1], [0], [0], [1], [0, 0, 1, 1], [], []>} : vector<16x3xf32>, vector<3x288xf32>, vector<16x288xf32> -> vector<16x288xf32>
    %59 = arith.addf %53, %58 : vector<16x288xf32>
    %c7 = arith.constant 7 : index
    %c0_40 = arith.constant 0 : index
    %c0_41 = arith.constant 0 : index
    %60 = vector.load %arg2[%c7, %c0_40, %c0_41] : memref<9x16x3xf32, #tpu.memory_space<vmem>>, vector<1x16x3xf32>
    %61 = vector.shape_cast %60 : vector<1x16x3xf32> to vector<16x3xf32>
    %c0_42 = arith.constant 0 : index
    %c0_43 = arith.constant 0 : index
    %c37 = arith.constant 37 : index
    %62 = vector.load %arg1[%c0_42, %c0_43, %c37] : memref<1x3x342xf32, #tpu.memory_space<vmem>>, vector<1x3x288xf32>
    %63 = vector.shape_cast %62 : vector<1x3x288xf32> to vector<3x288xf32>
    %cst_44 = arith.constant dense<0.000000e+00> : vector<16x288xf32>
    %64 = tpu.matmul %61, %63, %cst_44 {dimension_numbers = #tpu.dot_dimension_numbers<[1], [0], [0], [1], [0, 0, 1, 1], [], []>} : vector<16x3xf32>, vector<3x288xf32>, vector<16x288xf32> -> vector<16x288xf32>
    %65 = arith.addf %59, %64 : vector<16x288xf32>
    %c8 = arith.constant 8 : index
    %c0_45 = arith.constant 0 : index
    %c0_46 = arith.constant 0 : index
    %66 = vector.load %arg2[%c8, %c0_45, %c0_46] : memref<9x16x3xf32, #tpu.memory_space<vmem>>, vector<1x16x3xf32>
    %67 = vector.shape_cast %66 : vector<1x16x3xf32> to vector<16x3xf32>
    %c0_47 = arith.constant 0 : index
    %c0_48 = arith.constant 0 : index
    %c38 = arith.constant 38 : index
    %68 = vector.load %arg1[%c0_47, %c0_48, %c38] : memref<1x3x342xf32, #tpu.memory_space<vmem>>, vector<1x3x288xf32>
    %69 = vector.shape_cast %68 : vector<1x3x288xf32> to vector<3x288xf32>
    %cst_49 = arith.constant dense<0.000000e+00> : vector<16x288xf32>
    %70 = tpu.matmul %67, %69, %cst_49 {dimension_numbers = #tpu.dot_dimension_numbers<[1], [0], [0], [1], [0, 0, 1, 1], [], []>} : vector<16x3xf32>, vector<3x288xf32>, vector<16x288xf32> -> vector<16x288xf32>
    %71 = arith.addf %65, %70 : vector<16x288xf32>
    %c0_50 = arith.constant 0 : index
    %c0_51 = arith.constant 0 : index
    %72 = vector.load %arg3[%c0_50, %c0_51] : memref<16x1xf32, #tpu.memory_space<vmem>>, vector<16x1xf32>
    %73 = vector.broadcast %72 : vector<16x1xf32> to vector<16x288xf32>
    %74 = arith.addf %71, %73 : vector<16x288xf32>
    %cst_52 = arith.constant 0.000000e+00 : f32
    %75 = vector.broadcast %cst_52 : f32 to vector<16x288xf32>
    %76 = arith.maximumf %74, %75 : vector<16x288xf32>
    %cst_53 = arith.constant 0.000000e+00 : f32
    %77 = vector.shape_cast %18 : vector<1x288xi1> to vector<1x288xi1>
    %78 = vector.broadcast %77 : vector<1x288xi1> to vector<16x288xi1>
    %79 = vector.broadcast %cst_53 : f32 to vector<16x288xf32>
    %80 = arith.select %78, %76, %79 : vector<16x288xi1>, vector<16x288xf32>
    %cst_54 = arith.constant 0.000000e+00 : f32
    %81 = vector.broadcast %cst_54 : f32 to vector<16x342xf32>
    %c0_55 = arith.constant 0 : index
    %c0_56 = arith.constant 0 : index
    %82 = vector.load %arg14[%c0_55, %c0_56] : memref<16x342xf32, #tpu.memory_space<vmem>>, vector<16x342xf32>
    tpu.vector_store %arg14[%c0_55, %c0_56], %81 {strides = array<i32>} : memref<16x342xf32, #tpu.memory_space<vmem>>, vector<16x342xf32>,
    %c0_57 = arith.constant 0 : index
    %c19_58 = arith.constant 19 : index
    %83 = vector.load %arg14[%c0_57, %c19_58] : memref<16x342xf32, #tpu.memory_space<vmem>>, vector<16x288xf32>
    tpu.vector_store %arg14[%c0_57, %c19_58], %80 {strides = array<i32>} : memref<16x342xf32, #tpu.memory_space<vmem>>, vector<16x288xf32>,
    %c0_59 = arith.constant 0 : index
    %c0_60 = arith.constant 0 : index
    %c0_61 = arith.constant 0 : index
    %84 = vector.load %arg4[%c0_59, %c0_60, %c0_61] : memref<9x16x16xf32, #tpu.memory_space<vmem>>, vector<1x16x16xf32>
    %85 = vector.shape_cast %84 : vector<1x16x16xf32> to vector<16x16xf32>
    %c0_62 = arith.constant 0 : index
    %c0_63 = arith.constant 0 : index
    %86 = vector.load %arg14[%c0_62, %c0_63] : memref<16x342xf32, #tpu.memory_space<vmem>>, vector<16x288xf32>
    %cst_64 = arith.constant dense<0.000000e+00> : vector<16x288xf32>
    %87 = tpu.matmul %85, %86, %cst_64 {dimension_numbers = #tpu.dot_dimension_numbers<[1], [0], [0], [1], [0, 0, 1, 1], [], []>} : vector<16x16xf32>, vector<16x288xf32>, vector<16x288xf32> -> vector<16x288xf32>
    %c1_65 = arith.constant 1 : index
    %c0_66 = arith.constant 0 : index
    %c0_67 = arith.constant 0 : index
    %88 = vector.load %arg4[%c1_65, %c0_66, %c0_67] : memref<9x16x16xf32, #tpu.memory_space<vmem>>, vector<1x16x16xf32>
    %89 = vector.shape_cast %88 : vector<1x16x16xf32> to vector<16x16xf32>
    %c0_68 = arith.constant 0 : index
    %c1_69 = arith.constant 1 : index
    %90 = vector.load %arg14[%c0_68, %c1_69] : memref<16x342xf32, #tpu.memory_space<vmem>>, vector<16x288xf32>
    %cst_70 = arith.constant dense<0.000000e+00> : vector<16x288xf32>
    %91 = tpu.matmul %89, %90, %cst_70 {dimension_numbers = #tpu.dot_dimension_numbers<[1], [0], [0], [1], [0, 0, 1, 1], [], []>} : vector<16x16xf32>, vector<16x288xf32>, vector<16x288xf32> -> vector<16x288xf32>
    %92 = arith.addf %87, %91 : vector<16x288xf32>
    %c2_71 = arith.constant 2 : index
    %c0_72 = arith.constant 0 : index
    %c0_73 = arith.constant 0 : index
    %93 = vector.load %arg4[%c2_71, %c0_72, %c0_73] : memref<9x16x16xf32, #tpu.memory_space<vmem>>, vector<1x16x16xf32>
    %94 = vector.shape_cast %93 : vector<1x16x16xf32> to vector<16x16xf32>
    %c0_74 = arith.constant 0 : index
    %c2_75 = arith.constant 2 : index
    %95 = vector.load %arg14[%c0_74, %c2_75] : memref<16x342xf32, #tpu.memory_space<vmem>>, vector<16x288xf32>
    %cst_76 = arith.constant dense<0.000000e+00> : vector<16x288xf32>
    %96 = tpu.matmul %94, %95, %cst_76 {dimension_numbers = #tpu.dot_dimension_numbers<[1], [0], [0], [1], [0, 0, 1, 1], [], []>} : vector<16x16xf32>, vector<16x288xf32>, vector<16x288xf32> -> vector<16x288xf32>
    %97 = arith.addf %92, %96 : vector<16x288xf32>
    %c3_77 = arith.constant 3 : index
    %c0_78 = arith.constant 0 : index
    %c0_79 = arith.constant 0 : index
    %98 = vector.load %arg4[%c3_77, %c0_78, %c0_79] : memref<9x16x16xf32, #tpu.memory_space<vmem>>, vector<1x16x16xf32>
    %99 = vector.shape_cast %98 : vector<1x16x16xf32> to vector<16x16xf32>
    %c0_80 = arith.constant 0 : index
    %c18_81 = arith.constant 18 : index
    %100 = vector.load %arg14[%c0_80, %c18_81] : memref<16x342xf32, #tpu.memory_space<vmem>>, vector<16x288xf32>
    %cst_82 = arith.constant dense<0.000000e+00> : vector<16x288xf32>
    %101 = tpu.matmul %99, %100, %cst_82 {dimension_numbers = #tpu.dot_dimension_numbers<[1], [0], [0], [1], [0, 0, 1, 1], [], []>} : vector<16x16xf32>, vector<16x288xf32>, vector<16x288xf32> -> vector<16x288xf32>
    %102 = arith.addf %97, %101 : vector<16x288xf32>
    %c4_83 = arith.constant 4 : index
    %c0_84 = arith.constant 0 : index
    %c0_85 = arith.constant 0 : index
    %103 = vector.load %arg4[%c4_83, %c0_84, %c0_85] : memref<9x16x16xf32, #tpu.memory_space<vmem>>, vector<1x16x16xf32>
    %104 = vector.shape_cast %103 : vector<1x16x16xf32> to vector<16x16xf32>
    %c0_86 = arith.constant 0 : index
    %c19_87 = arith.constant 19 : index
    %105 = vector.load %arg14[%c0_86, %c19_87] : memref<16x342xf32, #tpu.memory_space<vmem>>, vector<16x288xf32>
    %cst_88 = arith.constant dense<0.000000e+00> : vector<16x288xf32>
    %106 = tpu.matmul %104, %105, %cst_88 {dimension_numbers = #tpu.dot_dimension_numbers<[1], [0], [0], [1], [0, 0, 1, 1], [], []>} : vector<16x16xf32>, vector<16x288xf32>, vector<16x288xf32> -> vector<16x288xf32>
    %107 = arith.addf %102, %106 : vector<16x288xf32>
    %c5_89 = arith.constant 5 : index
    %c0_90 = arith.constant 0 : index
    %c0_91 = arith.constant 0 : index
    %108 = vector.load %arg4[%c5_89, %c0_90, %c0_91] : memref<9x16x16xf32, #tpu.memory_space<vmem>>, vector<1x16x16xf32>
    %109 = vector.shape_cast %108 : vector<1x16x16xf32> to vector<16x16xf32>
    %c0_92 = arith.constant 0 : index
    %c20_93 = arith.constant 20 : index
    %110 = vector.load %arg14[%c0_92, %c20_93] : memref<16x342xf32, #tpu.memory_space<vmem>>, vector<16x288xf32>
    %cst_94 = arith.constant dense<0.000000e+00> : vector<16x288xf32>
    %111 = tpu.matmul %109, %110, %cst_94 {dimension_numbers = #tpu.dot_dimension_numbers<[1], [0], [0], [1], [0, 0, 1, 1], [], []>} : vector<16x16xf32>, vector<16x288xf32>, vector<16x288xf32> -> vector<16x288xf32>
    %112 = arith.addf %107, %111 : vector<16x288xf32>
    %c6_95 = arith.constant 6 : index
    %c0_96 = arith.constant 0 : index
    %c0_97 = arith.constant 0 : index
    %113 = vector.load %arg4[%c6_95, %c0_96, %c0_97] : memref<9x16x16xf32, #tpu.memory_space<vmem>>, vector<1x16x16xf32>
    %114 = vector.shape_cast %113 : vector<1x16x16xf32> to vector<16x16xf32>
    %c0_98 = arith.constant 0 : index
    %c36_99 = arith.constant 36 : index
    %115 = vector.load %arg14[%c0_98, %c36_99] : memref<16x342xf32, #tpu.memory_space<vmem>>, vector<16x288xf32>
    %cst_100 = arith.constant dense<0.000000e+00> : vector<16x288xf32>
    %116 = tpu.matmul %114, %115, %cst_100 {dimension_numbers = #tpu.dot_dimension_numbers<[1], [0], [0], [1], [0, 0, 1, 1], [], []>} : vector<16x16xf32>, vector<16x288xf32>, vector<16x288xf32> -> vector<16x288xf32>
    %117 = arith.addf %112, %116 : vector<16x288xf32>
    %c7_101 = arith.constant 7 : index
    %c0_102 = arith.constant 0 : index
    %c0_103 = arith.constant 0 : index
    %118 = vector.load %arg4[%c7_101, %c0_102, %c0_103] : memref<9x16x16xf32, #tpu.memory_space<vmem>>, vector<1x16x16xf32>
    %119 = vector.shape_cast %118 : vector<1x16x16xf32> to vector<16x16xf32>
    %c0_104 = arith.constant 0 : index
    %c37_105 = arith.constant 37 : index
    %120 = vector.load %arg14[%c0_104, %c37_105] : memref<16x342xf32, #tpu.memory_space<vmem>>, vector<16x288xf32>
    %cst_106 = arith.constant dense<0.000000e+00> : vector<16x288xf32>
    %121 = tpu.matmul %119, %120, %cst_106 {dimension_numbers = #tpu.dot_dimension_numbers<[1], [0], [0], [1], [0, 0, 1, 1], [], []>} : vector<16x16xf32>, vector<16x288xf32>, vector<16x288xf32> -> vector<16x288xf32>
    %122 = arith.addf %117, %121 : vector<16x288xf32>
    %c8_107 = arith.constant 8 : index
    %c0_108 = arith.constant 0 : index
    %c0_109 = arith.constant 0 : index
    %123 = vector.load %arg4[%c8_107, %c0_108, %c0_109] : memref<9x16x16xf32, #tpu.memory_space<vmem>>, vector<1x16x16xf32>
    %124 = vector.shape_cast %123 : vector<1x16x16xf32> to vector<16x16xf32>
    %c0_110 = arith.constant 0 : index
    %c38_111 = arith.constant 38 : index
    %125 = vector.load %arg14[%c0_110, %c38_111] : memref<16x342xf32, #tpu.memory_space<vmem>>, vector<16x288xf32>
    %cst_112 = arith.constant dense<0.000000e+00> : vector<16x288xf32>
    %126 = tpu.matmul %124, %125, %cst_112 {dimension_numbers = #tpu.dot_dimension_numbers<[1], [0], [0], [1], [0, 0, 1, 1], [], []>} : vector<16x16xf32>, vector<16x288xf32>, vector<16x288xf32> -> vector<16x288xf32>
    %127 = arith.addf %122, %126 : vector<16x288xf32>
    %c0_113 = arith.constant 0 : index
    %c0_114 = arith.constant 0 : index
    %128 = vector.load %arg5[%c0_113, %c0_114] : memref<16x1xf32, #tpu.memory_space<vmem>>, vector<16x1xf32>
    %129 = vector.broadcast %128 : vector<16x1xf32> to vector<16x288xf32>
    %130 = arith.addf %127, %129 : vector<16x288xf32>
    %cst_115 = arith.constant 0.000000e+00 : f32
    %131 = vector.broadcast %cst_115 : f32 to vector<16x288xf32>
    %132 = arith.maximumf %130, %131 : vector<16x288xf32>
    %cst_116 = arith.constant 0.000000e+00 : f32
    %133 = vector.shape_cast %18 : vector<1x288xi1> to vector<1x288xi1>
    %134 = vector.broadcast %133 : vector<1x288xi1> to vector<16x288xi1>
    %135 = vector.broadcast %cst_116 : f32 to vector<16x288xf32>
    %136 = arith.select %134, %132, %135 : vector<16x288xi1>, vector<16x288xf32>
    %cst_117 = arith.constant 0.000000e+00 : f32
    %137 = vector.broadcast %cst_117 : f32 to vector<16x342xf32>
    %c0_118 = arith.constant 0 : index
    %c0_119 = arith.constant 0 : index
    %138 = vector.load %arg15[%c0_118, %c0_119] : memref<16x342xf32, #tpu.memory_space<vmem>>, vector<16x342xf32>
    tpu.vector_store %arg15[%c0_118, %c0_119], %137 {strides = array<i32>} : memref<16x342xf32, #tpu.memory_space<vmem>>, vector<16x342xf32>,
    %c0_120 = arith.constant 0 : index
    %c19_121 = arith.constant 19 : index
    %139 = vector.load %arg15[%c0_120, %c19_121] : memref<16x342xf32, #tpu.memory_space<vmem>>, vector<16x288xf32>
    tpu.vector_store %arg15[%c0_120, %c19_121], %136 {strides = array<i32>} : memref<16x342xf32, #tpu.memory_space<vmem>>, vector<16x288xf32>,
    %c0_122 = arith.constant 0 : index
    %c0_123 = arith.constant 0 : index
    %c0_124 = arith.constant 0 : index
    %140 = vector.load %arg6[%c0_122, %c0_123, %c0_124] : memref<9x16x16xf32, #tpu.memory_space<vmem>>, vector<1x16x16xf32>
    %141 = vector.shape_cast %140 : vector<1x16x16xf32> to vector<16x16xf32>
    %c0_125 = arith.constant 0 : index
    %c0_126 = arith.constant 0 : index
    %142 = vector.load %arg15[%c0_125, %c0_126] : memref<16x342xf32, #tpu.memory_space<vmem>>, vector<16x288xf32>
    %cst_127 = arith.constant dense<0.000000e+00> : vector<16x288xf32>
    %143 = tpu.matmul %141, %142, %cst_127 {dimension_numbers = #tpu.dot_dimension_numbers<[1], [0], [0], [1], [0, 0, 1, 1], [], []>} : vector<16x16xf32>, vector<16x288xf32>, vector<16x288xf32> -> vector<16x288xf32>
    %c1_128 = arith.constant 1 : index
    %c0_129 = arith.constant 0 : index
    %c0_130 = arith.constant 0 : index
    %144 = vector.load %arg6[%c1_128, %c0_129, %c0_130] : memref<9x16x16xf32, #tpu.memory_space<vmem>>, vector<1x16x16xf32>
    %145 = vector.shape_cast %144 : vector<1x16x16xf32> to vector<16x16xf32>
    %c0_131 = arith.constant 0 : index
    %c1_132 = arith.constant 1 : index
    %146 = vector.load %arg15[%c0_131, %c1_132] : memref<16x342xf32, #tpu.memory_space<vmem>>, vector<16x288xf32>
    %cst_133 = arith.constant dense<0.000000e+00> : vector<16x288xf32>
    %147 = tpu.matmul %145, %146, %cst_133 {dimension_numbers = #tpu.dot_dimension_numbers<[1], [0], [0], [1], [0, 0, 1, 1], [], []>} : vector<16x16xf32>, vector<16x288xf32>, vector<16x288xf32> -> vector<16x288xf32>
    %148 = arith.addf %143, %147 : vector<16x288xf32>
    %c2_134 = arith.constant 2 : index
    %c0_135 = arith.constant 0 : index
    %c0_136 = arith.constant 0 : index
    %149 = vector.load %arg6[%c2_134, %c0_135, %c0_136] : memref<9x16x16xf32, #tpu.memory_space<vmem>>, vector<1x16x16xf32>
    %150 = vector.shape_cast %149 : vector<1x16x16xf32> to vector<16x16xf32>
    %c0_137 = arith.constant 0 : index
    %c2_138 = arith.constant 2 : index
    %151 = vector.load %arg15[%c0_137, %c2_138] : memref<16x342xf32, #tpu.memory_space<vmem>>, vector<16x288xf32>
    %cst_139 = arith.constant dense<0.000000e+00> : vector<16x288xf32>
    %152 = tpu.matmul %150, %151, %cst_139 {dimension_numbers = #tpu.dot_dimension_numbers<[1], [0], [0], [1], [0, 0, 1, 1], [], []>} : vector<16x16xf32>, vector<16x288xf32>, vector<16x288xf32> -> vector<16x288xf32>
    %153 = arith.addf %148, %152 : vector<16x288xf32>
    %c3_140 = arith.constant 3 : index
    %c0_141 = arith.constant 0 : index
    %c0_142 = arith.constant 0 : index
    %154 = vector.load %arg6[%c3_140, %c0_141, %c0_142] : memref<9x16x16xf32, #tpu.memory_space<vmem>>, vector<1x16x16xf32>
    %155 = vector.shape_cast %154 : vector<1x16x16xf32> to vector<16x16xf32>
    %c0_143 = arith.constant 0 : index
    %c18_144 = arith.constant 18 : index
    %156 = vector.load %arg15[%c0_143, %c18_144] : memref<16x342xf32, #tpu.memory_space<vmem>>, vector<16x288xf32>
    %cst_145 = arith.constant dense<0.000000e+00> : vector<16x288xf32>
    %157 = tpu.matmul %155, %156, %cst_145 {dimension_numbers = #tpu.dot_dimension_numbers<[1], [0], [0], [1], [0, 0, 1, 1], [], []>} : vector<16x16xf32>, vector<16x288xf32>, vector<16x288xf32> -> vector<16x288xf32>
    %158 = arith.addf %153, %157 : vector<16x288xf32>
    %c4_146 = arith.constant 4 : index
    %c0_147 = arith.constant 0 : index
    %c0_148 = arith.constant 0 : index
    %159 = vector.load %arg6[%c4_146, %c0_147, %c0_148] : memref<9x16x16xf32, #tpu.memory_space<vmem>>, vector<1x16x16xf32>
    %160 = vector.shape_cast %159 : vector<1x16x16xf32> to vector<16x16xf32>
    %c0_149 = arith.constant 0 : index
    %c19_150 = arith.constant 19 : index
    %161 = vector.load %arg15[%c0_149, %c19_150] : memref<16x342xf32, #tpu.memory_space<vmem>>, vector<16x288xf32>
    %cst_151 = arith.constant dense<0.000000e+00> : vector<16x288xf32>
    %162 = tpu.matmul %160, %161, %cst_151 {dimension_numbers = #tpu.dot_dimension_numbers<[1], [0], [0], [1], [0, 0, 1, 1], [], []>} : vector<16x16xf32>, vector<16x288xf32>, vector<16x288xf32> -> vector<16x288xf32>
    %163 = arith.addf %158, %162 : vector<16x288xf32>
    %c5_152 = arith.constant 5 : index
    %c0_153 = arith.constant 0 : index
    %c0_154 = arith.constant 0 : index
    %164 = vector.load %arg6[%c5_152, %c0_153, %c0_154] : memref<9x16x16xf32, #tpu.memory_space<vmem>>, vector<1x16x16xf32>
    %165 = vector.shape_cast %164 : vector<1x16x16xf32> to vector<16x16xf32>
    %c0_155 = arith.constant 0 : index
    %c20_156 = arith.constant 20 : index
    %166 = vector.load %arg15[%c0_155, %c20_156] : memref<16x342xf32, #tpu.memory_space<vmem>>, vector<16x288xf32>
    %cst_157 = arith.constant dense<0.000000e+00> : vector<16x288xf32>
    %167 = tpu.matmul %165, %166, %cst_157 {dimension_numbers = #tpu.dot_dimension_numbers<[1], [0], [0], [1], [0, 0, 1, 1], [], []>} : vector<16x16xf32>, vector<16x288xf32>, vector<16x288xf32> -> vector<16x288xf32>
    %168 = arith.addf %163, %167 : vector<16x288xf32>
    %c6_158 = arith.constant 6 : index
    %c0_159 = arith.constant 0 : index
    %c0_160 = arith.constant 0 : index
    %169 = vector.load %arg6[%c6_158, %c0_159, %c0_160] : memref<9x16x16xf32, #tpu.memory_space<vmem>>, vector<1x16x16xf32>
    %170 = vector.shape_cast %169 : vector<1x16x16xf32> to vector<16x16xf32>
    %c0_161 = arith.constant 0 : index
    %c36_162 = arith.constant 36 : index
    %171 = vector.load %arg15[%c0_161, %c36_162] : memref<16x342xf32, #tpu.memory_space<vmem>>, vector<16x288xf32>
    %cst_163 = arith.constant dense<0.000000e+00> : vector<16x288xf32>
    %172 = tpu.matmul %170, %171, %cst_163 {dimension_numbers = #tpu.dot_dimension_numbers<[1], [0], [0], [1], [0, 0, 1, 1], [], []>} : vector<16x16xf32>, vector<16x288xf32>, vector<16x288xf32> -> vector<16x288xf32>
    %173 = arith.addf %168, %172 : vector<16x288xf32>
    %c7_164 = arith.constant 7 : index
    %c0_165 = arith.constant 0 : index
    %c0_166 = arith.constant 0 : index
    %174 = vector.load %arg6[%c7_164, %c0_165, %c0_166] : memref<9x16x16xf32, #tpu.memory_space<vmem>>, vector<1x16x16xf32>
    %175 = vector.shape_cast %174 : vector<1x16x16xf32> to vector<16x16xf32>
    %c0_167 = arith.constant 0 : index
    %c37_168 = arith.constant 37 : index
    %176 = vector.load %arg15[%c0_167, %c37_168] : memref<16x342xf32, #tpu.memory_space<vmem>>, vector<16x288xf32>
    %cst_169 = arith.constant dense<0.000000e+00> : vector<16x288xf32>
    %177 = tpu.matmul %175, %176, %cst_169 {dimension_numbers = #tpu.dot_dimension_numbers<[1], [0], [0], [1], [0, 0, 1, 1], [], []>} : vector<16x16xf32>, vector<16x288xf32>, vector<16x288xf32> -> vector<16x288xf32>
    %178 = arith.addf %173, %177 : vector<16x288xf32>
    %c8_170 = arith.constant 8 : index
    %c0_171 = arith.constant 0 : index
    %c0_172 = arith.constant 0 : index
    %179 = vector.load %arg6[%c8_170, %c0_171, %c0_172] : memref<9x16x16xf32, #tpu.memory_space<vmem>>, vector<1x16x16xf32>
    %180 = vector.shape_cast %179 : vector<1x16x16xf32> to vector<16x16xf32>
    %c0_173 = arith.constant 0 : index
    %c38_174 = arith.constant 38 : index
    %181 = vector.load %arg15[%c0_173, %c38_174] : memref<16x342xf32, #tpu.memory_space<vmem>>, vector<16x288xf32>
    %cst_175 = arith.constant dense<0.000000e+00> : vector<16x288xf32>
    %182 = tpu.matmul %180, %181, %cst_175 {dimension_numbers = #tpu.dot_dimension_numbers<[1], [0], [0], [1], [0, 0, 1, 1], [], []>} : vector<16x16xf32>, vector<16x288xf32>, vector<16x288xf32> -> vector<16x288xf32>
    %183 = arith.addf %178, %182 : vector<16x288xf32>
    %c0_176 = arith.constant 0 : index
    %c0_177 = arith.constant 0 : index
    %184 = vector.load %arg7[%c0_176, %c0_177] : memref<16x1xf32, #tpu.memory_space<vmem>>, vector<16x1xf32>
    %185 = vector.broadcast %184 : vector<16x1xf32> to vector<16x288xf32>
    %186 = arith.addf %183, %185 : vector<16x288xf32>
    %cst_178 = arith.constant 0.000000e+00 : f32
    %187 = vector.broadcast %cst_178 : f32 to vector<16x288xf32>
    %188 = arith.maximumf %186, %187 : vector<16x288xf32>
    %cst_179 = arith.constant 0.000000e+00 : f32
    %189 = vector.shape_cast %18 : vector<1x288xi1> to vector<1x288xi1>
    %190 = vector.broadcast %189 : vector<1x288xi1> to vector<16x288xi1>
    %191 = vector.broadcast %cst_179 : f32 to vector<16x288xf32>
    %192 = arith.select %190, %188, %191 : vector<16x288xi1>, vector<16x288xf32>
    %cst_180 = arith.constant 0.000000e+00 : f32
    %193 = vector.broadcast %cst_180 : f32 to vector<16x342xf32>
    %c0_181 = arith.constant 0 : index
    %c0_182 = arith.constant 0 : index
    %194 = vector.load %arg16[%c0_181, %c0_182] : memref<16x342xf32, #tpu.memory_space<vmem>>, vector<16x342xf32>
    tpu.vector_store %arg16[%c0_181, %c0_182], %193 {strides = array<i32>} : memref<16x342xf32, #tpu.memory_space<vmem>>, vector<16x342xf32>,
    %c0_183 = arith.constant 0 : index
    %c19_184 = arith.constant 19 : index
    %195 = vector.load %arg16[%c0_183, %c19_184] : memref<16x342xf32, #tpu.memory_space<vmem>>, vector<16x288xf32>
    tpu.vector_store %arg16[%c0_183, %c19_184], %192 {strides = array<i32>} : memref<16x342xf32, #tpu.memory_space<vmem>>, vector<16x288xf32>,
    %c0_185 = arith.constant 0 : index
    %c0_186 = arith.constant 0 : index
    %c0_187 = arith.constant 0 : index
    %196 = vector.load %arg8[%c0_185, %c0_186, %c0_187] : memref<9x3x16xf32, #tpu.memory_space<vmem>>, vector<1x3x16xf32>
    %197 = vector.shape_cast %196 : vector<1x3x16xf32> to vector<3x16xf32>
    %c0_188 = arith.constant 0 : index
    %c0_189 = arith.constant 0 : index
    %198 = vector.load %arg14[%c0_188, %c0_189] : memref<16x342xf32, #tpu.memory_space<vmem>>, vector<16x288xf32>
    %cst_190 = arith.constant dense<0.000000e+00> : vector<3x288xf32>
    %199 = tpu.matmul %197, %198, %cst_190 {dimension_numbers = #tpu.dot_dimension_numbers<[1], [0], [0], [1], [0, 0, 1, 1], [], []>} : vector<3x16xf32>, vector<16x288xf32>, vector<3x288xf32> -> vector<3x288xf32>
    %c1_191 = arith.constant 1 : index
    %c0_192 = arith.constant 0 : index
    %c0_193 = arith.constant 0 : index
    %200 = vector.load %arg8[%c1_191, %c0_192, %c0_193] : memref<9x3x16xf32, #tpu.memory_space<vmem>>, vector<1x3x16xf32>
    %201 = vector.shape_cast %200 : vector<1x3x16xf32> to vector<3x16xf32>
    %c0_194 = arith.constant 0 : index
    %c1_195 = arith.constant 1 : index
    %202 = vector.load %arg14[%c0_194, %c1_195] : memref<16x342xf32, #tpu.memory_space<vmem>>, vector<16x288xf32>
    %cst_196 = arith.constant dense<0.000000e+00> : vector<3x288xf32>
    %203 = tpu.matmul %201, %202, %cst_196 {dimension_numbers = #tpu.dot_dimension_numbers<[1], [0], [0], [1], [0, 0, 1, 1], [], []>} : vector<3x16xf32>, vector<16x288xf32>, vector<3x288xf32> -> vector<3x288xf32>
    %204 = arith.addf %199, %203 : vector<3x288xf32>
    %c2_197 = arith.constant 2 : index
    %c0_198 = arith.constant 0 : index
    %c0_199 = arith.constant 0 : index
    %205 = vector.load %arg8[%c2_197, %c0_198, %c0_199] : memref<9x3x16xf32, #tpu.memory_space<vmem>>, vector<1x3x16xf32>
    %206 = vector.shape_cast %205 : vector<1x3x16xf32> to vector<3x16xf32>
    %c0_200 = arith.constant 0 : index
    %c2_201 = arith.constant 2 : index
    %207 = vector.load %arg14[%c0_200, %c2_201] : memref<16x342xf32, #tpu.memory_space<vmem>>, vector<16x288xf32>
    %cst_202 = arith.constant dense<0.000000e+00> : vector<3x288xf32>
    %208 = tpu.matmul %206, %207, %cst_202 {dimension_numbers = #tpu.dot_dimension_numbers<[1], [0], [0], [1], [0, 0, 1, 1], [], []>} : vector<3x16xf32>, vector<16x288xf32>, vector<3x288xf32> -> vector<3x288xf32>
    %209 = arith.addf %204, %208 : vector<3x288xf32>
    %c3_203 = arith.constant 3 : index
    %c0_204 = arith.constant 0 : index
    %c0_205 = arith.constant 0 : index
    %210 = vector.load %arg8[%c3_203, %c0_204, %c0_205] : memref<9x3x16xf32, #tpu.memory_space<vmem>>, vector<1x3x16xf32>
    %211 = vector.shape_cast %210 : vector<1x3x16xf32> to vector<3x16xf32>
    %c0_206 = arith.constant 0 : index
    %c18_207 = arith.constant 18 : index
    %212 = vector.load %arg14[%c0_206, %c18_207] : memref<16x342xf32, #tpu.memory_space<vmem>>, vector<16x288xf32>
    %cst_208 = arith.constant dense<0.000000e+00> : vector<3x288xf32>
    %213 = tpu.matmul %211, %212, %cst_208 {dimension_numbers = #tpu.dot_dimension_numbers<[1], [0], [0], [1], [0, 0, 1, 1], [], []>} : vector<3x16xf32>, vector<16x288xf32>, vector<3x288xf32> -> vector<3x288xf32>
    %214 = arith.addf %209, %213 : vector<3x288xf32>
    %c4_209 = arith.constant 4 : index
    %c0_210 = arith.constant 0 : index
    %c0_211 = arith.constant 0 : index
    %215 = vector.load %arg8[%c4_209, %c0_210, %c0_211] : memref<9x3x16xf32, #tpu.memory_space<vmem>>, vector<1x3x16xf32>
    %216 = vector.shape_cast %215 : vector<1x3x16xf32> to vector<3x16xf32>
    %c0_212 = arith.constant 0 : index
    %c19_213 = arith.constant 19 : index
    %217 = vector.load %arg14[%c0_212, %c19_213] : memref<16x342xf32, #tpu.memory_space<vmem>>, vector<16x288xf32>
    %cst_214 = arith.constant dense<0.000000e+00> : vector<3x288xf32>
    %218 = tpu.matmul %216, %217, %cst_214 {dimension_numbers = #tpu.dot_dimension_numbers<[1], [0], [0], [1], [0, 0, 1, 1], [], []>} : vector<3x16xf32>, vector<16x288xf32>, vector<3x288xf32> -> vector<3x288xf32>
    %219 = arith.addf %214, %218 : vector<3x288xf32>
    %c5_215 = arith.constant 5 : index
    %c0_216 = arith.constant 0 : index
    %c0_217 = arith.constant 0 : index
    %220 = vector.load %arg8[%c5_215, %c0_216, %c0_217] : memref<9x3x16xf32, #tpu.memory_space<vmem>>, vector<1x3x16xf32>
    %221 = vector.shape_cast %220 : vector<1x3x16xf32> to vector<3x16xf32>
    %c0_218 = arith.constant 0 : index
    %c20_219 = arith.constant 20 : index
    %222 = vector.load %arg14[%c0_218, %c20_219] : memref<16x342xf32, #tpu.memory_space<vmem>>, vector<16x288xf32>
    %cst_220 = arith.constant dense<0.000000e+00> : vector<3x288xf32>
    %223 = tpu.matmul %221, %222, %cst_220 {dimension_numbers = #tpu.dot_dimension_numbers<[1], [0], [0], [1], [0, 0, 1, 1], [], []>} : vector<3x16xf32>, vector<16x288xf32>, vector<3x288xf32> -> vector<3x288xf32>
    %224 = arith.addf %219, %223 : vector<3x288xf32>
    %c6_221 = arith.constant 6 : index
    %c0_222 = arith.constant 0 : index
    %c0_223 = arith.constant 0 : index
    %225 = vector.load %arg8[%c6_221, %c0_222, %c0_223] : memref<9x3x16xf32, #tpu.memory_space<vmem>>, vector<1x3x16xf32>
    %226 = vector.shape_cast %225 : vector<1x3x16xf32> to vector<3x16xf32>
    %c0_224 = arith.constant 0 : index
    %c36_225 = arith.constant 36 : index
    %227 = vector.load %arg14[%c0_224, %c36_225] : memref<16x342xf32, #tpu.memory_space<vmem>>, vector<16x288xf32>
    %cst_226 = arith.constant dense<0.000000e+00> : vector<3x288xf32>
    %228 = tpu.matmul %226, %227, %cst_226 {dimension_numbers = #tpu.dot_dimension_numbers<[1], [0], [0], [1], [0, 0, 1, 1], [], []>} : vector<3x16xf32>, vector<16x288xf32>, vector<3x288xf32> -> vector<3x288xf32>
    %229 = arith.addf %224, %228 : vector<3x288xf32>
    %c7_227 = arith.constant 7 : index
    %c0_228 = arith.constant 0 : index
    %c0_229 = arith.constant 0 : index
    %230 = vector.load %arg8[%c7_227, %c0_228, %c0_229] : memref<9x3x16xf32, #tpu.memory_space<vmem>>, vector<1x3x16xf32>
    %231 = vector.shape_cast %230 : vector<1x3x16xf32> to vector<3x16xf32>
    %c0_230 = arith.constant 0 : index
    %c37_231 = arith.constant 37 : index
    %232 = vector.load %arg14[%c0_230, %c37_231] : memref<16x342xf32, #tpu.memory_space<vmem>>, vector<16x288xf32>
    %cst_232 = arith.constant dense<0.000000e+00> : vector<3x288xf32>
    %233 = tpu.matmul %231, %232, %cst_232 {dimension_numbers = #tpu.dot_dimension_numbers<[1], [0], [0], [1], [0, 0, 1, 1], [], []>} : vector<3x16xf32>, vector<16x288xf32>, vector<3x288xf32> -> vector<3x288xf32>
    %234 = arith.addf %229, %233 : vector<3x288xf32>
    %c8_233 = arith.constant 8 : index
    %c0_234 = arith.constant 0 : index
    %c0_235 = arith.constant 0 : index
    %235 = vector.load %arg8[%c8_233, %c0_234, %c0_235] : memref<9x3x16xf32, #tpu.memory_space<vmem>>, vector<1x3x16xf32>
    %236 = vector.shape_cast %235 : vector<1x3x16xf32> to vector<3x16xf32>
    %c0_236 = arith.constant 0 : index
    %c38_237 = arith.constant 38 : index
    %237 = vector.load %arg14[%c0_236, %c38_237] : memref<16x342xf32, #tpu.memory_space<vmem>>, vector<16x288xf32>
    %cst_238 = arith.constant dense<0.000000e+00> : vector<3x288xf32>
    %238 = tpu.matmul %236, %237, %cst_238 {dimension_numbers = #tpu.dot_dimension_numbers<[1], [0], [0], [1], [0, 0, 1, 1], [], []>} : vector<3x16xf32>, vector<16x288xf32>, vector<3x288xf32> -> vector<3x288xf32>
    %239 = arith.addf %234, %238 : vector<3x288xf32>
    %c0_239 = arith.constant 0 : index
    %c0_240 = arith.constant 0 : index
    %c0_241 = arith.constant 0 : index
    %240 = vector.load %arg9[%c0_239, %c0_240, %c0_241] : memref<9x3x16xf32, #tpu.memory_space<vmem>>, vector<1x3x16xf32>
    %241 = vector.shape_cast %240 : vector<1x3x16xf32> to vector<3x16xf32>
    %c0_242 = arith.constant 0 : index
    %c0_243 = arith.constant 0 : index
    %242 = vector.load %arg15[%c0_242, %c0_243] : memref<16x342xf32, #tpu.memory_space<vmem>>, vector<16x288xf32>
    %cst_244 = arith.constant dense<0.000000e+00> : vector<3x288xf32>
    %243 = tpu.matmul %241, %242, %cst_244 {dimension_numbers = #tpu.dot_dimension_numbers<[1], [0], [0], [1], [0, 0, 1, 1], [], []>} : vector<3x16xf32>, vector<16x288xf32>, vector<3x288xf32> -> vector<3x288xf32>
    %244 = arith.addf %239, %243 : vector<3x288xf32>
    %c1_245 = arith.constant 1 : index
    %c0_246 = arith.constant 0 : index
    %c0_247 = arith.constant 0 : index
    %245 = vector.load %arg9[%c1_245, %c0_246, %c0_247] : memref<9x3x16xf32, #tpu.memory_space<vmem>>, vector<1x3x16xf32>
    %246 = vector.shape_cast %245 : vector<1x3x16xf32> to vector<3x16xf32>
    %c0_248 = arith.constant 0 : index
    %c1_249 = arith.constant 1 : index
    %247 = vector.load %arg15[%c0_248, %c1_249] : memref<16x342xf32, #tpu.memory_space<vmem>>, vector<16x288xf32>
    %cst_250 = arith.constant dense<0.000000e+00> : vector<3x288xf32>
    %248 = tpu.matmul %246, %247, %cst_250 {dimension_numbers = #tpu.dot_dimension_numbers<[1], [0], [0], [1], [0, 0, 1, 1], [], []>} : vector<3x16xf32>, vector<16x288xf32>, vector<3x288xf32> -> vector<3x288xf32>
    %249 = arith.addf %244, %248 : vector<3x288xf32>
    %c2_251 = arith.constant 2 : index
    %c0_252 = arith.constant 0 : index
    %c0_253 = arith.constant 0 : index
    %250 = vector.load %arg9[%c2_251, %c0_252, %c0_253] : memref<9x3x16xf32, #tpu.memory_space<vmem>>, vector<1x3x16xf32>
    %251 = vector.shape_cast %250 : vector<1x3x16xf32> to vector<3x16xf32>
    %c0_254 = arith.constant 0 : index
    %c2_255 = arith.constant 2 : index
    %252 = vector.load %arg15[%c0_254, %c2_255] : memref<16x342xf32, #tpu.memory_space<vmem>>, vector<16x288xf32>
    %cst_256 = arith.constant dense<0.000000e+00> : vector<3x288xf32>
    %253 = tpu.matmul %251, %252, %cst_256 {dimension_numbers = #tpu.dot_dimension_numbers<[1], [0], [0], [1], [0, 0, 1, 1], [], []>} : vector<3x16xf32>, vector<16x288xf32>, vector<3x288xf32> -> vector<3x288xf32>
    %254 = arith.addf %249, %253 : vector<3x288xf32>
    %c3_257 = arith.constant 3 : index
    %c0_258 = arith.constant 0 : index
    %c0_259 = arith.constant 0 : index
    %255 = vector.load %arg9[%c3_257, %c0_258, %c0_259] : memref<9x3x16xf32, #tpu.memory_space<vmem>>, vector<1x3x16xf32>
    %256 = vector.shape_cast %255 : vector<1x3x16xf32> to vector<3x16xf32>
    %c0_260 = arith.constant 0 : index
    %c18_261 = arith.constant 18 : index
    %257 = vector.load %arg15[%c0_260, %c18_261] : memref<16x342xf32, #tpu.memory_space<vmem>>, vector<16x288xf32>
    %cst_262 = arith.constant dense<0.000000e+00> : vector<3x288xf32>
    %258 = tpu.matmul %256, %257, %cst_262 {dimension_numbers = #tpu.dot_dimension_numbers<[1], [0], [0], [1], [0, 0, 1, 1], [], []>} : vector<3x16xf32>, vector<16x288xf32>, vector<3x288xf32> -> vector<3x288xf32>
    %259 = arith.addf %254, %258 : vector<3x288xf32>
    %c4_263 = arith.constant 4 : index
    %c0_264 = arith.constant 0 : index
    %c0_265 = arith.constant 0 : index
    %260 = vector.load %arg9[%c4_263, %c0_264, %c0_265] : memref<9x3x16xf32, #tpu.memory_space<vmem>>, vector<1x3x16xf32>
    %261 = vector.shape_cast %260 : vector<1x3x16xf32> to vector<3x16xf32>
    %c0_266 = arith.constant 0 : index
    %c19_267 = arith.constant 19 : index
    %262 = vector.load %arg15[%c0_266, %c19_267] : memref<16x342xf32, #tpu.memory_space<vmem>>, vector<16x288xf32>
    %cst_268 = arith.constant dense<0.000000e+00> : vector<3x288xf32>
    %263 = tpu.matmul %261, %262, %cst_268 {dimension_numbers = #tpu.dot_dimension_numbers<[1], [0], [0], [1], [0, 0, 1, 1], [], []>} : vector<3x16xf32>, vector<16x288xf32>, vector<3x288xf32> -> vector<3x288xf32>
    %264 = arith.addf %259, %263 : vector<3x288xf32>
    %c5_269 = arith.constant 5 : index
    %c0_270 = arith.constant 0 : index
    %c0_271 = arith.constant 0 : index
    %265 = vector.load %arg9[%c5_269, %c0_270, %c0_271] : memref<9x3x16xf32, #tpu.memory_space<vmem>>, vector<1x3x16xf32>
    %266 = vector.shape_cast %265 : vector<1x3x16xf32> to vector<3x16xf32>
    %c0_272 = arith.constant 0 : index
    %c20_273 = arith.constant 20 : index
    %267 = vector.load %arg15[%c0_272, %c20_273] : memref<16x342xf32, #tpu.memory_space<vmem>>, vector<16x288xf32>
    %cst_274 = arith.constant dense<0.000000e+00> : vector<3x288xf32>
    %268 = tpu.matmul %266, %267, %cst_274 {dimension_numbers = #tpu.dot_dimension_numbers<[1], [0], [0], [1], [0, 0, 1, 1], [], []>} : vector<3x16xf32>, vector<16x288xf32>, vector<3x288xf32> -> vector<3x288xf32>
    %269 = arith.addf %264, %268 : vector<3x288xf32>
    %c6_275 = arith.constant 6 : index
    %c0_276 = arith.constant 0 : index
    %c0_277 = arith.constant 0 : index
    %270 = vector.load %arg9[%c6_275, %c0_276, %c0_277] : memref<9x3x16xf32, #tpu.memory_space<vmem>>, vector<1x3x16xf32>
    %271 = vector.shape_cast %270 : vector<1x3x16xf32> to vector<3x16xf32>
    %c0_278 = arith.constant 0 : index
    %c36_279 = arith.constant 36 : index
    %272 = vector.load %arg15[%c0_278, %c36_279] : memref<16x342xf32, #tpu.memory_space<vmem>>, vector<16x288xf32>
    %cst_280 = arith.constant dense<0.000000e+00> : vector<3x288xf32>
    %273 = tpu.matmul %271, %272, %cst_280 {dimension_numbers = #tpu.dot_dimension_numbers<[1], [0], [0], [1], [0, 0, 1, 1], [], []>} : vector<3x16xf32>, vector<16x288xf32>, vector<3x288xf32> -> vector<3x288xf32>
    %274 = arith.addf %269, %273 : vector<3x288xf32>
    %c7_281 = arith.constant 7 : index
    %c0_282 = arith.constant 0 : index
    %c0_283 = arith.constant 0 : index
    %275 = vector.load %arg9[%c7_281, %c0_282, %c0_283] : memref<9x3x16xf32, #tpu.memory_space<vmem>>, vector<1x3x16xf32>
    %276 = vector.shape_cast %275 : vector<1x3x16xf32> to vector<3x16xf32>
    %c0_284 = arith.constant 0 : index
    %c37_285 = arith.constant 37 : index
    %277 = vector.load %arg15[%c0_284, %c37_285] : memref<16x342xf32, #tpu.memory_space<vmem>>, vector<16x288xf32>
    %cst_286 = arith.constant dense<0.000000e+00> : vector<3x288xf32>
    %278 = tpu.matmul %276, %277, %cst_286 {dimension_numbers = #tpu.dot_dimension_numbers<[1], [0], [0], [1], [0, 0, 1, 1], [], []>} : vector<3x16xf32>, vector<16x288xf32>, vector<3x288xf32> -> vector<3x288xf32>
    %279 = arith.addf %274, %278 : vector<3x288xf32>
    %c8_287 = arith.constant 8 : index
    %c0_288 = arith.constant 0 : index
    %c0_289 = arith.constant 0 : index
    %280 = vector.load %arg9[%c8_287, %c0_288, %c0_289] : memref<9x3x16xf32, #tpu.memory_space<vmem>>, vector<1x3x16xf32>
    %281 = vector.shape_cast %280 : vector<1x3x16xf32> to vector<3x16xf32>
    %c0_290 = arith.constant 0 : index
    %c38_291 = arith.constant 38 : index
    %282 = vector.load %arg15[%c0_290, %c38_291] : memref<16x342xf32, #tpu.memory_space<vmem>>, vector<16x288xf32>
    %cst_292 = arith.constant dense<0.000000e+00> : vector<3x288xf32>
    %283 = tpu.matmul %281, %282, %cst_292 {dimension_numbers = #tpu.dot_dimension_numbers<[1], [0], [0], [1], [0, 0, 1, 1], [], []>} : vector<3x16xf32>, vector<16x288xf32>, vector<3x288xf32> -> vector<3x288xf32>
    %284 = arith.addf %279, %283 : vector<3x288xf32>
    %c0_293 = arith.constant 0 : index
    %c0_294 = arith.constant 0 : index
    %c0_295 = arith.constant 0 : index
    %285 = vector.load %arg10[%c0_293, %c0_294, %c0_295] : memref<9x3x16xf32, #tpu.memory_space<vmem>>, vector<1x3x16xf32>
    %286 = vector.shape_cast %285 : vector<1x3x16xf32> to vector<3x16xf32>
    %c0_296 = arith.constant 0 : index
    %c0_297 = arith.constant 0 : index
    %287 = vector.load %arg16[%c0_296, %c0_297] : memref<16x342xf32, #tpu.memory_space<vmem>>, vector<16x288xf32>
    %cst_298 = arith.constant dense<0.000000e+00> : vector<3x288xf32>
    %288 = tpu.matmul %286, %287, %cst_298 {dimension_numbers = #tpu.dot_dimension_numbers<[1], [0], [0], [1], [0, 0, 1, 1], [], []>} : vector<3x16xf32>, vector<16x288xf32>, vector<3x288xf32> -> vector<3x288xf32>
    %289 = arith.addf %284, %288 : vector<3x288xf32>
    %c1_299 = arith.constant 1 : index
    %c0_300 = arith.constant 0 : index
    %c0_301 = arith.constant 0 : index
    %290 = vector.load %arg10[%c1_299, %c0_300, %c0_301] : memref<9x3x16xf32, #tpu.memory_space<vmem>>, vector<1x3x16xf32>
    %291 = vector.shape_cast %290 : vector<1x3x16xf32> to vector<3x16xf32>
    %c0_302 = arith.constant 0 : index
    %c1_303 = arith.constant 1 : index
    %292 = vector.load %arg16[%c0_302, %c1_303] : memref<16x342xf32, #tpu.memory_space<vmem>>, vector<16x288xf32>
    %cst_304 = arith.constant dense<0.000000e+00> : vector<3x288xf32>
    %293 = tpu.matmul %291, %292, %cst_304 {dimension_numbers = #tpu.dot_dimension_numbers<[1], [0], [0], [1], [0, 0, 1, 1], [], []>} : vector<3x16xf32>, vector<16x288xf32>, vector<3x288xf32> -> vector<3x288xf32>
    %294 = arith.addf %289, %293 : vector<3x288xf32>
    %c2_305 = arith.constant 2 : index
    %c0_306 = arith.constant 0 : index
    %c0_307 = arith.constant 0 : index
    %295 = vector.load %arg10[%c2_305, %c0_306, %c0_307] : memref<9x3x16xf32, #tpu.memory_space<vmem>>, vector<1x3x16xf32>
    %296 = vector.shape_cast %295 : vector<1x3x16xf32> to vector<3x16xf32>
    %c0_308 = arith.constant 0 : index
    %c2_309 = arith.constant 2 : index
    %297 = vector.load %arg16[%c0_308, %c2_309] : memref<16x342xf32, #tpu.memory_space<vmem>>, vector<16x288xf32>
    %cst_310 = arith.constant dense<0.000000e+00> : vector<3x288xf32>
    %298 = tpu.matmul %296, %297, %cst_310 {dimension_numbers = #tpu.dot_dimension_numbers<[1], [0], [0], [1], [0, 0, 1, 1], [], []>} : vector<3x16xf32>, vector<16x288xf32>, vector<3x288xf32> -> vector<3x288xf32>
    %299 = arith.addf %294, %298 : vector<3x288xf32>
    %c3_311 = arith.constant 3 : index
    %c0_312 = arith.constant 0 : index
    %c0_313 = arith.constant 0 : index
    %300 = vector.load %arg10[%c3_311, %c0_312, %c0_313] : memref<9x3x16xf32, #tpu.memory_space<vmem>>, vector<1x3x16xf32>
    %301 = vector.shape_cast %300 : vector<1x3x16xf32> to vector<3x16xf32>
    %c0_314 = arith.constant 0 : index
    %c18_315 = arith.constant 18 : index
    %302 = vector.load %arg16[%c0_314, %c18_315] : memref<16x342xf32, #tpu.memory_space<vmem>>, vector<16x288xf32>
    %cst_316 = arith.constant dense<0.000000e+00> : vector<3x288xf32>
    %303 = tpu.matmul %301, %302, %cst_316 {dimension_numbers = #tpu.dot_dimension_numbers<[1], [0], [0], [1], [0, 0, 1, 1], [], []>} : vector<3x16xf32>, vector<16x288xf32>, vector<3x288xf32> -> vector<3x288xf32>
    %304 = arith.addf %299, %303 : vector<3x288xf32>
    %c4_317 = arith.constant 4 : index
    %c0_318 = arith.constant 0 : index
    %c0_319 = arith.constant 0 : index
    %305 = vector.load %arg10[%c4_317, %c0_318, %c0_319] : memref<9x3x16xf32, #tpu.memory_space<vmem>>, vector<1x3x16xf32>
    %306 = vector.shape_cast %305 : vector<1x3x16xf32> to vector<3x16xf32>
    %c0_320 = arith.constant 0 : index
    %c19_321 = arith.constant 19 : index
    %307 = vector.load %arg16[%c0_320, %c19_321] : memref<16x342xf32, #tpu.memory_space<vmem>>, vector<16x288xf32>
    %cst_322 = arith.constant dense<0.000000e+00> : vector<3x288xf32>
    %308 = tpu.matmul %306, %307, %cst_322 {dimension_numbers = #tpu.dot_dimension_numbers<[1], [0], [0], [1], [0, 0, 1, 1], [], []>} : vector<3x16xf32>, vector<16x288xf32>, vector<3x288xf32> -> vector<3x288xf32>
    %309 = arith.addf %304, %308 : vector<3x288xf32>
    %c5_323 = arith.constant 5 : index
    %c0_324 = arith.constant 0 : index
    %c0_325 = arith.constant 0 : index
    %310 = vector.load %arg10[%c5_323, %c0_324, %c0_325] : memref<9x3x16xf32, #tpu.memory_space<vmem>>, vector<1x3x16xf32>
    %311 = vector.shape_cast %310 : vector<1x3x16xf32> to vector<3x16xf32>
    %c0_326 = arith.constant 0 : index
    %c20_327 = arith.constant 20 : index
    %312 = vector.load %arg16[%c0_326, %c20_327] : memref<16x342xf32, #tpu.memory_space<vmem>>, vector<16x288xf32>
    %cst_328 = arith.constant dense<0.000000e+00> : vector<3x288xf32>
    %313 = tpu.matmul %311, %312, %cst_328 {dimension_numbers = #tpu.dot_dimension_numbers<[1], [0], [0], [1], [0, 0, 1, 1], [], []>} : vector<3x16xf32>, vector<16x288xf32>, vector<3x288xf32> -> vector<3x288xf32>
    %314 = arith.addf %309, %313 : vector<3x288xf32>
    %c6_329 = arith.constant 6 : index
    %c0_330 = arith.constant 0 : index
    %c0_331 = arith.constant 0 : index
    %315 = vector.load %arg10[%c6_329, %c0_330, %c0_331] : memref<9x3x16xf32, #tpu.memory_space<vmem>>, vector<1x3x16xf32>
    %316 = vector.shape_cast %315 : vector<1x3x16xf32> to vector<3x16xf32>
    %c0_332 = arith.constant 0 : index
    %c36_333 = arith.constant 36 : index
    %317 = vector.load %arg16[%c0_332, %c36_333] : memref<16x342xf32, #tpu.memory_space<vmem>>, vector<16x288xf32>
    %cst_334 = arith.constant dense<0.000000e+00> : vector<3x288xf32>
    %318 = tpu.matmul %316, %317, %cst_334 {dimension_numbers = #tpu.dot_dimension_numbers<[1], [0], [0], [1], [0, 0, 1, 1], [], []>} : vector<3x16xf32>, vector<16x288xf32>, vector<3x288xf32> -> vector<3x288xf32>
    %319 = arith.addf %314, %318 : vector<3x288xf32>
    %c7_335 = arith.constant 7 : index
    %c0_336 = arith.constant 0 : index
    %c0_337 = arith.constant 0 : index
    %320 = vector.load %arg10[%c7_335, %c0_336, %c0_337] : memref<9x3x16xf32, #tpu.memory_space<vmem>>, vector<1x3x16xf32>
    %321 = vector.shape_cast %320 : vector<1x3x16xf32> to vector<3x16xf32>
    %c0_338 = arith.constant 0 : index
    %c37_339 = arith.constant 37 : index
    %322 = vector.load %arg16[%c0_338, %c37_339] : memref<16x342xf32, #tpu.memory_space<vmem>>, vector<16x288xf32>
    %cst_340 = arith.constant dense<0.000000e+00> : vector<3x288xf32>
    %323 = tpu.matmul %321, %322, %cst_340 {dimension_numbers = #tpu.dot_dimension_numbers<[1], [0], [0], [1], [0, 0, 1, 1], [], []>} : vector<3x16xf32>, vector<16x288xf32>, vector<3x288xf32> -> vector<3x288xf32>
    %324 = arith.addf %319, %323 : vector<3x288xf32>
    %c8_341 = arith.constant 8 : index
    %c0_342 = arith.constant 0 : index
    %c0_343 = arith.constant 0 : index
    %325 = vector.load %arg10[%c8_341, %c0_342, %c0_343] : memref<9x3x16xf32, #tpu.memory_space<vmem>>, vector<1x3x16xf32>
    %326 = vector.shape_cast %325 : vector<1x3x16xf32> to vector<3x16xf32>
    %c0_344 = arith.constant 0 : index
    %c38_345 = arith.constant 38 : index
    %327 = vector.load %arg16[%c0_344, %c38_345] : memref<16x342xf32, #tpu.memory_space<vmem>>, vector<16x288xf32>
    %cst_346 = arith.constant dense<0.000000e+00> : vector<3x288xf32>
    %328 = tpu.matmul %326, %327, %cst_346 {dimension_numbers = #tpu.dot_dimension_numbers<[1], [0], [0], [1], [0, 0, 1, 1], [], []>} : vector<3x16xf32>, vector<16x288xf32>, vector<3x288xf32> -> vector<3x288xf32>
    %329 = arith.addf %324, %328 : vector<3x288xf32>
    %c0_347 = arith.constant 0 : index
    %c0_348 = arith.constant 0 : index
    %c0_349 = arith.constant 0 : index
    %330 = vector.load %arg11[%c0_347, %c0_348, %c0_349] : memref<9x3x3xf32, #tpu.memory_space<vmem>>, vector<1x3x3xf32>
    %331 = vector.shape_cast %330 : vector<1x3x3xf32> to vector<3x3xf32>
    %c0_350 = arith.constant 0 : index
    %c0_351 = arith.constant 0 : index
    %c0_352 = arith.constant 0 : index
    %332 = vector.load %arg1[%c0_350, %c0_351, %c0_352] : memref<1x3x342xf32, #tpu.memory_space<vmem>>, vector<1x3x288xf32>
    %333 = vector.shape_cast %332 : vector<1x3x288xf32> to vector<3x288xf32>
    %cst_353 = arith.constant dense<0.000000e+00> : vector<3x288xf32>
    %334 = tpu.matmul %331, %333, %cst_353 {dimension_numbers = #tpu.dot_dimension_numbers<[1], [0], [0], [1], [0, 0, 1, 1], [], []>} : vector<3x3xf32>, vector<3x288xf32>, vector<3x288xf32> -> vector<3x288xf32>
    %335 = arith.addf %329, %334 : vector<3x288xf32>
    %c1_354 = arith.constant 1 : index
    %c0_355 = arith.constant 0 : index
    %c0_356 = arith.constant 0 : index
    %336 = vector.load %arg11[%c1_354, %c0_355, %c0_356] : memref<9x3x3xf32, #tpu.memory_space<vmem>>, vector<1x3x3xf32>
    %337 = vector.shape_cast %336 : vector<1x3x3xf32> to vector<3x3xf32>
    %c0_357 = arith.constant 0 : index
    %c0_358 = arith.constant 0 : index
    %c1_359 = arith.constant 1 : index
    %338 = vector.load %arg1[%c0_357, %c0_358, %c1_359] : memref<1x3x342xf32, #tpu.memory_space<vmem>>, vector<1x3x288xf32>
    %339 = vector.shape_cast %338 : vector<1x3x288xf32> to vector<3x288xf32>
    %cst_360 = arith.constant dense<0.000000e+00> : vector<3x288xf32>
    %340 = tpu.matmul %337, %339, %cst_360 {dimension_numbers = #tpu.dot_dimension_numbers<[1], [0], [0], [1], [0, 0, 1, 1], [], []>} : vector<3x3xf32>, vector<3x288xf32>, vector<3x288xf32> -> vector<3x288xf32>
    %341 = arith.addf %335, %340 : vector<3x288xf32>
    %c2_361 = arith.constant 2 : index
    %c0_362 = arith.constant 0 : index
    %c0_363 = arith.constant 0 : index
    %342 = vector.load %arg11[%c2_361, %c0_362, %c0_363] : memref<9x3x3xf32, #tpu.memory_space<vmem>>, vector<1x3x3xf32>
    %343 = vector.shape_cast %342 : vector<1x3x3xf32> to vector<3x3xf32>
    %c0_364 = arith.constant 0 : index
    %c0_365 = arith.constant 0 : index
    %c2_366 = arith.constant 2 : index
    %344 = vector.load %arg1[%c0_364, %c0_365, %c2_366] : memref<1x3x342xf32, #tpu.memory_space<vmem>>, vector<1x3x288xf32>
    %345 = vector.shape_cast %344 : vector<1x3x288xf32> to vector<3x288xf32>
    %cst_367 = arith.constant dense<0.000000e+00> : vector<3x288xf32>
    %346 = tpu.matmul %343, %345, %cst_367 {dimension_numbers = #tpu.dot_dimension_numbers<[1], [0], [0], [1], [0, 0, 1, 1], [], []>} : vector<3x3xf32>, vector<3x288xf32>, vector<3x288xf32> -> vector<3x288xf32>
    %347 = arith.addf %341, %346 : vector<3x288xf32>
    %c3_368 = arith.constant 3 : index
    %c0_369 = arith.constant 0 : index
    %c0_370 = arith.constant 0 : index
    %348 = vector.load %arg11[%c3_368, %c0_369, %c0_370] : memref<9x3x3xf32, #tpu.memory_space<vmem>>, vector<1x3x3xf32>
    %349 = vector.shape_cast %348 : vector<1x3x3xf32> to vector<3x3xf32>
    %c0_371 = arith.constant 0 : index
    %c0_372 = arith.constant 0 : index
    %c18_373 = arith.constant 18 : index
    %350 = vector.load %arg1[%c0_371, %c0_372, %c18_373] : memref<1x3x342xf32, #tpu.memory_space<vmem>>, vector<1x3x288xf32>
    %351 = vector.shape_cast %350 : vector<1x3x288xf32> to vector<3x288xf32>
    %cst_374 = arith.constant dense<0.000000e+00> : vector<3x288xf32>
    %352 = tpu.matmul %349, %351, %cst_374 {dimension_numbers = #tpu.dot_dimension_numbers<[1], [0], [0], [1], [0, 0, 1, 1], [], []>} : vector<3x3xf32>, vector<3x288xf32>, vector<3x288xf32> -> vector<3x288xf32>
    %353 = arith.addf %347, %352 : vector<3x288xf32>
    %c4_375 = arith.constant 4 : index
    %c0_376 = arith.constant 0 : index
    %c0_377 = arith.constant 0 : index
    %354 = vector.load %arg11[%c4_375, %c0_376, %c0_377] : memref<9x3x3xf32, #tpu.memory_space<vmem>>, vector<1x3x3xf32>
    %355 = vector.shape_cast %354 : vector<1x3x3xf32> to vector<3x3xf32>
    %c0_378 = arith.constant 0 : index
    %c0_379 = arith.constant 0 : index
    %c19_380 = arith.constant 19 : index
    %356 = vector.load %arg1[%c0_378, %c0_379, %c19_380] : memref<1x3x342xf32, #tpu.memory_space<vmem>>, vector<1x3x288xf32>
    %357 = vector.shape_cast %356 : vector<1x3x288xf32> to vector<3x288xf32>
    %cst_381 = arith.constant dense<0.000000e+00> : vector<3x288xf32>
    %358 = tpu.matmul %355, %357, %cst_381 {dimension_numbers = #tpu.dot_dimension_numbers<[1], [0], [0], [1], [0, 0, 1, 1], [], []>} : vector<3x3xf32>, vector<3x288xf32>, vector<3x288xf32> -> vector<3x288xf32>
    %359 = arith.addf %353, %358 : vector<3x288xf32>
    %c5_382 = arith.constant 5 : index
    %c0_383 = arith.constant 0 : index
    %c0_384 = arith.constant 0 : index
    %360 = vector.load %arg11[%c5_382, %c0_383, %c0_384] : memref<9x3x3xf32, #tpu.memory_space<vmem>>, vector<1x3x3xf32>
    %361 = vector.shape_cast %360 : vector<1x3x3xf32> to vector<3x3xf32>
    %c0_385 = arith.constant 0 : index
    %c0_386 = arith.constant 0 : index
    %c20_387 = arith.constant 20 : index
    %362 = vector.load %arg1[%c0_385, %c0_386, %c20_387] : memref<1x3x342xf32, #tpu.memory_space<vmem>>, vector<1x3x288xf32>
    %363 = vector.shape_cast %362 : vector<1x3x288xf32> to vector<3x288xf32>
    %cst_388 = arith.constant dense<0.000000e+00> : vector<3x288xf32>
    %364 = tpu.matmul %361, %363, %cst_388 {dimension_numbers = #tpu.dot_dimension_numbers<[1], [0], [0], [1], [0, 0, 1, 1], [], []>} : vector<3x3xf32>, vector<3x288xf32>, vector<3x288xf32> -> vector<3x288xf32>
    %365 = arith.addf %359, %364 : vector<3x288xf32>
    %c6_389 = arith.constant 6 : index
    %c0_390 = arith.constant 0 : index
    %c0_391 = arith.constant 0 : index
    %366 = vector.load %arg11[%c6_389, %c0_390, %c0_391] : memref<9x3x3xf32, #tpu.memory_space<vmem>>, vector<1x3x3xf32>
    %367 = vector.shape_cast %366 : vector<1x3x3xf32> to vector<3x3xf32>
    %c0_392 = arith.constant 0 : index
    %c0_393 = arith.constant 0 : index
    %c36_394 = arith.constant 36 : index
    %368 = vector.load %arg1[%c0_392, %c0_393, %c36_394] : memref<1x3x342xf32, #tpu.memory_space<vmem>>, vector<1x3x288xf32>
    %369 = vector.shape_cast %368 : vector<1x3x288xf32> to vector<3x288xf32>
    %cst_395 = arith.constant dense<0.000000e+00> : vector<3x288xf32>
    %370 = tpu.matmul %367, %369, %cst_395 {dimension_numbers = #tpu.dot_dimension_numbers<[1], [0], [0], [1], [0, 0, 1, 1], [], []>} : vector<3x3xf32>, vector<3x288xf32>, vector<3x288xf32> -> vector<3x288xf32>
    %371 = arith.addf %365, %370 : vector<3x288xf32>
    %c7_396 = arith.constant 7 : index
    %c0_397 = arith.constant 0 : index
    %c0_398 = arith.constant 0 : index
    %372 = vector.load %arg11[%c7_396, %c0_397, %c0_398] : memref<9x3x3xf32, #tpu.memory_space<vmem>>, vector<1x3x3xf32>
    %373 = vector.shape_cast %372 : vector<1x3x3xf32> to vector<3x3xf32>
    %c0_399 = arith.constant 0 : index
    %c0_400 = arith.constant 0 : index
    %c37_401 = arith.constant 37 : index
    %374 = vector.load %arg1[%c0_399, %c0_400, %c37_401] : memref<1x3x342xf32, #tpu.memory_space<vmem>>, vector<1x3x288xf32>
    %375 = vector.shape_cast %374 : vector<1x3x288xf32> to vector<3x288xf32>
    %cst_402 = arith.constant dense<0.000000e+00> : vector<3x288xf32>
    %376 = tpu.matmul %373, %375, %cst_402 {dimension_numbers = #tpu.dot_dimension_numbers<[1], [0], [0], [1], [0, 0, 1, 1], [], []>} : vector<3x3xf32>, vector<3x288xf32>, vector<3x288xf32> -> vector<3x288xf32>
    %377 = arith.addf %371, %376 : vector<3x288xf32>
    %c8_403 = arith.constant 8 : index
    %c0_404 = arith.constant 0 : index
    %c0_405 = arith.constant 0 : index
    %378 = vector.load %arg11[%c8_403, %c0_404, %c0_405] : memref<9x3x3xf32, #tpu.memory_space<vmem>>, vector<1x3x3xf32>
    %379 = vector.shape_cast %378 : vector<1x3x3xf32> to vector<3x3xf32>
    %c0_406 = arith.constant 0 : index
    %c0_407 = arith.constant 0 : index
    %c38_408 = arith.constant 38 : index
    %380 = vector.load %arg1[%c0_406, %c0_407, %c38_408] : memref<1x3x342xf32, #tpu.memory_space<vmem>>, vector<1x3x288xf32>
    %381 = vector.shape_cast %380 : vector<1x3x288xf32> to vector<3x288xf32>
    %cst_409 = arith.constant dense<0.000000e+00> : vector<3x288xf32>
    %382 = tpu.matmul %379, %381, %cst_409 {dimension_numbers = #tpu.dot_dimension_numbers<[1], [0], [0], [1], [0, 0, 1, 1], [], []>} : vector<3x3xf32>, vector<3x288xf32>, vector<3x288xf32> -> vector<3x288xf32>
    %383 = arith.addf %377, %382 : vector<3x288xf32>
    %c0_410 = arith.constant 0 : index
    %c0_411 = arith.constant 0 : index
    %384 = vector.load %arg12[%c0_410, %c0_411] : memref<3x1xf32, #tpu.memory_space<vmem>>, vector<3x1xf32>
    %385 = vector.broadcast %384 : vector<3x1xf32> to vector<3x288xf32>
    %386 = arith.addf %383, %385 : vector<3x288xf32>
    %c0_412 = arith.constant 0 : index
    %c0_413 = arith.constant 0 : index
    %c19_414 = arith.constant 19 : index
    %387 = vector.load %arg1[%c0_412, %c0_413, %c19_414] : memref<1x3x342xf32, #tpu.memory_space<vmem>>, vector<1x3x288xf32>
    %388 = vector.shape_cast %387 : vector<1x3x288xf32> to vector<3x288xf32>
    %389 = arith.addf %386, %388 : vector<3x288xf32>
    %c0_415 = arith.constant 0 : index
    %c0_416 = arith.constant 0 : index
    %c0_417 = arith.constant 0 : index
    %390 = vector.load %arg13[%c0_415, %c0_416, %c0_417] : memref<1x3x288xf32, #tpu.memory_space<vmem>>, vector<1x3x288xf32>
    %391 = vector.shape_cast %390 : vector<1x3x288xf32> to vector<3x288xf32>
    %392 = vector.shape_cast %389 : vector<3x288xf32> to vector<1x3x288xf32>
    tpu.vector_store %arg13[%c0_415, %c0_416, %c0_417], %392 {strides = array<i32>} : memref<1x3x288xf32, #tpu.memory_space<vmem>>, vector<1x3x288xf32>,
    return
  }
  func.func @transform_0(%arg0: i32) -> (i32, i32, i32) {
    %c0_i32 = arith.constant 0 : i32
    %c0_i32_0 = arith.constant 0 : i32
    %c0_i32_1 = arith.constant 0 : i32
    return %arg0, %c0_i32, %c0_i32_0 : i32, i32, i32
  }
  func.func @transform_1(%arg0: i32) -> (i32, i32, i32) {
    %c0_i32 = arith.constant 0 : i32
    %c0_i32_0 = arith.constant 0 : i32
    %c0_i32_1 = arith.constant 0 : i32
    %c0_i32_2 = arith.constant 0 : i32
    return %c0_i32, %c0_i32_0, %c0_i32_1 : i32, i32, i32
  }
  func.func @transform_2(%arg0: i32) -> (i32, i32) {
    %c0_i32 = arith.constant 0 : i32
    %c0_i32_0 = arith.constant 0 : i32
    %c0_i32_1 = arith.constant 0 : i32
    return %c0_i32, %c0_i32_0 : i32, i32
  }
  func.func @transform_3(%arg0: i32) -> (i32, i32, i32) {
    %c0_i32 = arith.constant 0 : i32
    %c0_i32_0 = arith.constant 0 : i32
    %c0_i32_1 = arith.constant 0 : i32
    %c0_i32_2 = arith.constant 0 : i32
    return %c0_i32, %c0_i32_0, %c0_i32_1 : i32, i32, i32
  }
  func.func @transform_4(%arg0: i32) -> (i32, i32) {
    %c0_i32 = arith.constant 0 : i32
    %c0_i32_0 = arith.constant 0 : i32
    %c0_i32_1 = arith.constant 0 : i32
    return %c0_i32, %c0_i32_0 : i32, i32
  }
  func.func @transform_5(%arg0: i32) -> (i32, i32, i32) {
    %c0_i32 = arith.constant 0 : i32
    %c0_i32_0 = arith.constant 0 : i32
    %c0_i32_1 = arith.constant 0 : i32
    %c0_i32_2 = arith.constant 0 : i32
    return %c0_i32, %c0_i32_0, %c0_i32_1 : i32, i32, i32
  }
  func.func @transform_6(%arg0: i32) -> (i32, i32) {
    %c0_i32 = arith.constant 0 : i32
    %c0_i32_0 = arith.constant 0 : i32
    %c0_i32_1 = arith.constant 0 : i32
    return %c0_i32, %c0_i32_0 : i32, i32
  }
  func.func @transform_7(%arg0: i32) -> (i32, i32, i32) {
    %c0_i32 = arith.constant 0 : i32
    %c0_i32_0 = arith.constant 0 : i32
    %c0_i32_1 = arith.constant 0 : i32
    %c0_i32_2 = arith.constant 0 : i32
    return %c0_i32, %c0_i32_0, %c0_i32_1 : i32, i32, i32
  }
  func.func @transform_8(%arg0: i32) -> (i32, i32, i32) {
    %c0_i32 = arith.constant 0 : i32
    %c0_i32_0 = arith.constant 0 : i32
    %c0_i32_1 = arith.constant 0 : i32
    %c0_i32_2 = arith.constant 0 : i32
    return %c0_i32, %c0_i32_0, %c0_i32_1 : i32, i32, i32
  }
  func.func @transform_9(%arg0: i32) -> (i32, i32, i32) {
    %c0_i32 = arith.constant 0 : i32
    %c0_i32_0 = arith.constant 0 : i32
    %c0_i32_1 = arith.constant 0 : i32
    %c0_i32_2 = arith.constant 0 : i32
    return %c0_i32, %c0_i32_0, %c0_i32_1 : i32, i32, i32
  }
  func.func @transform_10(%arg0: i32) -> (i32, i32, i32) {
    %c0_i32 = arith.constant 0 : i32
    %c0_i32_0 = arith.constant 0 : i32
    %c0_i32_1 = arith.constant 0 : i32
    %c0_i32_2 = arith.constant 0 : i32
    return %c0_i32, %c0_i32_0, %c0_i32_1 : i32, i32, i32
  }
  func.func @transform_11(%arg0: i32) -> (i32, i32) {
    %c0_i32 = arith.constant 0 : i32
    %c0_i32_0 = arith.constant 0 : i32
    %c0_i32_1 = arith.constant 0 : i32
    return %c0_i32, %c0_i32_0 : i32, i32
  }
  func.func @transform_12(%arg0: i32) -> (i32, i32, i32) {
    %c0_i32 = arith.constant 0 : i32
    %c0_i32_0 = arith.constant 0 : i32
    %c0_i32_1 = arith.constant 0 : i32
    return %arg0, %c0_i32, %c0_i32_0 : i32, i32, i32
  }
}

</mosaic_0001>

<bundles_post_ra>
// kernel: tpu_custom_call.1
= control target key start
LH: loop header
LB: loop body
LE: loop exit
PB: predicated region body
PF: predicated region fallthrough
CT: control target
= control target key end

     0   :  { %17 = vsyncpa [#allocation6], 0  ;;  %s15991_s0 = inlined_call_operand.vmem [shape: f32[2,3,342], index: 0, kind: input, shape index: {}]   ;;  %s15992_s1 = inlined_call_operand.vmem [shape: f32[9,16,3], index: 1, kind: input, shape index: {}]   ;;  %s15993_s2 = inlined_call_operand.vmem [shape: f32[16,1], index: 2, kind: input, shape index: {}]   ;;  %s15994_s3 = inlined_call_operand.vmem [shape: f32[9,16,16], index: 3, kind: input, shape index: {}]   ;;  %s15995_s4 = inlined_call_operand.vmem [shape: f32[16,1], index: 4, kind: input, shape index: {}]   ;;  %s15996_s5 = inlined_call_operand.vmem [shape: f32[9,16,16], index: 5, kind: input, shape index: {}]   ;;  %s15997_s6 = inlined_call_operand.vmem [shape: f32[16,1], index: 6, kind: input, shape index: {}]   ;;  %s15998_s7 = inlined_call_operand.hbm [shape: f32[9,3,16], index: 7, kind: input, shape index: {}]   ;;  %s15999_s8 = inlined_call_operand.hbm [shape: f32[9,3,16], index: 8, kind: input, shape index: {}]   ;;  %s16000_s9 = inlined_call_operand.vmem [shape: f32[9,3,16], index: 9, kind: input, shape index: {}]   ;;  %s16001_s10 = inlined_call_operand.vmem [shape: f32[9,3,3], index: 10, kind: input, shape index: {}]   ;;  %s16002_s11 = inlined_call_operand.vmem [shape: f32[3,1], index: 11, kind: input, shape index: {}]   ;;  %s16003_s12 = inlined_call_operand.vmem [shape: f32[2,3,288], index: 12, kind: output, shape index: {}]  }
   0x1   :  { %18 = vsyncpa [#allocation8], 0  ;;  %s14201_s21 = smov 0  }
   0x2 LB: > { %s14207_s22 = sadd.s32 4294967295, %s14117_s21   ;;  %p11916_p0 = scmp.ge.s32.totalorder %s14117_s21, 1  ;;  %s14117_s21 = sphi %s14201_s21, %s24_s21  }
   0x3   : > { %p312_p1 = scmp.lt.s32.totalorder %s14117_s21, 3  ;;  %s14119_s23 = smov [#allocation5]  }
   0x4   : > { %s342_s24 = sshll.u32 %s14119_s23, 4  ;;  %p16004_p3 = scmp.eq.s32.totalorder %s14207_s22, 0  ;;  %s343_s24 = int_to_ptr.vmem [resolvable:$true] %s342_s24 }
   0x5   : > { %p14211_p2 = pnand %p11916_p0, %p312_p1  ;;  %s14120_s26 = smov [#allocation7]  }
   0x6   : > { %s355_s27 = sshll.u32 %s14120_s26, 4  ;;  %s14047_s13 = scalar_lea.hbm %s15998_s7, 576  ;;  %s14224_s27 = int_to_ptr.vmem [resolvable:$true] %s355_s27 }
   0x7   : > { %s16012_s25 = scalar_select %p14211_p2, 1, 0 }
   0x8   : > { %p13390_p4 = pneg %p14211_p2  ;;  %p14048_p6 = scmp.ne.s32.totalorder %s15998_s7, %s14047_s13 }
   0x9   : > { %p14054_p10 = scmp.lt.u32.totalorder %s14047_s13, %s15998_s7 }
   0xa   : > { %p14220_p5 = pnand %p16004_p3, %p13390_p4 }
   0xc   : > { %p14049_p7 = pneg %p14220_p5 }
   0xe   : > { %p14050_p8 = pnand %p14049_p7, %p14048_p6 }
  0x10   : > { %p14051_p9 = pneg %p14050_p8 }
  0x12   : > { %p14056_p11 = pnand %p14054_p10, %p14051_p9 }
  0x14   : > { %14059 = shalt.err (!%p14056_p11)
}
  0x15   : > { %s14060_s18 = scalar_lea.vmem %s343_s24, 576  ;;  %p14068_p1 = scmp.lt.s32.totalorder %s343_s24, %s343_s24 }
  0x16   : > { %p14061_p12 = scmp.ne.s32.totalorder %s343_s24, %s14060_s18  ;;  %p14069_p4 = scmp.lt.s32.totalorder %s14060_s18, %s14060_s18 }
  0x18   : > { %p14063_p13 = pnand %p14061_p12, %p14049_p7  ;;  %p14070_p3 = por %p14069_p4, %p14068_p1 }
  0x1a   : > { %p14064_p0 = pneg %p14063_p13 }
  0x1c   : > { %p14071_p2 = pnand %p14070_p3, %p14064_p0 }
  0x1e   : > { %14074 = shalt.err (!%p14071_p2)
}
  0x1f   : > { %s14121_s19 = smov 64   ;;  %s14122_s20 = smov 4  }
  0x20   : > { %13393 = dma.hbm_to_vmem [thread:$0]  (!%p14220_p5), %s15998_s7, 576, %s343_s24, [#allocation6], %s14121_s19, %s14121_s19, %s14122_s20  }
  0x21   : > { %s14075_s13 = scalar_lea.hbm %s15999_s8, 576 }
  0x22   : > { %p14076_p6 = scmp.ne.s32.totalorder %s15999_s8, %s14075_s13  ;;  %p14082_p8 = scmp.lt.u32.totalorder %s14075_s13, %s15999_s8 }
  0x24   : > { %p14078_p2 = pnand %p14076_p6, %p14049_p7 }
  0x26   : > { %p14079_p3 = pneg %p14078_p2 }
  0x28   : > { %p14084_p9 = pnand %p14082_p8, %p14079_p3 }
  0x2a   : > { %14087 = shalt.err (!%p14084_p9)
}
  0x2b   : > { %s14088_s24 = scalar_lea.vmem %s14224_s27, 576  ;;  %p14096_p13 = scmp.lt.s32.totalorder %s14224_s27, %s14224_s27 }
  0x2c   : > { %p14089_p10 = scmp.ne.s32.totalorder %s14224_s27, %s14088_s24  ;;  %p14097_p0 = scmp.lt.s32.totalorder %s14088_s24, %s14088_s24 }
  0x2e   : > { %p14091_p11 = pnand %p14089_p10, %p14049_p7  ;;  %p14098_p1 = por %p14097_p0, %p14096_p13 }
  0x30   : > { %p14092_p12 = pneg %p14091_p11 }
  0x32   : > { %p14099_p4 = pnand %p14098_p1, %p14092_p12 }
  0x34   : > { %14102 = shalt.err (!%p14099_p4)
}
  0x35   : > { %13396 = dma.hbm_to_vmem [thread:$0]  (!%p14220_p5), %s15999_s8, 576, %s14224_s27, [#allocation8], %s14121_s19, %s14121_s19, %s14122_s20  }
  0x36   : > { %p16014_p6 = scmp.ne.s32.totalorder %s16012_s25, 0 }
  0x37   : > { %p16015_p2 = scmp.eq.s32.totalorder (!%p16014_p6), %s14207_s22, 0 }
  0x38   : > { %388 = sbr.rel (%p16014_p6) target bundleno = 2237 (0x8bd), region = 68 }
  0x3f   : > { %14108 = dma.done.wait (%p16015_p2), [#allocation6], 576   ;;  %p16016_p7 = pmov %p16015_p2 }
  0x40   : > { %p16017_p3 = pmov %p16015_p2 }
  0x41   : > { %14110 = vsyncadd (%p16016_p7), [#allocation6], 4294966720 }
  0x42   : > { %14112 = dma.done.wait (%p16017_p3), [#allocation8], 576   ;;  %p16018_p8 = pmov %p16015_p2 }
  0x43   : > { %p434_p9 = scmp.lt.s32.totalorder %s14207_s22, 1  ;;  %v14123_v0 = vmov 0.0   ;;  %s14124_s20 = smov 127   ;;  %vm16006_vm0 = vcmask 23552   ;;  %v14321_v6 = vld [vmem:[%s15992_s1 + $0x10] sm:$0xff]  ;;  %v2158_v26 = vld [vmem:[%s15993_s2 + $0x8] sm:$0xff] }
  0x44   : > { %14114 = vsyncadd (%p16018_p8), [#allocation8], 4294966720  ;;  %596 = vmatprep.mubr.f32.mxu0 %v14123_v0  ;;  %2193 = vst [vmem:[#allocation2] sm:$0xff] %v14123_v0  ;;  %s14125_s26 = smov 126   ;;  %12425 = vmatprep.mubr.msk.f32.mxu1 %vm16006_vm0, %v14321_v6  ;;  %s14126_s13 = smov 110   ;;  %v2157_v27 = vld [vmem:[%s15993_s2] sm:$0xff] }
  0x45   : > { %s16140_s22 = smov (!%p434_p9, %s14207_s22), 1  ;;  %2197 = vst [vmem:[#allocation2 + $0x18] sm:$0xff] %v14123_v0  ;;  %3946 = vst [vmem:[#allocation3] sm:$0xff] %v14123_v0  ;;  %s14127_s14 = smov 109   ;;  %v14132_v28 = vmov 0   ;;  %vm16007_vm1 = vcmask 1042432  }
  0x46   : > { %3949 = vst [vmem:[#allocation3 + $0x18] sm:$0xff] %v14123_v0  ;;  %5694 = vst [vmem:[#allocation4] sm:$0xff] %v14123_v0  ;;  %s13375_s25 = smul.u32 12, %s16140_s22  ;;  %s14128_s15 = smov 108   ;;  %13427 = vset.pattern.permute.xlu1 %v14132_v28  ;;  %13426 = vset.pattern.permute.xlu0 %v14132_v28  ;;  %vm515_vm2 = vcmask 1039360   ;;  %v11926_v33 = vld [vmem:[%s15992_s1 + $0x18] sm:$0xff] }
  0x47   : > { %5697 = vst [vmem:[#allocation4 + $0x18] sm:$0xff] %v14123_v0  ;;  %s14129_s16 = smov 92   ;;  %s14130_s17 = smov 91   ;;  %vm862_vm3 = vcmask 1031168   ;;  %v499_v37 = vld [vmem:[%s15992_s1] sm:$0xff]  ;;  %v500_v40 = vld [vmem:[%s15992_s1 + $0x8] sm:$0xff] }
  0x48   : > { %s14300_s19 = scalar_lea.vmem %s15991_s0, %s13375_s25  ;;  %s14131_s24 = smov 90   ;;  %vm1049_vm4 = vcmask 900096   ;;  %v11941_v44 = vld [vmem:[%s15992_s1 + $0x20] sm:$0xff]  ;;  %v11942_v48 = vld [vmem:[%s15992_s1 + $0x28] sm:$0xff]  ;;  %vm1236_vm5 = vcmask 891904   ;;  %v11950_v51 = vld [vmem:[%s15992_s1 + $0x30] sm:$0xff] }
  0x49   : > { %v14303_v1 = vld [vmem:[%s14300_s19] sm:$0x77]  ;;  %v14315_v5 = vld [vmem:[%s14300_s19 + $0x8] sm:$0x7]  ;;  %v11951_v55 = vld [vmem:[%s15992_s1 + $0x38] sm:$0xff]  ;;  %vm16011_vm6 = vcmask 883712   ;;  %s443_s29 = scalar_lea.vmem %s16003_s12, %s13375_s25 }
  0x4a   : > { %v851_v2 = vld [vmem:[%s14300_s19] sm:$0x77]  ;;  %509 = vrot.lane.b32.xlu1 %v14303_v1, %s14124_s20  ;;  %v14310_v3 = vcombine.high %v14303_v1, %v14303_v1  ;;  %v852_v7 = vld [vmem:[%s14300_s19 + $0x8] sm:$0x7]  ;;  %vm16010_vm7 = vcmask 752640   ;;  %vm16009_vm8 = vcmask 744448  }
  0x4b   : > { %v855_v4 = vcombine.high %v851_v2, %v851_v2  ;;  %v1038_v8 = vld [vmem:[%s14300_s19] sm:$0x77]  ;;  %v1039_v9 = vld [vmem:[%s14300_s19 + $0x8] sm:$0x7]  ;;  %vm16008_vm9 = vcmask 736256   ;;  %vm2195_vm10 = vcmask 703488  }
  0x4c   : > { %511 = vrot.lane.b32.xlu0 %v14310_v3, %s14124_s20  ;;  %v1225_v10 = vld [vmem:[%s14300_s19] sm:$0x77]  ;;  %v1042_v11 = vcombine.high %v1038_v8, %v1038_v8  ;;  %v1226_v13 = vld [vmem:[%s14300_s19 + $0x8] sm:$0x7]  ;;  %2196 = vst.msk [vmem:[#allocation2 + $0x10] sm:$0xff] %vm2195_vm10, %v14123_v0  ;;  %2199 = vst.msk [vmem:[#allocation2 + $0x28] sm:$0xff] %vm2195_vm10, %v14123_v0 }
  0x4d   : > { %v1229_v12 = vcombine.high %v1225_v10, %v1225_v10  ;;  %v1412_v14 = vld [vmem:[%s14300_s19] sm:$0x77]  ;;  %v1413_v15 = vld [vmem:[%s14300_s19 + $0x8] sm:$0x7]  ;;  %3948 = vst.msk [vmem:[#allocation3 + $0x10] sm:$0xff] %vm2195_vm10, %v14123_v0  ;;  %3951 = vst.msk [vmem:[#allocation3 + $0x28] sm:$0xff] %vm2195_vm10, %v14123_v0 }
  0x4e   : > { %858 = vrot.lane.b32.xlu1 %v855_v4, %s14125_s26  ;;  %v1599_v16 = vld [vmem:[%s14300_s19] sm:$0x77]  ;;  %v1416_v17 = vcombine.high %v1412_v14, %v1412_v14  ;;  %v1600_v19 = vld [vmem:[%s14300_s19 + $0x8] sm:$0x7]  ;;  %5696 = vst.msk [vmem:[#allocation4 + $0x10] sm:$0xff] %vm2195_vm10, %v14123_v0  ;;  %5699 = vst.msk [vmem:[#allocation4 + $0x28] sm:$0xff] %vm2195_vm10, %v14123_v0 }
  0x4f   : > { %v1603_v18 = vcombine.high %v1599_v16, %v1599_v16  ;;  %v1786_v20 = vld [vmem:[%s14300_s19] sm:$0x77]  ;;  %v1787_v21 = vld [vmem:[%s14300_s19 + $0x8] sm:$0x7]  ;;  %s14133_s27 = smov 19  }
  0x50   : > { %513 = vrot.lane.b32.xlu0 %v14315_v5, %s14124_s20  ;;  %v1973_v22 = vld [vmem:[%s14300_s19] sm:$0x77]  ;;  %v1790_v23 = vcombine.high %v1786_v20, %v1786_v20  ;;  %v1974_v25 = vld [vmem:[%s14300_s19 + $0x8] sm:$0x7] }
  0x51   : > { %v1977_v24 = vcombine.high %v1973_v22, %v1973_v22  ;;  %v11959_v58 = vld [vmem:[%s15992_s1 + $0x40] sm:$0xff]  ;;  %v11960_v62 = vld [vmem:[%s15992_s1 + $0x48] sm:$0xff] }
  0x52   : > { %856 = vrot.lane.b32.xlu1 %v851_v2, %s14125_s26  ;;  %v11968_v2 = vld [vmem:[%s15992_s1 + $0x50] sm:$0xff] }
  0x54   : > { %860 = vrot.lane.b32.xlu0 %v852_v7, %s14125_s26 }
  0x56   : > { %1047 = vrot.lane.b32.xlu1 %v1039_v9, %s14126_s13  ;;  %v11977_v9 = vld [vmem:[%s15992_s1 + $0x60] sm:$0xff] }
  0x58   : > { %1045 = vrot.lane.b32.xlu0 %v1042_v11, %s14126_s13 }
  0x5a   : > { %1232 = vrot.lane.b32.xlu1 %v1229_v12, %s14127_s14  ;;  %v11978_v12 = vld [vmem:[%s15992_s1 + $0x68] sm:$0xff] }
  0x5c   : > { %1043 = vrot.lane.b32.xlu0 %v1038_v8, %s14126_s13 }
  0x5e   : > { %1230 = vrot.lane.b32.xlu1 %v1225_v10, %s14127_s14 }
  0x60   : > { %1234 = vrot.lane.b32.xlu0 %v1226_v13, %s14127_s14 }
  0x62   : > { %1421 = vrot.lane.b32.xlu1 %v1413_v15, %s14128_s15 }
  0x64   : > { %1419 = vrot.lane.b32.xlu0 %v1416_v17, %s14128_s15 }
  0x66   : > { %1606 = vrot.lane.b32.xlu1 %v1603_v18, %s14129_s16 }
  0x68   : > { %1417 = vrot.lane.b32.xlu0 %v1412_v14, %s14128_s15 }
  0x6a   : > { %1604 = vrot.lane.b32.xlu1 %v1599_v16, %s14129_s16  ;;  %v11986_v16 = vld [vmem:[%s15992_s1 + $0x70] sm:$0xff] }
  0x6c   : > { %1608 = vrot.lane.b32.xlu0 %v1600_v19, %s14129_s16  ;;  %v11987_v19 = vld [vmem:[%s15992_s1 + $0x78] sm:$0xff] }
  0x6e   : > { %1795 = vrot.lane.b32.xlu1 %v1787_v21, %s14130_s17  ;;  %v11995_v21 = vld [vmem:[%s15992_s1 + $0x80] sm:$0xff] }
  0x70   : > { %1793 = vrot.lane.b32.xlu0 %v1790_v23, %s14130_s17  ;;  %v444_v23 = vlaneseq }
  0x72   : > { %1980 = vrot.lane.b32.xlu1 %v1977_v24, %s14131_s24  ;;  %v445_v24 = vand.u32 127, %v444_v23 }
  0x74   : > { %1791 = vrot.lane.b32.xlu0 %v1786_v20, %s14130_s17 }
  0x76   : > { %1978 = vrot.lane.b32.xlu1 %v1973_v22, %s14131_s24  ;;  %v11996_v22 = vld [vmem:[%s15992_s1 + $0x88] sm:$0xff] }
  0x78   : > { %1982 = vrot.lane.b32.xlu0 %v1974_v25, %s14131_s24  ;;  %v447_v25 = vadd.s32 256, %v445_v24 }
  0x7a   : > { %2166 = vperm.xlu1 %13427, %v2158_v26   ;;  %v446_v26 = vadd.s32 128, %v445_v24 }
  0x7c   : > { %2161 = vperm.xlu0 %13426, %v2157_v27   ;;  %v14528_v27 = vmul.u32.u64.low 3817748708, %v447_v25  ;;  %v14529_v28 = vmul.u32.u64.high 3817748708, %v447_v25, %v14528_v27 }
  0xbc   : > { %v510_v29 = vpop.permute.xlu1 %509 }
  0xbe   : > { %v512_v30 = vpop.permute.xlu0 %511 }
  0xbf   : > { %v516_v35 = vsel %vm515_vm2, %v510_v29, %v512_v30 }
  0xc0   : > { %v859_v31 = vpop.permute.xlu1 %858 }
  0xc2   : > { %v514_v32 = vpop.permute.xlu0 %513 }
  0xc3   : > { %12423 = vmatprep.subr.msk.mxu1 %vm16007_vm1, %v514_v32  ;;  %v517_v34 = vsel %vm515_vm2, %v512_v30, %v514_v32  ;;  %v14531_v29 = vmul.u32.u64.low 3817748708, %v446_v26  ;;  %v14532_v30 = vmul.u32.u64.high 3817748708, %v446_v26, %v14531_v29 }
  0xc4   : > { %11927 = vmatprep.subr.msk.mxu0 %vm16007_vm1, %v517_v34  ;;  %12424 = vmatpush3.msk.msra.mxu1 %vm16007_vm1, %v514_v32  ;;  %v857_v38 = vpop.permute.xlu1 %856 }
  0xc5   : > { %11928 = vmatpush1.msk.msra.mxu0 %vm16007_vm1, %v516_v35  ;;  %12426 = vmatmul.mubr.msk.f32.vlgmr.msra.gmra.mrb[0].mxu1 %vm16006_vm0, %v11926_v33  ;;  %v863_v43 = vsel %vm862_vm3, %v857_v38, %v859_v31  ;;  %v465_v34 = vshrl.u32 %v14532_v30, 4 }
  0xc6   : > { %11929 = vmatmul.mubr.msk.f32.vlgmr.msra.gmra.mrb[0].mxu0 %vm16006_vm0, %v14321_v6  ;;  %11934 = vmatprep.subr.msk.mxu0 %vm16007_vm1, %v14310_v3  ;;  %v861_v36 = vpop.permute.xlu0 %860  ;;  %v11969_v6 = vld [vmem:[%s15992_s1 + $0x58] sm:$0xff] }
  0xc7   : > { %602 = vmatprep.mubr.f32.mxu0 %v14123_v0  ;;  %12428 = vmatprep.subr.msk.mxu1 %vm16007_vm1, %v14315_v5  ;;  %v864_v39 = vsel %vm862_vm3, %v859_v31, %v861_v36  ;;  %v14534_v31 = vmul.u32.u64.low 3817748708, %v445_v24  ;;  %v14535_v32 = vmul.u32.u64.high 3817748708, %v445_v24, %v14534_v31 }
  0xc8   : > { %11935 = vmatpush1.msk.msra.mxu0 %vm16007_vm1, %v14303_v1  ;;  %12429 = vmatpush3.msk.msra.mxu1 %vm16007_vm1, %v14315_v5  ;;  %v1048_v42 = vpop.permute.xlu1 %1047 }
  0xc9   : > { %12430 = vmatprep.mubr.msk.f32.mxu1 %vm16006_vm0, %v499_v37  ;;  %11943 = vmatprep.subr.msk.mxu0 %vm16007_vm1, %v864_v39 }
  0xca   : > { %11930 = vmatmul.mubr.msk.f32.gmra.mrb[2].mxu0 %vm16006_vm0, %v11926_v33  ;;  %12433 = vmatprep.subr.msk.mxu1 %vm16007_vm1, %v861_v36  ;;  %v1046_v41 = vpop.permute.xlu0 %1045  ;;  %v476_v33 = vshrl.u32 %v14529_v28, 4 }
  0xcb   : > { %760 = vmatprep.mubr.f32.mxu0 %v14123_v0  ;;  %v1051_v45 = vsel %vm1049_vm4, %v1046_v41, %v1048_v42 }
  0xcc   : > { %v1233_v47 = vpop.permute.xlu1 %1232  ;;  %v477_v35 = vmul.u32 18, %v476_v33 }
  0xcd   : > { %12431 = vmatmul.mubr.msk.f32.vlgmr.msra.gmra.mrb[0].mxu1 %vm16006_vm0, %v500_v40 }
  0xce   : > { %11936 = vmatmul.mubr.msk.f32.vlgmr.msra.gmra.mrb[0].mxu0 %vm16006_vm0, %v499_v37  ;;  %12434 = vmatpush3.msk.msra.mxu1 %vm16007_vm1, %v861_v36  ;;  %v1044_v46 = vpop.permute.xlu0 %1043  ;;  %v454_v36 = vshrl.u32 %v14535_v32, 4  ;;  %v466_v37 = vmul.u32 18, %v465_v34  ;;  %v478_v38 = vsub.s32 %v447_v25, %v477_v35 }
  0xcf   : > { %11944 = vmatpush1.msk.msra.mxu0 %vm16007_vm1, %v863_v43  ;;  %766 = vmatprep.mubr.f32.mxu0 %v14123_v0  ;;  %v1050_v50 = vsel %vm1049_vm4, %v1044_v46, %v1046_v41 }
  0xd0   : > { %12435 = vmatprep.mubr.msk.f32.mxu1 %vm16006_vm0, %v11941_v44  ;;  %11952 = vmatprep.subr.msk.mxu0 %vm16007_vm1, %v1051_v45  ;;  %v1231_v53 = vpop.permute.xlu1 %1230  ;;  %v455_v39 = vmul.u32 18, %v454_v36  ;;  %vm483_vm11 = vcmp.ne.s32.totalorder %v478_v38, 0  ;;  %vm486_vm12 = vcmp.lt.s32.totalorder %v478_v38, 0 }
  0xd1   : > { %12438 = vmatprep.subr.msk.mxu1 %vm16007_vm1, %v1048_v42  ;;  %v1237_v57 = vsel %vm1236_vm5, %v1231_v53, %v1233_v47  ;;  %vm14546_vm15 = vmand %vm486_vm12, %vm483_vm11 }
  0xd2   : > { %11937 = vmatmul.mubr.msk.f32.gmra.mrb[2].mxu0 %vm16006_vm0, %v500_v40  ;;  %v1235_v49 = vpop.permute.xlu0 %1234  ;;  %v467_v40 = vsub.s32 %v446_v26, %v466_v37  ;;  %v456_v41 = vsub.s32 %v445_v24, %v455_v39  ;;  %v3916_v37 = vld [vmem:[%s15995_s4] sm:$0xff] }
  0xd3   : > { %941 = vmatprep.mubr.f32.mxu0 %v14123_v0  ;;  %v1238_v52 = vsel %vm1236_vm5, %v1233_v47, %v1235_v49 }
  0xd4   : > { %v1422_v56 = vpop.permute.xlu1 %1421  ;;  %vm482_vm13 = vcmp.ne.s32.totalorder %v467_v40, 0  ;;  %vm485_vm14 = vcmp.lt.s32.totalorder %v467_v40, 0 }
  0xd5   : > { %12436 = vmatmul.mubr.msk.f32.vlgmr.msra.gmra.mrb[0].mxu1 %vm16006_vm0, %v11942_v48 }
  0xd6   : > { %11945 = vmatmul.mubr.msk.f32.vlgmr.msra.gmra.mrb[0].mxu0 %vm16006_vm0, %v11941_v44  ;;  %12439 = vmatpush3.msk.msra.mxu1 %vm16007_vm1, %v1048_v42  ;;  %v1420_v54 = vpop.permute.xlu0 %1419  ;;  %v492_v42 = vadd.s32 18, %v478_v38  ;;  %v491_v44 = vadd.s32 18, %v467_v40 }
  0xd7   : > { %11953 = vmatpush1.msk.msra.mxu0 %vm16007_vm1, %v1050_v50  ;;  %947 = vmatprep.mubr.f32.mxu0 %v14123_v0  ;;  %v1425_v59 = vsel %vm16011_vm6, %v1420_v54, %v1422_v56 }
  0xd8   : > { %12440 = vmatprep.mubr.msk.f32.mxu1 %vm16006_vm0, %v11950_v51  ;;  %11961 = vmatprep.subr.msk.mxu0 %vm16007_vm1, %v1238_v52  ;;  %v1607_v61 = vpop.permute.xlu1 %1606 }
  0xd9   : > { %12443 = vmatprep.subr.msk.mxu1 %vm16007_vm1, %v1235_v49 }
  0xda   : > { %11946 = vmatmul.mubr.msk.f32.gmra.mrb[2].mxu0 %vm16006_vm0, %v11942_v48  ;;  %v1418_v60 = vpop.permute.xlu0 %1417  ;;  %v495_v48 = vsel %vm14546_vm15, %v492_v42, %v478_v38  ;;  %v3917_v38 = vld [vmem:[%s15995_s4 + $0x8] sm:$0xff]  ;;  %vm16031_vm15 = vcmask 736256  }
  0xdb   : > { %1128 = vmatprep.mubr.f32.mxu0 %v14123_v0  ;;  %v1424_v1 = vsel %vm16011_vm6, %v1418_v60, %v1420_v54  ;;  %vm14562_vm11 = vcmp.lt.s32.totalorder %v495_v48, 16 }
  0xdc   : > { %v1605_v4 = vpop.permute.xlu1 %1604 }
  0xdd   : > { %12441 = vmatmul.mubr.msk.f32.vlgmr.msra.gmra.mrb[0].mxu1 %vm16006_vm0, %v11951_v55  ;;  %v1611_v8 = vsel %vm16010_vm7, %v1605_v4, %v1607_v61 }
  0xde   : > { %11954 = vmatmul.mubr.msk.f32.vlgmr.msra.gmra.mrb[0].mxu0 %vm16006_vm0, %v11950_v51  ;;  %12444 = vmatpush3.msk.msra.mxu1 %vm16007_vm1, %v1235_v49  ;;  %v1609_v63 = vpop.permute.xlu0 %1608  ;;  %v490_v49 = vadd.s32 18, %v456_v41 }
  0xdf   : > { %11962 = vmatpush1.msk.msra.mxu0 %vm16007_vm1, %v1237_v57  ;;  %1134 = vmatprep.mubr.f32.mxu0 %v14123_v0  ;;  %v1612_v3 = vsel %vm16010_vm7, %v1607_v61, %v1609_v63 }
  0xe0   : > { %12445 = vmatprep.mubr.msk.f32.mxu1 %vm16006_vm0, %v11959_v58  ;;  %11970 = vmatprep.subr.msk.mxu0 %vm16007_vm1, %v1425_v59  ;;  %v1796_v7 = vpop.permute.xlu1 %1795 }
  0xe1   : > { %12448 = vmatprep.subr.msk.mxu1 %vm16007_vm1, %v1422_v56 }
  0xe2   : > { %11955 = vmatmul.mubr.msk.f32.gmra.mrb[2].mxu0 %vm16006_vm0, %v11951_v55  ;;  %v1794_v5 = vpop.permute.xlu0 %1793 }
  0xe3   : > { %1315 = vmatprep.mubr.f32.mxu0 %v14123_v0  ;;  %v1799_v10 = vsel %vm16009_vm8, %v1794_v5, %v1796_v7 }
  0xe4   : > { %v1981_v14 = vpop.permute.xlu1 %1980 }
  0xe5   : > { %12446 = vmatmul.mubr.msk.f32.vlgmr.msra.gmra.mrb[0].mxu1 %vm16006_vm0, %v11960_v62 }
  0xe6   : > { %11963 = vmatmul.mubr.msk.f32.vlgmr.msra.gmra.mrb[0].mxu0 %vm16006_vm0, %v11959_v58  ;;  %12449 = vmatpush3.msk.msra.mxu1 %vm16007_vm1, %v1422_v56  ;;  %v1792_v11 = vpop.permute.xlu0 %1791 }
  0xe7   : > { %11971 = vmatpush1.msk.msra.mxu0 %vm16007_vm1, %v1424_v1  ;;  %1321 = vmatprep.mubr.f32.mxu0 %v14123_v0  ;;  %v1798_v15 = vsel %vm16009_vm8, %v1792_v11, %v1794_v5 }
  0xe8   : > { %12450 = vmatprep.mubr.msk.f32.mxu1 %vm16006_vm0, %v11968_v2  ;;  %11979 = vmatprep.subr.msk.mxu0 %vm16007_vm1, %v1612_v3  ;;  %v1979_v18 = vpop.permute.xlu1 %1978 }
  0xe9   : > { %12453 = vmatprep.subr.msk.mxu1 %vm16007_vm1, %v1609_v63  ;;  %v1985_v20 = vsel %vm16008_vm9, %v1979_v18, %v1981_v14 }
  0xea   : > { %11964 = vmatmul.mubr.msk.f32.gmra.mrb[2].mxu0 %vm16006_vm0, %v11960_v62  ;;  %v1983_v13 = vpop.permute.xlu0 %1982 }
  0xeb   : > { %1502 = vmatprep.mubr.f32.mxu0 %v14123_v0  ;;  %v1986_v17 = vsel %vm16008_vm9, %v1981_v14, %v1983_v13  ;;  %vm484_vm9 = vcmp.lt.s32.totalorder %v456_v41, 0 }
  0xed   : > { %12451 = vmatmul.mubr.msk.f32.vlgmr.msra.gmra.mrb[0].mxu1 %vm16006_vm0, %v11969_v6 }
  0xee   : > { %11972 = vmatmul.mubr.msk.f32.vlgmr.msra.gmra.mrb[0].mxu0 %vm16006_vm0, %v11968_v2  ;;  %12454 = vmatpush3.msk.msra.mxu1 %vm16007_vm1, %v1609_v63 }
  0xef   : > { %11980 = vmatpush1.msk.msra.mxu0 %vm16007_vm1, %v1611_v8  ;;  %1508 = vmatprep.mubr.f32.mxu0 %v14123_v0 }
  0xf0   : > { %12455 = vmatprep.mubr.msk.f32.mxu1 %vm16006_vm0, %v11977_v9  ;;  %11988 = vmatprep.subr.msk.mxu0 %vm16007_vm1, %v1799_v10 }
  0xf1   : > { %12458 = vmatprep.subr.msk.mxu1 %vm16007_vm1, %v1796_v7 }
  0xf2   : > { %11973 = vmatmul.mubr.msk.f32.gmra.mrb[2].mxu0 %vm16006_vm0, %v11969_v6 }
  0xf3   : > { %1689 = vmatprep.mubr.f32.mxu0 %v14123_v0 }
  0xf5   : > { %12456 = vmatmul.mubr.msk.f32.vlgmr.msra.gmra.mrb[0].mxu1 %vm16006_vm0, %v11978_v12 }
  0xf6   : > { %11981 = vmatmul.mubr.msk.f32.vlgmr.msra.gmra.mrb[0].mxu0 %vm16006_vm0, %v11977_v9  ;;  %12459 = vmatpush3.msk.msra.mxu1 %vm16007_vm1, %v1796_v7 }
  0xf7   : > { %11989 = vmatpush1.msk.msra.mxu0 %vm16007_vm1, %v1798_v15  ;;  %1695 = vmatprep.mubr.f32.mxu0 %v14123_v0 }
  0xf8   : > { %12460 = vmatprep.mubr.msk.f32.mxu1 %vm16006_vm0, %v11986_v16  ;;  %11997 = vmatprep.subr.msk.mxu0 %vm16007_vm1, %v1986_v17 }
  0xf9   : > { %12463 = vmatprep.subr.msk.mxu1 %vm16007_vm1, %v1983_v13  ;;  %v2167_v59 = vpop.permute.xlu1 %2166 }
  0xfa   : > { %11982 = vmatmul.mubr.msk.f32.gmra.mrb[2].mxu0 %vm16006_vm0, %v11978_v12 }
  0xfb   : > { %1876 = vmatprep.mubr.f32.mxu0 %v14123_v0  ;;  %v2162_v46 = vpop.permute.xlu0 %2161 }
  0xfd   : > { %12461 = vmatmul.mubr.msk.f32.vlgmr.msra.gmra.mrb[0].mxu1 %vm16006_vm0, %v11987_v19 }
  0xfe   : > { %11990 = vmatmul.mubr.msk.f32.vlgmr.msra.gmra.mrb[0].mxu0 %vm16006_vm0, %v11986_v16  ;;  %12464 = vmatpush3.msk.msra.mxu1 %vm16007_vm1, %v1983_v13 }
  0xff   : > { %11998 = vmatpush1.msk.msra.mxu0 %vm16007_vm1, %v1985_v20  ;;  %1882 = vmatprep.mubr.f32.mxu0 %v14123_v0  ;;  %vm481_vm1 = vcmp.ne.s32.totalorder %v456_v41, 0 }
 0x100   : > { %12465 = vmatprep.mubr.msk.f32.mxu1 %vm16006_vm0, %v11995_v21  ;;  %vm14558_vm10 = vmand %vm484_vm9, %vm481_vm1  ;;  %vm2218_vm1 = vcmask 154624   ;;  %vm2232_vm9 = vcmask 416768  }
 0x101   : > { %v493_v62 = vsel %vm14558_vm10, %v490_v49, %v456_v41  ;;  %vm16032_vm10 = vmmov %vm16031_vm15 }
 0x102   : > { %11991 = vmatmul.mubr.msk.f32.gmra.mrb[2].mxu0 %vm16006_vm0, %v11987_v19 }
 0x103   : > { %2063 = vmatprep.mubr.f32.mxu0 %v14123_v0 }
 0x105   : > { %12466 = vmatmul.mubr.msk.f32.vlgmr.msra.gmra.mrb[0].mxu1 %vm16006_vm0, %v11996_v22 }
 0x106   : > { %11999 = vmatmul.mubr.msk.f32.vlgmr.msra.gmra.mrb[0].mxu0 %vm16006_vm0, %v11995_v21  ;;  %2347 = vmatprep.mubr.f32.mxu1 %v14123_v0 }
 0x107   : > { %2069 = vmatprep.mubr.f32.mxu0 %v14123_v0 }
 0x10a   : > { %12000 = vmatmul.mubr.msk.f32.gmra.mrb[2].mxu0 %vm16006_vm0, %v11996_v22  ;;  %vm14550_vm0 = vmand %vm485_vm14, %vm482_vm13  ;;  %vm2229_vm13 = vcmask 1047704   ;;  %vm2276_vm14 = vcmask 130048  }
 0x10b   : > { %4095 = vmatprep.mubr.f32.mxu0 %v14123_v0  ;;  %v494_v52 = vsel %vm14550_vm0, %v491_v44, %v467_v40  ;;  %vm14577_vm0 = vcmp.lt.s32.totalorder %v493_v62, 16 }
 0x10c   : > { %vm14566_vm12 = vcmp.lt.s32.totalorder %v494_v52, 16 }
 0x1d8   : > { %v12467_v47 = vpop.f32.mrb[0].mxu1 }
 0x1d9   : > { %v2065_v50 = vpop.f32.mrb[0].mxu0  ;;  %v2142_v51 = vpop.f32.mrb[1].mxu1  ;;  %v2174_v6 = vadd.f32 %v12467_v47, %v2167_v59 }
 0x1da   : > { %v2169_v54 = vadd.f32 %v2162_v46, %v2065_v50  ;;  %v2171_v55 = vadd.f32 %v2162_v46, %v2142_v51  ;;  %v2067_v56 = vpop.f32.mrb[1].mxu0 }
 0x1db   : > { %v2170_v57 = vadd.f32 %v2162_v46, %v2067_v56  ;;  %v2180_v14 = vmax.f32 %v2174_v6, 0.0  ;;  %v12005_v56 = vld [vmem:[%s15994_s3 + $0x18] sm:$0xff] }
 0x1dc   : > { %v2177_v60 = vmax.f32 %v2171_v55, 0.0  ;;  %v2175_v2 = vmax.f32 %v2169_v54, 0.0  ;;  %v12004_v55 = vld [vmem:[%s15994_s3 + $0x10] sm:$0xff] }
 0x1dd   : > { %v2176_v63 = vmax.f32 %v2170_v57, 0.0  ;;  %v2071_v1 = vpop.f32.mrb[2].mxu0  ;;  %v2192_v16 = vsel %vm14562_vm11, %v2180_v14, 0.0 }
 0x1de   : > { %v2172_v3 = vadd.f32 %v2167_v59, %v2071_v1  ;;  %v2073_v4 = vpop.f32.mrb[3].mxu0  ;;  %v2189_v5 = vsel %vm14562_vm11, %v2177_v60, 0.0  ;;  %v2187_v12 = vsel %vm14577_vm0, %v2175_v2, 0.0 }
 0x1df   : > { %v2173_v7 = vadd.f32 %v2167_v59, %v2073_v4  ;;  %2210 = vrot.lane.b32.xlu1 %v2189_v5, %s14133_s27  ;;  %v2188_v8 = vsel %vm14566_vm12, %v2176_v63, 0.0 }
 0x1e0   : > { %v2178_v10 = vmax.f32 %v2172_v3, 0.0  ;;  %2208 = vrot.lane.b32.xlu0 %v2188_v8, %s14133_s27  ;;  %v2237_v3 = vld [vmem:[%s15994_s3] sm:$0xff] }
 0x1e1   : > { %v2179_v11 = vmax.f32 %v2173_v7, 0.0 }
 0x1e2   : > { %v2190_v13 = vsel %vm14577_vm0, %v2178_v10, 0.0  ;;  %v2238_v10 = vld [vmem:[%s15994_s3 + $0x8] sm:$0xff] }
 0x1e3   : > { %2206 = vrot.lane.b32.xlu1 %v2187_v12, %s14133_s27  ;;  %v2191_v15 = vsel %vm14566_vm12, %v2179_v11, 0.0 }
 0x1e4   : > { %2212 = vrot.lane.b32.xlu0 %v2190_v13, %s14133_s27 }
 0x1e7   : > { %2214 = vrot.lane.b32.xlu1 %v2191_v15, %s14133_s27 }
 0x1e8   : > { %2216 = vrot.lane.b32.xlu0 %v2192_v16, %s14133_s27 }
 0x251   : > { %v2211_v17 = vpop.permute.xlu1 %2210 }
 0x252   : > { %v2209_v18 = vpop.permute.xlu0 %2208 }
 0x253   : > { %v2220_v19 = vsel %vm2218_vm1, %v2209_v18, %v2211_v17 }
 0x254   : > { %2233 = vst.msk [vmem:[#allocation2 + $0x10] sm:$0xff] %vm2232_vm9, %v2220_v19 }
 0x255   : > { %v2207_v20 = vpop.permute.xlu1 %2206 }
 0x256   : > { %v2219_v21 = vsel %vm2218_vm1, %v2207_v20, %v2209_v18  ;;  %2230 = vst.msk [vmem:[#allocation2] sm:$0xff] %vm2229_vm13, %v2207_v20  ;;  %v2213_v22 = vpop.permute.xlu0 %2212 }
 0x257   : > { %2234 = vst.msk [vmem:[#allocation2 + $0x18] sm:$0xff] %vm2229_vm13, %v2213_v22 }
 0x259   : > { %v2215_v23 = vpop.permute.xlu1 %2214 }
 0x25a   : > { %v2221_v24 = vsel %vm2218_vm1, %v2213_v22, %v2215_v23  ;;  %v2217_v25 = vpop.permute.xlu0 %2216 }
 0x25b   : > { %v2222_v26 = vsel %vm2218_vm1, %v2215_v23, %v2217_v25  ;;  %v2241_v27 = vld [vmem:[#allocation2 + $0x10] sm:$0xff]  ;;  %v14601_v28 = vpack.c.bf16 %v2221_v24, %v2219_v21 }
 0x25c   : > { %2236 = vst.msk [vmem:[#allocation2 + $0x28] sm:$0xff] %vm2232_vm9, %v2222_v26  ;;  %v14604_v29 = vpack.i.bf16 %v2241_v27, %v2219_v21  ;;  %v12014_v21 = vld [vmem:[%s15994_s3 + $0x20] sm:$0xff]  ;;  %v12015_v26 = vld [vmem:[%s15994_s3 + $0x28] sm:$0xff] }
 0x25d   : > { %v2239_v30 = vld [vmem:[#allocation2] sm:$0xff] }
 0x25e   : > { %13429 = vrot.lane.b32.xlu1 %v14604_v29, %s14124_s20  ;;  %v2242_v31 = vld [vmem:[#allocation2 + $0x18] sm:$0xff] }
 0x25f   : > { %v14608_v32 = vpack.i.bf16 %v2242_v31, %v2239_v30  ;;  %v14610_v33 = vpack.c.bf16 %v2242_v31, %v2239_v30 }
 0x262   : > { %13439 = vrot.lane.b32.xlu1 %v14608_v32, %s14124_s20 }
 0x263   : > { %v2244_v34 = vld [vmem:[#allocation2 + $0x28] sm:$0xff] }
 0x264   : > { %v14614_v35 = vpack.i.bf16 %v2244_v34, %v2221_v24  ;;  %v14616_v36 = vpack.c.bf16 %v2244_v34, %v2241_v27 }
 0x266   : > { %13434 = vrot.lane.b32.xlu0 %v14614_v35, %s14124_s20  ;;  %13449 = vrot.lane.b32.xlu1 %v14614_v35, %s14125_s26 }
 0x26a   : > { %13444 = vrot.lane.b32.xlu0 %v14604_v29, %s14125_s26  ;;  %13459 = vrot.lane.b32.xlu1 %v14604_v29, %s14126_s13 }
 0x26e   : > { %13454 = vrot.lane.b32.xlu0 %v14608_v32, %s14125_s26  ;;  %13469 = vrot.lane.b32.xlu1 %v14608_v32, %s14126_s13 }
 0x272   : > { %13464 = vrot.lane.b32.xlu0 %v14614_v35, %s14126_s13  ;;  %13479 = vrot.lane.b32.xlu1 %v14614_v35, %s14127_s14 }
 0x276   : > { %13474 = vrot.lane.b32.xlu0 %v14604_v29, %s14127_s14  ;;  %13489 = vrot.lane.b32.xlu1 %v14604_v29, %s14128_s15 }
 0x27a   : > { %13484 = vrot.lane.b32.xlu0 %v14608_v32, %s14127_s14  ;;  %13499 = vrot.lane.b32.xlu1 %v14608_v32, %s14128_s15 }
 0x27e   : > { %13494 = vrot.lane.b32.xlu0 %v14614_v35, %s14128_s15  ;;  %13509 = vrot.lane.b32.xlu1 %v14614_v35, %s14129_s16 }
 0x282   : > { %13504 = vrot.lane.b32.xlu0 %v14604_v29, %s14129_s16  ;;  %13519 = vrot.lane.b32.xlu1 %v14604_v29, %s14130_s17 }
 0x286   : > { %13514 = vrot.lane.b32.xlu0 %v14608_v32, %s14129_s16  ;;  %13529 = vrot.lane.b32.xlu1 %v14608_v32, %s14130_s17 }
 0x28a   : > { %13524 = vrot.lane.b32.xlu0 %v14614_v35, %s14130_s17  ;;  %13539 = vrot.lane.b32.xlu1 %v14614_v35, %s14131_s24 }
 0x28e   : > { %13534 = vrot.lane.b32.xlu0 %v14604_v29, %s14131_s24  ;;  %3920 = vperm.xlu1 %13427, %v3916_v37  }
 0x292   : > { %13544 = vrot.lane.b32.xlu0 %v14608_v32, %s14131_s24 }
 0x296   : > { %3925 = vperm.xlu0 %13426, %v3917_v38  }
 0x2d0   : > { %v13430_v39 = vpop.permute.xlu1 %13429 }
 0x2d1   : > { %v13432_v41 = vunpack.i.h.bf16 %v13430_v39  ;;  %v13431_v42 = vunpack.i.l.bf16 %v13430_v39 }
 0x2d3   : > { %v2267_v50 = vsel %vm515_vm2, %v13431_v42, %v13432_v41 }
 0x2d4   : > { %v13440_v40 = vpop.permute.xlu1 %13439 }
 0x2d5   : > { %v13441_v43 = vunpack.i.l.bf16 %v13440_v40  ;;  %v13442_v45 = vunpack.i.h.bf16 %v13440_v40 }
 0x2d7   : > { %v2266_v48 = vsel %vm515_vm2, %v13441_v43, %v13431_v42 }
 0x2d8   : > { %v13435_v44 = vpop.permute.xlu0 %13434  ;;  %v13450_v59 = vpop.permute.xlu1 %13449 }
 0x2d9   : > { %v13437_v46 = vunpack.i.h.bf16 %v13435_v44  ;;  %v13436_v47 = vunpack.i.l.bf16 %v13435_v44  ;;  %v13452_v63 = vunpack.i.h.bf16 %v13450_v59  ;;  %v13451_v1 = vunpack.i.l.bf16 %v13450_v59 }
 0x2db   : > { %v2268_v49 = vsel %vm515_vm2, %v13442_v45, %v13436_v47  ;;  %v2269_v51 = vsel %vm515_vm2, %v13436_v47, %v13437_v46  ;;  %v12832_v54 = vpack.c.bf16 %v13437_v46, %v13432_v41  ;;  %v2611_v5 = vsel %vm862_vm3, %v13451_v1, %v13452_v63  ;;  %v12020_v46 = vld [vmem:[%s15994_s3 + $0x30] sm:$0xff] }
 0x2dc   : > { %v12828_v52 = vpack.c.bf16 %v2269_v51, %v2267_v50  ;;  %v12830_v53 = vpack.c.bf16 %v2268_v49, %v2266_v48  ;;  %v13445_v57 = vpop.permute.xlu0 %13444  ;;  %v13460_v12 = vpop.permute.xlu1 %13459 }
 0x2dd   : > { %v13447_v60 = vunpack.i.h.bf16 %v13445_v57  ;;  %v13446_v62 = vunpack.i.l.bf16 %v13445_v57  ;;  %v13462_v17 = vunpack.i.h.bf16 %v13460_v12  ;;  %v13461_v18 = vunpack.i.l.bf16 %v13460_v12 }
 0x2de   : > { %12829 = vmatprep.subr.bf16.mxu1 %v12828_v52  ;;  %v12021_v52 = vld [vmem:[%s15994_s3 + $0x38] sm:$0xff] }
 0x2df   : > { %12831 = vmatpush1.bf16.msra.mxu1 %v12830_v53  ;;  %v2609_v4 = vsel %vm862_vm3, %v13446_v62, %v13447_v60  ;;  %v12848_v20 = vpack.c.bf16 %v13452_v63, %v13447_v60  ;;  %v2798_v24 = vsel %vm1049_vm4, %v13461_v18, %v13462_v17 }
 0x2e0   : > { %12833 = vmatprep.subr.bf16.mxu1 %v12832_v54  ;;  %v13455_v2 = vpop.permute.xlu0 %13454  ;;  %v12844_v8 = vpack.c.bf16 %v2611_v5, %v2609_v4  ;;  %v13470_v23 = vpop.permute.xlu1 %13469 }
 0x2e1   : > { %v13457_v6 = vunpack.i.h.bf16 %v13455_v2  ;;  %v13456_v7 = vunpack.i.l.bf16 %v13455_v2  ;;  %v13472_v27 = vunpack.i.h.bf16 %v13470_v23  ;;  %v13471_v30 = vunpack.i.l.bf16 %v13470_v23  ;;  %v12026_v2 = vld [vmem:[%s15994_s3 + $0x40] sm:$0xff] }
 0x2e2   : > { %12006 = vmatmul.mubr.msk.f32.vlgmr.msra.gmra.mrb[2].mxu1 %vm2276_vm14, %v12004_v55 }
 0x2e3   : > { %12835 = vmatpush3.bf16.msra.mxu1 %v12832_v54  ;;  %2353 = vmatprep.mubr.f32.mxu1 %v14123_v0  ;;  %v2608_v13 = vsel %vm862_vm3, %v13456_v7, %v13446_v62  ;;  %v2610_v14 = vsel %vm862_vm3, %v13457_v6, %v13451_v1  ;;  %v2797_v40 = vsel %vm1049_vm4, %v13471_v30, %v13461_v18  ;;  %v12027_v7 = vld [vmem:[%s15994_s3 + $0x48] sm:$0xff]  ;;  %v12033_v30 = vld [vmem:[%s15994_s3 + $0x58] sm:$0xff] }
 0x2e4   : > { %12837 = vmatprep.subr.bf16.mxu1 %v14601_v28  ;;  %v13465_v11 = vpop.permute.xlu0 %13464  ;;  %v12846_v19 = vpack.c.bf16 %v2610_v14, %v2608_v13  ;;  %v13480_v37 = vpop.permute.xlu1 %13479 }
 0x2e5   : > { %v13467_v15 = vunpack.i.h.bf16 %v13465_v11  ;;  %v13466_v16 = vunpack.i.l.bf16 %v13465_v11  ;;  %v13482_v41 = vunpack.i.h.bf16 %v13480_v37  ;;  %v13481_v42 = vunpack.i.l.bf16 %v13480_v37 }
 0x2e6   : > { %12007 = vmatmul.mubr.msk.f32.gmra.mrb[4].mxu1 %vm2276_vm14, %v12005_v56 }
 0x2e7   : > { %12472 = vmatprep.mubr.msk.f32.mxu1 %vm2276_vm14, %v12004_v55  ;;  %v2800_v22 = vsel %vm1049_vm4, %v13466_v16, %v13467_v15  ;;  %v2799_v34 = vsel %vm1049_vm4, %v13472_v27, %v13466_v16  ;;  %v12856_v45 = vpack.c.bf16 %v13467_v15, %v13462_v17  ;;  %v2989_v48 = vsel %vm1236_vm5, %v13481_v42, %v13482_v41 }
 0x2e8   : > { %v12852_v25 = vpack.c.bf16 %v2800_v22, %v2798_v24  ;;  %v13475_v31 = vpop.permute.xlu0 %13474  ;;  %v12854_v43 = vpack.c.bf16 %v2799_v34, %v2797_v40  ;;  %v13490_v54 = vpop.permute.xlu1 %13489  ;;  %v12032_v22 = vld [vmem:[%s15994_s3 + $0x50] sm:$0xff] }
 0x2e9   : > { %v13477_v38 = vunpack.i.h.bf16 %v13475_v31  ;;  %v13476_v39 = vunpack.i.l.bf16 %v13475_v31  ;;  %v13492_v60 = vunpack.i.h.bf16 %v13490_v54  ;;  %v13491_v62 = vunpack.i.l.bf16 %v13490_v54 }
 0x2ea   : > { %12473 = vmatmul.mubr.msk.f32.vlgmr.msra.gmra.mrb[6].mxu1 %vm2276_vm14, %v12005_v56 }
 0x2eb   : > { %12839 = vmatpush1.bf16.msra.mxu1 %v14610_v33  ;;  %2505 = vmatprep.mubr.f32.mxu1 %v14123_v0  ;;  %v2987_v47 = vsel %vm1236_vm5, %v13476_v39, %v13477_v38  ;;  %v12864_v1 = vpack.c.bf16 %v13482_v41, %v13477_v38  ;;  %v3176_v5 = vsel %vm16011_vm6, %v13491_v62, %v13492_v60 }
 0x2ec   : > { %12841 = vmatprep.subr.bf16.mxu1 %v14616_v36  ;;  %v13485_v44 = vpop.permute.xlu0 %13484  ;;  %v12860_v51 = vpack.c.bf16 %v2989_v48, %v2987_v47  ;;  %v13500_v4 = vpop.permute.xlu1 %13499 }
 0x2ed   : > { %v13487_v49 = vunpack.i.h.bf16 %v13485_v44  ;;  %v13486_v50 = vunpack.i.l.bf16 %v13485_v44 }
 0x2ee   : > { %12010 = vmatmul.mubr.msk.f32.vlgmr.msra.gmra.mrb[2].mxu1 %vm2276_vm14, %v2237_v3 }
 0x2ef   : > { %12843 = vmatpush3.bf16.msra.mxu1 %v14616_v36  ;;  %2511 = vmatprep.mubr.f32.mxu1 %v14123_v0  ;;  %v2986_v55 = vsel %vm1236_vm5, %v13486_v50, %v13476_v39  ;;  %v2988_v56 = vsel %vm1236_vm5, %v13487_v49, %v13481_v42  ;;  %v12039_v50 = vld [vmem:[%s15994_s3 + $0x68] sm:$0xff] }
 0x2f0   : > { %12845 = vmatprep.subr.bf16.mxu1 %v12844_v8  ;;  %v13495_v53 = vpop.permute.xlu0 %13494  ;;  %v12862_v63 = vpack.c.bf16 %v2988_v56, %v2986_v55  ;;  %v13502_v8 = vunpack.i.h.bf16 %v13500_v4  ;;  %v13510_v13 = vpop.permute.xlu1 %13509 }
 0x2f1   : > { %v13497_v57 = vunpack.i.h.bf16 %v13495_v53  ;;  %v13496_v59 = vunpack.i.l.bf16 %v13495_v53  ;;  %v13511_v17 = vunpack.i.l.bf16 %v13510_v13 }
 0x2f2   : > { %12011 = vmatmul.mubr.msk.f32.gmra.mrb[4].mxu1 %vm2276_vm14, %v2238_v10 }
 0x2f3   : > { %12479 = vmatprep.mubr.msk.f32.mxu1 %vm2276_vm14, %v2237_v3  ;;  %v3178_v3 = vsel %vm16011_vm6, %v13496_v59, %v13497_v57  ;;  %v3177_v12 = vsel %vm16011_vm6, %v13502_v8, %v13496_v59 }
 0x2f4   : > { %v12868_v6 = vpack.c.bf16 %v3178_v3, %v3176_v5  ;;  %v13505_v11 = vpop.permute.xlu0 %13504  ;;  %v13520_v34 = vpop.permute.xlu1 %13519  ;;  %v12044_v3 = vld [vmem:[%s15994_s3 + $0x70] sm:$0xff] }
 0x2f5   : > { %v13507_v14 = vunpack.i.h.bf16 %v13505_v11  ;;  %v13506_v15 = vunpack.i.l.bf16 %v13505_v11  ;;  %v13522_v41 = vunpack.i.h.bf16 %v13520_v34  ;;  %v13521_v42 = vunpack.i.l.bf16 %v13520_v34 }
 0x2f6   : > { %12480 = vmatmul.mubr.msk.f32.vlgmr.msra.gmra.mrb[6].mxu1 %vm2276_vm14, %v2238_v10  ;;  %v13501_v10 = vunpack.i.l.bf16 %v13500_v4 }
 0x2f7   : > { %12847 = vmatpush1.bf16.msra.mxu1 %v12846_v19  ;;  %2688 = vmatprep.mubr.f32.mxu1 %v14123_v0  ;;  %v3365_v23 = vsel %vm16010_vm7, %v13506_v15, %v13507_v14  ;;  %v3554_v48 = vsel %vm16009_vm8, %v13521_v42, %v13522_v41 }
 0x2f8   : > { %12849 = vmatprep.subr.bf16.mxu1 %v12848_v20  ;;  %v3175_v16 = vsel %vm16011_vm6, %v13501_v10, %v13491_v62  ;;  %v13515_v19 = vpop.permute.xlu0 %13514  ;;  %v13530_v47 = vpop.permute.xlu1 %13529  ;;  %v12045_v10 = vld [vmem:[%s15994_s3 + $0x78] sm:$0xff] }
 0x2f9   : > { %v12870_v18 = vpack.c.bf16 %v3177_v12, %v3175_v16  ;;  %v12051_v16 = vld [vmem:[%s15994_s3 + $0x88] sm:$0xff] }
 0x2fa   : > { %12016 = vmatmul.mubr.msk.f32.vlgmr.msra.gmra.mrb[2].mxu1 %vm2276_vm14, %v12014_v21 }
 0x2fb   : > { %12851 = vmatpush3.bf16.msra.mxu1 %v12848_v20  ;;  %2694 = vmatprep.mubr.f32.mxu1 %v14123_v0  ;;  %v12872_v20 = vpack.c.bf16 %v13497_v57, %v13492_v60 }
 0x2fc   : > { %12853 = vmatprep.subr.bf16.mxu1 %v12852_v25  ;;  %v13517_v25 = vunpack.i.h.bf16 %v13515_v19  ;;  %v13525_v31 = vpop.permute.xlu0 %13524  ;;  %v13540_v55 = vpop.permute.xlu1 %13539 }
 0x2fd   : > { %v13527_v39 = vunpack.i.h.bf16 %v13525_v31  ;;  %v13526_v40 = vunpack.i.l.bf16 %v13525_v31  ;;  %v13542_v60 = vunpack.i.h.bf16 %v13540_v55  ;;  %v13541_v62 = vunpack.i.l.bf16 %v13540_v55 }
 0x2fe   : > { %12017 = vmatmul.mubr.msk.f32.gmra.mrb[4].mxu1 %vm2276_vm14, %v12015_v26  ;;  %v3366_v38 = vsel %vm16010_vm7, %v13517_v25, %v13511_v17 }
 0x2ff   : > { %12486 = vmatprep.mubr.msk.f32.mxu1 %vm2276_vm14, %v12014_v21  ;;  %v14751_v21 = vld [vmem:[#allocation3] sm:$0xff]  ;;  %v3745_v5 = vsel %vm16032_vm10, %v13541_v62, %v13542_v60 }
 0x300   : > { %v13535_v53 = vpop.permute.xlu0 %13534 }
 0x301   : > { %v13537_v56 = vunpack.i.h.bf16 %v13535_v53  ;;  %v13536_v57 = vunpack.i.l.bf16 %v13535_v53 }
 0x302   : > { %12487 = vmatmul.mubr.msk.f32.vlgmr.msra.gmra.mrb[6].mxu1 %vm2276_vm14, %v12015_v26  ;;  %v13516_v26 = vunpack.i.l.bf16 %v13515_v19 }
 0x303   : > { %12855 = vmatpush1.bf16.msra.mxu1 %v12854_v43  ;;  %2877 = vmatprep.mubr.f32.mxu1 %v14123_v0  ;;  %v3743_v4 = vsel %vm16031_vm15, %v13536_v57, %v13537_v56 }
 0x304   : > { %12857 = vmatprep.subr.bf16.mxu1 %v12856_v45  ;;  %v3364_v37 = vsel %vm16010_vm7, %v13516_v26, %v13506_v15  ;;  %v12892_v8 = vpack.c.bf16 %v3745_v5, %v3743_v4  ;;  %v12050_v15 = vld [vmem:[%s15994_s3 + $0x80] sm:$0xff] }
 0x305   : > { %v12878_v43 = vpack.c.bf16 %v3366_v38, %v3364_v37 }
 0x306   : > { %12022 = vmatmul.mubr.msk.f32.vlgmr.msra.gmra.mrb[2].mxu1 %vm2276_vm14, %v12020_v46 }
 0x307   : > { %12859 = vmatpush3.bf16.msra.mxu1 %v12856_v45  ;;  %2883 = vmatprep.mubr.f32.mxu1 %v14123_v0  ;;  %v12038_v45 = vld [vmem:[%s15994_s3 + $0x60] sm:$0xff] }
 0x308   : > { %12861 = vmatprep.subr.bf16.mxu1 %v12860_v51  ;;  %v13532_v51 = vunpack.i.h.bf16 %v13530_v47 }
 0x30a   : > { %12023 = vmatmul.mubr.msk.f32.gmra.mrb[4].mxu1 %vm2276_vm14, %v12021_v52  ;;  %v3555_v54 = vsel %vm16009_vm8, %v13532_v51, %v13526_v40 }
 0x30b   : > { %12493 = vmatprep.mubr.msk.f32.mxu1 %vm2276_vm14, %v12020_v46  ;;  %v3556_v46 = vsel %vm16009_vm8, %v13526_v40, %v13527_v39 }
 0x30c   : > { %v12884_v49 = vpack.c.bf16 %v3556_v46, %v3554_v48 }
 0x30e   : > { %12494 = vmatmul.mubr.msk.f32.vlgmr.msra.gmra.mrb[6].mxu1 %vm2276_vm14, %v12021_v52  ;;  %v13531_v52 = vunpack.i.l.bf16 %v13530_v47 }
 0x30f   : > { %12863 = vmatpush1.bf16.msra.mxu1 %v12862_v63  ;;  %3066 = vmatprep.mubr.f32.mxu1 %v14123_v0 }
 0x310   : > { %12865 = vmatprep.subr.bf16.mxu1 %v12864_v1  ;;  %v3553_v59 = vsel %vm16009_vm8, %v13531_v52, %v13521_v42  ;;  %vm16033_vm8 = vmmov %vm16032_vm10 }
 0x311   : > { %v12886_v63 = vpack.c.bf16 %v3555_v54, %v3553_v59 }
 0x312   : > { %12028 = vmatmul.mubr.msk.f32.vlgmr.msra.gmra.mrb[2].mxu1 %vm2276_vm14, %v12026_v2 }
 0x313   : > { %12867 = vmatpush3.bf16.msra.mxu1 %v12864_v1  ;;  %3072 = vmatprep.mubr.f32.mxu1 %v14123_v0  ;;  %v13512_v0 = vunpack.i.h.bf16 %v13510_v13  ;;  %v12888_v1 = vpack.c.bf16 %v13527_v39, %v13522_v41 }
 0x314   : > { %12869 = vmatprep.subr.bf16.mxu1 %v12868_v6 }
 0x315   : > { %v3367_v24 = vsel %vm16010_vm7, %v13511_v17, %v13512_v0  ;;  %v12880_v44 = vpack.c.bf16 %v13512_v0, %v13507_v14  ;;  %vm16034_vm7 = vmmov %vm16033_vm8  ;;  %v12896_v14 = vpack.c.bf16 %v13542_v60, %v13537_v56  ;;  %v3921_v0 = vpop.permute.xlu1 %3920 }
 0x316   : > { %12029 = vmatmul.mubr.msk.f32.gmra.mrb[4].mxu1 %vm2276_vm14, %v12027_v7  ;;  %v12876_v27 = vpack.c.bf16 %v3367_v24, %v3365_v23 }
 0x317   : > { %12500 = vmatprep.mubr.msk.f32.mxu1 %vm2276_vm14, %v12026_v2  ;;  %v13545_v2 = vpop.permute.xlu0 %13544 }
 0x318   : > { %v13547_v6 = vunpack.i.h.bf16 %v13545_v2 }
 0x31a   : > { %12501 = vmatmul.mubr.msk.f32.vlgmr.msra.gmra.mrb[6].mxu1 %vm2276_vm14, %v12027_v7  ;;  %v13546_v7 = vunpack.i.l.bf16 %v13545_v2  ;;  %v3744_v12 = vsel %vm16034_vm7, %v13547_v6, %v13541_v62  ;;  %vm14135_vm7 = vmmov 0  }
 0x31b   : > { %12871 = vmatpush1.bf16.msra.mxu1 %v12870_v18  ;;  %3255 = vmatprep.mubr.f32.mxu1 %v14751_v21  ;;  %v3926_v23 = vpop.permute.xlu0 %3925 }
 0x31c   : > { %12873 = vmatprep.subr.bf16.mxu1 %v12872_v20  ;;  %v3742_v11 = vsel %vm16033_vm8, %v13546_v7, %v13536_v57  ;;  %vm16035_vm8 = vcmask 752640  }
 0x31d   : > { %v12894_v13 = vpack.c.bf16 %v3744_v12, %v3742_v11  ;;  %vm16036_vm15 = vmmov %vm16035_vm8 }
 0x31e   : > { %12034 = vmatmul.mubr.msk.f32.vlgmr.msra.gmra.mrb[2].mxu1 %vm2276_vm14, %v12032_v22  ;;  %vm16037_vm10 = vmmov %vm16035_vm8 }
 0x31f   : > { %12875 = vmatpush3.bf16.msra.mxu1 %v12872_v20  ;;  %3261 = vmatprep.mubr.f32.mxu1 %v14751_v21 }
 0x320   : > { %12877 = vmatprep.subr.bf16.mxu1 %v12876_v27 }
 0x322   : > { %12035 = vmatmul.mubr.msk.f32.gmra.mrb[4].mxu1 %vm2276_vm14, %v12033_v30 }
 0x323   : > { %12507 = vmatprep.mubr.msk.f32.mxu1 %vm2276_vm14, %v12032_v22 }
 0x326   : > { %12508 = vmatmul.mubr.msk.f32.vlgmr.msra.gmra.mrb[6].mxu1 %vm2276_vm14, %v12033_v30 }
 0x327   : > { %12879 = vmatpush1.bf16.msra.mxu1 %v12878_v43  ;;  %3444 = vmatprep.mubr.f32.mxu1 %v14751_v21 }
 0x328   : > { %12881 = vmatprep.subr.bf16.mxu1 %v12880_v44 }
 0x32a   : > { %12040 = vmatmul.mubr.msk.f32.vlgmr.msra.gmra.mrb[2].mxu1 %vm2276_vm14, %v12038_v45 }
 0x32b   : > { %12883 = vmatpush3.bf16.msra.mxu1 %v12880_v44  ;;  %3450 = vmatprep.mubr.f32.mxu1 %v14751_v21 }
 0x32c   : > { %12885 = vmatprep.subr.bf16.mxu1 %v12884_v49 }
 0x32e   : > { %12041 = vmatmul.mubr.msk.f32.gmra.mrb[4].mxu1 %vm2276_vm14, %v12039_v50 }
 0x32f   : > { %12514 = vmatprep.mubr.msk.f32.mxu1 %vm2276_vm14, %v12038_v45 }
 0x332   : > { %12515 = vmatmul.mubr.msk.f32.vlgmr.msra.gmra.mrb[6].mxu1 %vm2276_vm14, %v12039_v50 }
 0x333   : > { %12887 = vmatpush1.bf16.msra.mxu1 %v12886_v63  ;;  %3633 = vmatprep.mubr.f32.mxu1 %v14751_v21 }
 0x334   : > { %12889 = vmatprep.subr.bf16.mxu1 %v12888_v1 }
 0x336   : > { %12046 = vmatmul.mubr.msk.f32.vlgmr.msra.gmra.mrb[2].mxu1 %vm2276_vm14, %v12044_v3 }
 0x337   : > { %12891 = vmatpush3.bf16.msra.mxu1 %v12888_v1  ;;  %3639 = vmatprep.mubr.f32.mxu1 %v14751_v21 }
 0x338   : > { %12893 = vmatprep.subr.bf16.mxu1 %v12892_v8  ;;  %v5665_v8 = vld [vmem:[%s15997_s6 + $0x8] sm:$0xff] }
 0x33a   : > { %12047 = vmatmul.mubr.msk.f32.gmra.mrb[4].mxu1 %vm2276_vm14, %v12045_v10 }
 0x33b   : > { %12521 = vmatprep.mubr.msk.f32.mxu1 %vm2276_vm14, %v12044_v3 }
 0x33e   : > { %12522 = vmatmul.mubr.msk.f32.vlgmr.msra.gmra.mrb[6].mxu1 %vm2276_vm14, %v12045_v10  ;;  %v5664_v10 = vld [vmem:[%s15997_s6] sm:$0xff] }
 0x33f   : > { %12895 = vmatpush1.bf16.msra.mxu1 %v12894_v13  ;;  %3822 = vmatprep.mubr.f32.mxu1 %v14751_v21 }
 0x340   : > { %12897 = vmatprep.subr.bf16.mxu1 %v12896_v14 }
 0x342   : > { %12052 = vmatmul.mubr.msk.f32.vlgmr.msra.gmra.mrb[2].mxu1 %vm2276_vm14, %v12050_v15 }
 0x343   : > { %12899 = vmatpush3.bf16.msra.mxu1 %v12896_v14  ;;  %3828 = vmatprep.mubr.f32.mxu1 %v14751_v21 }
 0x346   : > { %12053 = vmatmul.mubr.msk.f32.gmra.mrb[4].mxu1 %vm2276_vm14, %v12051_v16 }
 0x347   : > { %12528 = vmatprep.mubr.msk.f32.mxu1 %vm2276_vm14, %v12050_v15 }
 0x34a   : > { %12529 = vmatmul.mubr.msk.f32.vlgmr.msra.gmra.mrb[6].mxu1 %vm2276_vm14, %v12051_v16 }
 0x34b   : > { %5838 = vmatprep.mubr.f32.mxu1 %v14751_v21 }
 0x415   : > { %v3824_v17 = vpop.f32.mrb[2].mxu1 }
 0x416   : > { %v3928_v18 = vadd.f32 %v3921_v0, %v3824_v17  ;;  %v3826_v19 = vpop.f32.mrb[3].mxu1 }
 0x417   : > { %v3929_v20 = vadd.f32 %v3921_v0, %v3826_v19 }
 0x418   : > { %v3934_v22 = vmax.f32 %v3928_v18, 0.0 }
 0x419   : > { %v3935_v24 = vmax.f32 %v3929_v20, 0.0  ;;  %v3830_v25 = vpop.f32.mrb[4].mxu1 }
 0x41a   : > { %v3931_v26 = vadd.f32 %v3926_v23, %v3830_v25  ;;  %v3832_v27 = vpop.f32.mrb[5].mxu1  ;;  %v3940_v30 = vsel %vm14577_vm0, %v3934_v22, 0.0 }
 0x41b   : > { %3958 = vrot.lane.b32.xlu1 %v3940_v30, %s14133_s27  ;;  %v3941_v31 = vsel %vm14566_vm12, %v3935_v24, 0.0  ;;  %v3932_v41 = vadd.f32 %v3926_v23, %v3832_v27 }
 0x41c   : > { %v3937_v34 = vmax.f32 %v3931_v26, 0.0  ;;  %3960 = vrot.lane.b32.xlu0 %v3941_v31, %s14133_s27  ;;  %v12056_v26 = vld [vmem:[%s15996_s5 + $0x10] sm:$0xff]  ;;  %v12057_v31 = vld [vmem:[%s15996_s5 + $0x18] sm:$0xff] }
 0x41d   : > { %v12530_v37 = vpop.f32.mrb[6].mxu1  ;;  %v3938_v46 = vmax.f32 %v3932_v41, 0.0 }
 0x41e   : > { %v3933_v38 = vadd.f32 %v12530_v37, %v3926_v23  ;;  %v3901_v39 = vpop.f32.mrb[7].mxu1  ;;  %v3943_v40 = vsel %vm14577_vm0, %v3937_v34, 0.0 }
 0x41f   : > { %v3930_v42 = vadd.f32 %v3921_v0, %v3901_v39  ;;  %v3944_v48 = vsel %vm14566_vm12, %v3938_v46, 0.0 }
 0x420   : > { %v3939_v43 = vmax.f32 %v3933_v38, 0.0  ;;  %3964 = vrot.lane.b32.xlu0 %v3943_v40, %s14133_s27 }
 0x421   : > { %v3936_v44 = vmax.f32 %v3930_v42, 0.0 }
 0x422   : > { %v3945_v45 = vsel %vm14562_vm11, %v3939_v43, 0.0 }
 0x423   : > { %v3942_v47 = vsel %vm14562_vm11, %v3936_v44, 0.0  ;;  %v3986_v44 = vld [vmem:[%s15996_s5] sm:$0xff] }
 0x424   : > { %3968 = vrot.lane.b32.xlu0 %v3945_v45, %s14133_s27  ;;  %3962 = vrot.lane.b32.xlu1 %v3942_v47, %s14133_s27 }
 0x428   : > { %3966 = vrot.lane.b32.xlu1 %v3944_v48, %s14133_s27 }
 0x48d   : > { %v3959_v49 = vpop.permute.xlu1 %3958 }
 0x48e   : > { %3980 = vst.msk [vmem:[#allocation3] sm:$0xff] %vm2229_vm13, %v3959_v49  ;;  %v3961_v50 = vpop.permute.xlu0 %3960 }
 0x48f   : > { %v3970_v51 = vsel %vm2218_vm1, %v3959_v49, %v3961_v50 }
 0x492   : > { %v3965_v52 = vpop.permute.xlu0 %3964 }
 0x493   : > { %3983 = vst.msk [vmem:[#allocation3 + $0x18] sm:$0xff] %vm2229_vm13, %v3965_v52 }
 0x495   : > { %v3988_v57 = vld [vmem:[#allocation3] sm:$0xff] }
 0x496   : > { %v3963_v53 = vpop.permute.xlu1 %3962  ;;  %v3969_v55 = vpop.permute.xlu0 %3968 }
 0x497   : > { %v3971_v54 = vsel %vm2218_vm1, %v3961_v50, %v3963_v53 }
 0x498   : > { %3982 = vst.msk [vmem:[#allocation3 + $0x10] sm:$0xff] %vm2232_vm9, %v3971_v54 }
 0x49a   : > { %v3967_v56 = vpop.permute.xlu1 %3966  ;;  %v3991_v59 = vld [vmem:[#allocation3 + $0x18] sm:$0xff] }
 0x49b   : > { %v3972_v60 = vsel %vm2218_vm1, %v3965_v52, %v3967_v56  ;;  %v3973_v62 = vsel %vm2218_vm1, %v3967_v56, %v3969_v55  ;;  %v14839_v63 = vpack.c.bf16 %v3991_v59, %v3988_v57  ;;  %v14844_v2 = vpack.i.bf16 %v3991_v59, %v3988_v57  ;;  %v3987_v52 = vld [vmem:[%s15996_s5 + $0x8] sm:$0xff] }
 0x49c   : > { %3985 = vst.msk [vmem:[#allocation3 + $0x28] sm:$0xff] %vm2232_vm9, %v3973_v62  ;;  %v14842_v1 = vpack.c.bf16 %v3972_v60, %v3970_v51 }
 0x49f   : > { %v3990_v3 = vld [vmem:[#allocation3 + $0x10] sm:$0xff] }
 0x4a0   : > { %v14846_v4 = vpack.i.bf16 %v3990_v3, %v3970_v51 }
 0x4a2   : > { %13554 = vrot.lane.b32.xlu1 %v14846_v4, %s14124_s20 }
 0x4a3   : > { %v3993_v5 = vld [vmem:[#allocation3 + $0x28] sm:$0xff] }
 0x4a4   : > { %v14850_v6 = vpack.i.bf16 %v3993_v5, %v3972_v60  ;;  %v14852_v7 = vpack.c.bf16 %v3993_v5, %v3990_v3 }
 0x4a6   : > { %13559 = vrot.lane.b32.xlu1 %v14844_v2, %s14124_s20  ;;  %13549 = vrot.lane.b32.xlu0 %v14850_v6, %s14124_s20 }
 0x4aa   : > { %13564 = vrot.lane.b32.xlu1 %v14850_v6, %s14125_s26  ;;  %13569 = vrot.lane.b32.xlu0 %v14846_v4, %s14125_s26 }
 0x4ae   : > { %13584 = vrot.lane.b32.xlu1 %v14846_v4, %s14126_s13  ;;  %13574 = vrot.lane.b32.xlu0 %v14844_v2, %s14125_s26 }
 0x4b2   : > { %13589 = vrot.lane.b32.xlu1 %v14844_v2, %s14126_s13  ;;  %13579 = vrot.lane.b32.xlu0 %v14850_v6, %s14126_s13 }
 0x4b6   : > { %13594 = vrot.lane.b32.xlu1 %v14850_v6, %s14127_s14  ;;  %13599 = vrot.lane.b32.xlu0 %v14846_v4, %s14127_s14 }
 0x4ba   : > { %13614 = vrot.lane.b32.xlu1 %v14846_v4, %s14128_s15  ;;  %13604 = vrot.lane.b32.xlu0 %v14844_v2, %s14127_s14 }
 0x4be   : > { %13619 = vrot.lane.b32.xlu1 %v14844_v2, %s14128_s15  ;;  %13609 = vrot.lane.b32.xlu0 %v14850_v6, %s14128_s15 }
 0x4c2   : > { %13624 = vrot.lane.b32.xlu1 %v14850_v6, %s14129_s16  ;;  %13629 = vrot.lane.b32.xlu0 %v14846_v4, %s14129_s16 }
 0x4c6   : > { %13644 = vrot.lane.b32.xlu1 %v14846_v4, %s14130_s17  ;;  %13634 = vrot.lane.b32.xlu0 %v14844_v2, %s14129_s16 }
 0x4ca   : > { %13649 = vrot.lane.b32.xlu1 %v14844_v2, %s14130_s17  ;;  %13639 = vrot.lane.b32.xlu0 %v14850_v6, %s14130_s17 }
 0x4ce   : > { %13654 = vrot.lane.b32.xlu1 %v14850_v6, %s14131_s24  ;;  %13659 = vrot.lane.b32.xlu0 %v14846_v4, %s14131_s24 }
 0x4d2   : > { %13669 = vrot.lane.b32.xlu1 %v14604_v29, %s14124_s20  ;;  %13664 = vrot.lane.b32.xlu0 %v14844_v2, %s14131_s24 }
 0x4d6   : > { %13679 = vrot.lane.b32.xlu1 %v14608_v32, %s14124_s20  ;;  %13674 = vrot.lane.b32.xlu0 %v14614_v35, %s14124_s20 }
 0x4da   : > { %5673 = vperm.xlu1 %13427, %v5665_v8   ;;  %5668 = vperm.xlu0 %13426, %v5664_v10  }
 0x4de   : > { %13689 = vrot.lane.b32.xlu1 %v14614_v35, %s14125_s26  ;;  %13684 = vrot.lane.b32.xlu0 %v14604_v29, %s14125_s26 }
 0x4e2   : > { %13699 = vrot.lane.b32.xlu1 %v14604_v29, %s14126_s13  ;;  %13694 = vrot.lane.b32.xlu0 %v14608_v32, %s14125_s26 }
 0x4e6   : > { %13709 = vrot.lane.b32.xlu1 %v14608_v32, %s14126_s13  ;;  %13704 = vrot.lane.b32.xlu0 %v14614_v35, %s14126_s13 }
 0x4ea   : > { %13719 = vrot.lane.b32.xlu1 %v14614_v35, %s14127_s14  ;;  %13714 = vrot.lane.b32.xlu0 %v14604_v29, %s14127_s14 }
 0x4ee   : > { %13729 = vrot.lane.b32.xlu1 %v14604_v29, %s14128_s15  ;;  %13724 = vrot.lane.b32.xlu0 %v14608_v32, %s14127_s14 }
 0x4f2   : > { %13739 = vrot.lane.b32.xlu1 %v14608_v32, %s14128_s15  ;;  %13734 = vrot.lane.b32.xlu0 %v14614_v35, %s14128_s15 }
 0x4f6   : > { %13749 = vrot.lane.b32.xlu1 %v14614_v35, %s14129_s16  ;;  %13744 = vrot.lane.b32.xlu0 %v14604_v29, %s14129_s16 }
 0x4fa   : > { %13759 = vrot.lane.b32.xlu1 %v14604_v29, %s14130_s17  ;;  %13754 = vrot.lane.b32.xlu0 %v14608_v32, %s14129_s16 }
 0x4fe   : > { %13769 = vrot.lane.b32.xlu1 %v14608_v32, %s14130_s17  ;;  %13764 = vrot.lane.b32.xlu0 %v14614_v35, %s14130_s17 }
 0x502   : > { %13779 = vrot.lane.b32.xlu1 %v14614_v35, %s14131_s24  ;;  %13774 = vrot.lane.b32.xlu0 %v14604_v29, %s14131_s24 }
 0x506   : > { %13794 = vrot.lane.b32.xlu1 %v14844_v2, %s14124_s20  ;;  %13784 = vrot.lane.b32.xlu0 %v14608_v32, %s14131_s24 }
 0x50a   : > { %13799 = vrot.lane.b32.xlu1 %v14846_v4, %s14124_s20  ;;  %13789 = vrot.lane.b32.xlu0 %v14850_v6, %s14124_s20 }
 0x50e   : > { %13804 = vrot.lane.b32.xlu0 %v14846_v4, %s14125_s26 }
 0x514   : > { %v13555_v11 = vpop.permute.xlu1 %13554 }
 0x515   : > { %v13557_v35 = vunpack.i.h.bf16 %v13555_v11  ;;  %v13556_v12 = vunpack.i.l.bf16 %v13555_v11  ;;  %v12066_v11 = vld [vmem:[%s15996_s5 + $0x20] sm:$0xff] }
 0x517   : > { %v4016_v18 = vsel %vm515_vm2, %v13556_v12, %v13557_v35 }
 0x518   : > { %v13550_v13 = vpop.permute.xlu0 %13549  ;;  %v13560_v29 = vpop.permute.xlu1 %13559 }
 0x519   : > { %v13552_v14 = vunpack.i.h.bf16 %v13550_v13  ;;  %v13551_v15 = vunpack.i.l.bf16 %v13550_v13  ;;  %v13562_v16 = vunpack.i.h.bf16 %v13560_v29  ;;  %v13561_v0 = vunpack.i.l.bf16 %v13560_v29 }
 0x51b   : > { %v4017_v32 = vsel %vm515_vm2, %v13562_v16, %v13551_v15  ;;  %v4015_v17 = vsel %vm515_vm2, %v13561_v0, %v13556_v12  ;;  %v4018_v19 = vsel %vm515_vm2, %v13551_v15, %v13552_v14  ;;  %v12904_v25 = vpack.c.bf16 %v13552_v14, %v13557_v35  ;;  %v12067_v0 = vld [vmem:[%s15996_s5 + $0x28] sm:$0xff] }
 0x51c   : > { %v13570_v20 = vpop.permute.xlu0 %13569  ;;  %v13565_v22 = vpop.permute.xlu1 %13564  ;;  %v12900_v23 = vpack.c.bf16 %v4018_v19, %v4016_v18  ;;  %v12902_v24 = vpack.c.bf16 %v4017_v32, %v4015_v17 }
 0x51d   : > { %v13572_v38 = vunpack.i.h.bf16 %v13570_v20  ;;  %v13571_v39 = vunpack.i.l.bf16 %v13570_v20  ;;  %v13567_v40 = vunpack.i.h.bf16 %v13565_v22  ;;  %v13566_v41 = vunpack.i.l.bf16 %v13565_v22 }
 0x51e   : > { %12901 = vmatprep.subr.bf16.mxu0 %v12900_v23 }
 0x51f   : > { %12903 = vmatpush1.bf16.msra.mxu0 %v12902_v24  ;;  %v4357_v45 = vsel %vm862_vm3, %v13571_v39, %v13572_v38  ;;  %v4359_v46 = vsel %vm862_vm3, %v13566_v41, %v13567_v40  ;;  %v12920_v10 = vpack.c.bf16 %v13567_v40, %v13572_v38 }
 0x520   : > { %v13575_v27 = vpop.permute.xlu0 %13574  ;;  %v14969_v30 = vpop.permute.xlu1 %13584  ;;  %12905 = vmatprep.subr.bf16.mxu0 %v12904_v25  ;;  %v12916_v51 = vpack.c.bf16 %v4359_v46, %v4357_v45  ;;  %v12073_v45 = vld [vmem:[%s15996_s5 + $0x38] sm:$0xff] }
 0x521   : > { %v13577_v49 = vunpack.i.h.bf16 %v13575_v27  ;;  %v13576_v50 = vunpack.i.l.bf16 %v13575_v27  ;;  %v13587_v3 = vunpack.i.h.bf16 %v14969_v30  ;;  %v13586_v5 = vunpack.i.l.bf16 %v14969_v30 }
 0x522   : > { %12058 = vmatmul.mubr.msk.f32.vlgmr.msra.gmra.mrb[4].mxu0 %vm2276_vm14, %v12056_v26 }
 0x523   : > { %12907 = vmatpush3.bf16.msra.mxu0 %v12904_v25  ;;  %4101 = vmatprep.mubr.f32.mxu0 %v14751_v21  ;;  %v4356_v55 = vsel %vm862_vm3, %v13576_v50, %v13571_v39  ;;  %v4358_v56 = vsel %vm862_vm3, %v13577_v49, %v13566_v41  ;;  %v4546_v29 = vsel %vm1049_vm4, %v13586_v5, %v13587_v3 }
 0x524   : > { %v14976_v34 = vpop.permute.xlu0 %13579  ;;  %v14978_v37 = vpop.permute.xlu1 %13589  ;;  %12909 = vmatprep.subr.bf16.mxu0 %v14842_v1  ;;  %v12918_v8 = vpack.c.bf16 %v4358_v56, %v4356_v55 }
 0x525   : > { %v13582_v57 = vunpack.i.h.bf16 %v14976_v34  ;;  %v13581_v59 = vunpack.i.l.bf16 %v14976_v34  ;;  %v13592_v14 = vunpack.i.h.bf16 %v14978_v37  ;;  %v13591_v15 = vunpack.i.l.bf16 %v14978_v37 }
 0x526   : > { %12059 = vmatmul.mubr.msk.f32.gmra.mrb[6].mxu0 %vm2276_vm14, %v12057_v31 }
 0x527   : > { %12535 = vmatprep.mubr.msk.f32.mxu0 %vm2276_vm14, %v12056_v26  ;;  %v4548_v35 = vsel %vm1049_vm4, %v13581_v59, %v13582_v57  ;;  %v4547_v18 = vsel %vm1049_vm4, %v13592_v14, %v13581_v59  ;;  %v4545_v19 = vsel %vm1049_vm4, %v13591_v15, %v13586_v5  ;;  %v12928_v30 = vpack.c.bf16 %v13582_v57, %v13587_v3 }
 0x528   : > { %v14983_v42 = vpop.permute.xlu0 %13599  ;;  %v14985_v43 = vpop.permute.xlu1 %13594  ;;  %v12924_v16 = vpack.c.bf16 %v4548_v35, %v4546_v29  ;;  %v12926_v27 = vpack.c.bf16 %v4547_v18, %v4545_v19  ;;  %v5742_v18 = vld [vmem:[#allocation5 + $0x4] sm:$0x7] }
 0x529   : > { %v13602_v20 = vunpack.i.h.bf16 %v14983_v42  ;;  %v13601_v22 = vunpack.i.l.bf16 %v14983_v42  ;;  %v13597_v23 = vunpack.i.h.bf16 %v14985_v43  ;;  %v13596_v24 = vunpack.i.l.bf16 %v14985_v43 }
 0x52a   : > { %12536 = vmatmul.mubr.msk.f32.vlgmr.msra.gmra.mrb[8].mxu0 %vm2276_vm14, %v12057_v31  ;;  %v12072_v31 = vld [vmem:[%s15996_s5 + $0x30] sm:$0xff] }
 0x52b   : > { %12911 = vmatpush1.bf16.msra.mxu0 %v14839_v63  ;;  %4253 = vmatprep.mubr.f32.mxu0 %v14751_v21  ;;  %v4735_v34 = vsel %vm1236_vm5, %v13601_v22, %v13602_v20  ;;  %v4737_v37 = vsel %vm1236_vm5, %v13596_v24, %v13597_v23 }
 0x52c   : > { %12913 = vmatprep.subr.bf16.mxu0 %v14852_v7  ;;  %v14996_v47 = vpop.permute.xlu0 %13604  ;;  %v14998_v48 = vpop.permute.xlu1 %13614  ;;  %v12932_v42 = vpack.c.bf16 %v4737_v37, %v4735_v34 }
 0x52d   : > { %v13607_v40 = vunpack.i.h.bf16 %v14996_v47  ;;  %v13606_v41 = vunpack.i.l.bf16 %v14996_v47  ;;  %v13617_v29 = vunpack.i.h.bf16 %v14998_v48  ;;  %v13616_v14 = vunpack.i.l.bf16 %v14998_v48 }
 0x52e   : > { %12062 = vmatmul.mubr.msk.f32.vlgmr.msra.gmra.mrb[4].mxu0 %vm2276_vm14, %v3986_v44 }
 0x52f   : > { %12915 = vmatpush3.bf16.msra.mxu0 %v14852_v7  ;;  %4259 = vmatprep.mubr.f32.mxu0 %v14751_v21  ;;  %v4734_v47 = vsel %vm1236_vm5, %v13606_v41, %v13601_v22  ;;  %v4736_v56 = vsel %vm1236_vm5, %v13607_v40, %v13596_v24  ;;  %v14134_v24 = vmov 0.0|0.0  }
 0x530   : > { %12917 = vmatprep.subr.bf16.mxu0 %v12916_v51  ;;  %v15006_v53 = vpop.permute.xlu0 %13609  ;;  %v15008_v54 = vpop.permute.xlu1 %13619  ;;  %v12934_v15 = vpack.c.bf16 %v4736_v56, %v4734_v47 }
 0x531   : > { %v13612_v57 = vunpack.i.h.bf16 %v15006_v53  ;;  %v13611_v59 = vunpack.i.l.bf16 %v15006_v53  ;;  %v12936_v53 = vpack.c.bf16 %v13597_v23, %v13602_v20  ;;  %v13622_v19 = vunpack.i.h.bf16 %v15008_v54 }
 0x532   : > { %12063 = vmatmul.mubr.msk.f32.gmra.mrb[6].mxu0 %vm2276_vm14, %v3987_v52  ;;  %v13621_v48 = vunpack.i.l.bf16 %v15008_v54  ;;  %v4924_v20 = vsel %vm16011_vm6, %v13616_v14, %v13617_v29 }
 0x533   : > { %12542 = vmatprep.mubr.msk.f32.mxu0 %vm2276_vm14, %v3986_v44  ;;  %v4925_v54 = vsel %vm16011_vm6, %v13622_v19, %v13611_v59 }
 0x534   : > { %v15016_v60 = vpop.permute.xlu0 %13629  ;;  %v15018_v62 = vpop.permute.xlu1 %13624 }
 0x535   : > { %v13631_v34 = vunpack.i.l.bf16 %v15016_v60  ;;  %v13627_v37 = vunpack.i.h.bf16 %v15018_v62 }
 0x536   : > { %12543 = vmatmul.mubr.msk.f32.vlgmr.msra.gmra.mrb[8].mxu0 %vm2276_vm14, %v3987_v52 }
 0x537   : > { %12919 = vmatpush1.bf16.msra.mxu0 %v12918_v8  ;;  %4436 = vmatprep.mubr.f32.mxu0 %v14751_v21 }
 0x538   : > { %12921 = vmatprep.subr.bf16.mxu0 %v12920_v10  ;;  %v15028_v12 = vpop.permute.xlu0 %13634  ;;  %v15030_v13 = vpop.permute.xlu1 %13644 }
 0x53a   : > { %12068 = vmatmul.mubr.msk.f32.vlgmr.msra.gmra.mrb[4].mxu0 %vm2276_vm14, %v12066_v11 }
 0x53b   : > { %12923 = vmatpush3.bf16.msra.mxu0 %v12920_v10  ;;  %4442 = vmatprep.mubr.f32.mxu0 %v14751_v21 }
 0x53c   : > { %12925 = vmatprep.subr.bf16.mxu0 %v12924_v16  ;;  %v15040_v32 = vpop.permute.xlu0 %13639  ;;  %v15042_v17 = vpop.permute.xlu1 %13649  ;;  %v12078_v16 = vld [vmem:[%s15996_s5 + $0x40] sm:$0xff] }
 0x53e   : > { %12069 = vmatmul.mubr.msk.f32.gmra.mrb[6].mxu0 %vm2276_vm14, %v12067_v0 }
 0x53f   : > { %12549 = vmatprep.mubr.msk.f32.mxu0 %vm2276_vm14, %v12066_v11 }
 0x540   : > { %v15052_v25 = vpop.permute.xlu0 %13659  ;;  %v15054_v26 = vpop.permute.xlu1 %13654 }
 0x542   : > { %12550 = vmatmul.mubr.msk.f32.vlgmr.msra.gmra.mrb[8].mxu0 %vm2276_vm14, %v12067_v0  ;;  %v4926_v0 = vsel %vm16011_vm6, %v13611_v59, %v13612_v57 }
 0x543   : > { %12927 = vmatpush1.bf16.msra.mxu0 %v12926_v27  ;;  %4625 = vmatprep.mubr.f32.mxu0 %v14751_v21  ;;  %v12940_v23 = vpack.c.bf16 %v4926_v0, %v4924_v20  ;;  %v12079_v27 = vld [vmem:[%s15996_s5 + $0x48] sm:$0xff] }
 0x544   : > { %12929 = vmatprep.subr.bf16.mxu0 %v12928_v30  ;;  %v15063_v38 = vpop.permute.xlu0 %13664  ;;  %v13670_v39 = vpop.permute.xlu1 %13669 }
 0x545   : > { %v13672_v43 = vunpack.i.h.bf16 %v13670_v39  ;;  %v13671_v44 = vunpack.i.l.bf16 %v13670_v39  ;;  %v13626_v39 = vunpack.i.l.bf16 %v15018_v62  ;;  %v12944_v62 = vpack.c.bf16 %v13612_v57, %v13617_v29 }
 0x546   : > { %12074 = vmatmul.mubr.msk.f32.vlgmr.msra.gmra.mrb[4].mxu0 %vm2276_vm14, %v12072_v31 }
 0x547   : > { %12931 = vmatpush3.bf16.msra.mxu0 %v12928_v30  ;;  %4631 = vmatprep.mubr.f32.mxu0 %v14751_v21  ;;  %v5762_v8 = vsel %vm515_vm2, %v13671_v44, %v13672_v43  ;;  %v4923_v30 = vsel %vm16011_vm6, %v13621_v48, %v13616_v14  ;;  %v13647_v14 = vunpack.i.h.bf16 %v15030_v13 }
 0x548   : > { %12933 = vmatprep.subr.bf16.mxu0 %v12932_v42  ;;  %v13675_v46 = vpop.permute.xlu0 %13674  ;;  %v13680_v49 = vpop.permute.xlu1 %13679  ;;  %v12942_v41 = vpack.c.bf16 %v4925_v54, %v4923_v30 }
 0x549   : > { %v13677_v50 = vunpack.i.h.bf16 %v13675_v46  ;;  %v13676_v51 = vunpack.i.l.bf16 %v13675_v46  ;;  %v13682_v52 = vunpack.i.h.bf16 %v13680_v49  ;;  %v13681_v55 = vunpack.i.l.bf16 %v13680_v49 }
 0x54a   : > { %12075 = vmatmul.mubr.msk.f32.gmra.mrb[6].mxu0 %vm2276_vm14, %v12073_v45 }
 0x54b   : > { %v5763_v3 = vsel %vm515_vm2, %v13682_v52, %v13676_v51  ;;  %v5761_v5 = vsel %vm515_vm2, %v13681_v55, %v13671_v44  ;;  %12556 = vmatprep.mubr.msk.f32.mxu0 %vm2276_vm14, %v12072_v31  ;;  %v5764_v10 = vsel %vm515_vm2, %v13676_v51, %v13677_v50  ;;  %v12977_v22 = vpack.c.bf16 %v13677_v50, %v13672_v43  ;;  %v12084_v43 = vld [vmem:[%s15996_s5 + $0x50] sm:$0xff] }
 0x54c   : > { %v12972_v11 = vpack.c.bf16 %v5764_v10, %v5762_v8  ;;  %v12974_v35 = vpack.c.bf16 %v5763_v3, %v5761_v5  ;;  %v13632_v31 = vunpack.i.h.bf16 %v15016_v60  ;;  %v13636_v44 = vunpack.i.l.bf16 %v15028_v12 }
 0x54d   : > { %v13642_v3 = vunpack.i.h.bf16 %v15040_v32  ;;  %v13641_v5 = vunpack.i.l.bf16 %v15040_v32 }
 0x54e   : > { %12557 = vmatmul.mubr.msk.f32.vlgmr.msra.gmra.mrb[8].mxu0 %vm2276_vm14, %v12073_v45  ;;  %12973 = vmatprep.subr.bf16.mxu1 %v12972_v11  ;;  %v5113_v42 = vsel %vm16035_vm8, %v13631_v34, %v13632_v31  ;;  %v13637_v45 = vunpack.i.h.bf16 %v15028_v12  ;;  %v12085_v12 = vld [vmem:[%s15996_s5 + $0x58] sm:$0xff]  ;;  %v5112_v47 = vsel %vm16037_vm10, %v13636_v44, %v13631_v34 }
 0x54f   : > { %12935 = vmatpush1.bf16.msra.mxu0 %v12934_v15  ;;  %12975 = vmatpush1.bf16.msra.mxu1 %v12974_v35  ;;  %v13646_v15 = vunpack.i.l.bf16 %v15030_v13 }
 0x550   : > { %12937 = vmatprep.subr.bf16.mxu0 %v12936_v53  ;;  %4814 = vmatprep.mubr.f32.mxu0 %v14751_v21  ;;  %v5114_v59 = vsel %vm16035_vm8, %v13637_v45, %v13626_v39 }
 0x551   : > { %12976 = vmatprep.subr.bf16.mxu1 %v14134_v24  ;;  %v12950_v0 = vpack.c.bf16 %v5114_v59, %v5112_v47  ;;  %v13661_v59 = vunpack.i.l.bf16 %v15052_v25 }
 0x552   : > { %12080 = vmatmul.mubr.msk.f32.vlgmr.msra.gmra.mrb[4].mxu0 %vm2276_vm14, %v12078_v16  ;;  %12108 = vmatmul.mubr.msk.f32.vlgmr.msra.gmra.mrb[8].mxu1 %vm2276_vm14, %v5742_v18 }
 0x553   : > { %12939 = vmatpush3.bf16.msra.mxu0 %v12936_v53  ;;  %12978 = vmatpush3.bf16.msra.mxu1 %v12977_v22 }
 0x554   : > { %12941 = vmatprep.subr.bf16.mxu0 %v12940_v23  ;;  %12980 = vmatprep.subr.bf16.mxu1 %v14601_v28  ;;  %v5734_v28 = vld [vmem:[#allocation5] sm:$0x7] }
 0x555   : > { %4820 = vmatprep.mubr.f32.mxu0 %v14751_v21  ;;  %12598 = vmatprep.mubr.msk.f32.mxu1 %vm14135_vm7, %v14751_v21 }
 0x556   : > { %12081 = vmatmul.mubr.msk.f32.gmra.mrb[6].mxu0 %vm2276_vm14, %v12079_v27  ;;  %12599 = vmatmul.mubr.msk.f32.vlgmr.msra.gmra.mrb[10].mxu1 %vm2276_vm14, %v5742_v18  ;;  %v12952_v18 = vpack.c.bf16 %v13627_v37, %v13632_v31  ;;  %v13652_v31 = vunpack.i.h.bf16 %v15042_v17 }
 0x557   : > { %12982 = vmatpush1.bf16.msra.mxu1 %v14610_v33  ;;  %12563 = vmatprep.mubr.msk.f32.mxu0 %vm2276_vm14, %v12078_v16  ;;  %v5115_v33 = vsel %vm16036_vm15, %v13626_v39, %v13627_v37  ;;  %vm16038_vm15 = vcmask 744448   ;;  %v13651_v37 = vunpack.i.l.bf16 %v15042_v17 }
 0x558   : > { %5982 = vmatprep.mubr.f32.mxu1 %v14751_v21  ;;  %12983 = vmatprep.subr.bf16.mxu1 %v14134_v24  ;;  %v12948_v50 = vpack.c.bf16 %v5115_v33, %v5113_v42  ;;  %vm16039_vm10 = vmmov %vm16038_vm15 }
 0x559   : > { %v15115_v40 = vpop.permute.xlu0 %5668  ;;  %v15117_v60 = vpop.permute.xlu1 %5673  ;;  %vm16040_vm8 = vmmov %vm16039_vm10 }
 0x55a   : > { %12564 = vmatmul.mubr.msk.f32.vlgmr.msra.gmra.mrb[8].mxu0 %vm2276_vm14, %v12079_v27  ;;  %12110 = vmatmul.mubr.msk.f32.vlgmr.msra.gmra.mrb[8].mxu1 %vm2276_vm14, %v5734_v28  ;;  %v5304_v27 = vsel %vm16038_vm15, %v13641_v5, %v13642_v3  ;;  %vm16041_vm15 = vmmov %vm16040_vm8 }
 0x55b   : > { %12943 = vmatpush1.bf16.msra.mxu0 %v12942_v41  ;;  %12985 = vmatpush3.bf16.msra.mxu1 %v14616_v36  ;;  %v6060_v41 = vld [vmem:[#allocation5 + $0x8] sm:$0x7] }
 0x55c   : > { %12945 = vmatprep.subr.bf16.mxu0 %v12944_v62  ;;  %5003 = vmatprep.mubr.f32.mxu0 %v14751_v21 }
 0x55d   : > { %v13685_v46 = vpop.permute.xlu0 %13684  ;;  %v13690_v49 = vpop.permute.xlu1 %13689  ;;  %12605 = vmatprep.mubr.msk.f32.mxu1 %vm14135_vm7, %v14751_v21 }
 0x55e   : > { %v13687_v51 = vunpack.i.h.bf16 %v13685_v46  ;;  %v13686_v52 = vunpack.i.l.bf16 %v13685_v46  ;;  %v13692_v36 = vunpack.i.h.bf16 %v13690_v49  ;;  %v13691_v55 = vunpack.i.l.bf16 %v13690_v49  ;;  %12086 = vmatmul.mubr.msk.f32.vlgmr.msra.gmra.mrb[4].mxu0 %vm2276_vm14, %v12084_v43  ;;  %12606 = vmatmul.mubr.msk.f32.vlgmr.msra.gmra.mrb[12].mxu1 %vm2276_vm14, %v5734_v28  ;;  %v12090_v28 = vld [vmem:[%s15996_s5 + $0x60] sm:$0xff] }
 0x55f   : > { %12947 = vmatpush3.bf16.msra.mxu0 %v12944_v62  ;;  %5009 = vmatprep.mubr.f32.mxu0 %v14751_v21  ;;  %v5302_v62 = vsel %vm16039_vm10, %v13646_v15, %v13647_v14  ;;  %vm16042_vm10 = vcmask 736256  }
 0x560   : > { %12949 = vmatprep.subr.bf16.mxu0 %v12948_v50  ;;  %v6074_v56 = vsel %vm862_vm3, %v13686_v52, %v13687_v51  ;;  %v6076_v57 = vsel %vm862_vm3, %v13691_v55, %v13692_v36  ;;  %6150 = vmatprep.mubr.f32.mxu1 %v14751_v21  ;;  %v12991_v42 = vpack.c.bf16 %v13692_v36, %v13687_v51 }
 0x561   : > { %v13695_v8 = vpop.permute.xlu0 %13694  ;;  %v15145_v10 = vpop.permute.xlu1 %13699  ;;  %v12986_v11 = vpack.c.bf16 %v6076_v57, %v6074_v56  ;;  %v12956_v33 = vpack.c.bf16 %v5304_v27, %v5302_v62  ;;  %v12091_v56 = vld [vmem:[%s15996_s5 + $0x68] sm:$0xff]  ;;  %v13662_v57 = vunpack.i.h.bf16 %v15052_v25  ;;  %v12102_v25 = vld [vmem:[%s15996_s5 + $0x80] sm:$0xff] }
 0x562   : > { %v13697_v35 = vunpack.i.h.bf16 %v13695_v8  ;;  %v13696_v29 = vunpack.i.l.bf16 %v13695_v8  ;;  %12087 = vmatmul.mubr.msk.f32.gmra.mrb[6].mxu0 %vm2276_vm14, %v12085_v12  ;;  %v13702_v48 = vunpack.i.h.bf16 %v15145_v10  ;;  %v13701_v22 = vunpack.i.l.bf16 %v15145_v10  ;;  %v12096_v10 = vld [vmem:[%s15996_s5 + $0x70] sm:$0xff] }
 0x563   : > { %12987 = vmatprep.subr.bf16.mxu1 %v12986_v11  ;;  %12570 = vmatprep.mubr.msk.f32.mxu0 %vm2276_vm14, %v12084_v43  ;;  %v13657_v8 = vunpack.i.h.bf16 %v15054_v26  ;;  %v13656_v11 = vunpack.i.l.bf16 %v15054_v26 }
 0x564   : > { %v6073_v53 = vsel %vm862_vm3, %v13696_v29, %v13686_v52  ;;  %v6075_v16 = vsel %vm862_vm3, %v13697_v35, %v13691_v55  ;;  %v6245_v46 = vsel %vm1049_vm4, %v13701_v22, %v13702_v48  ;;  %v5303_v55 = vsel %vm16040_vm8, %v13652_v31, %v13641_v5  ;;  %vm16043_vm8 = vmmov %vm16042_vm10 }
 0x565   : > { %v12988_v19 = vpack.c.bf16 %v6075_v16, %v6073_v53  ;;  %v15155_v20 = vpop.permute.xlu0 %13704  ;;  %v13710_v23 = vpop.permute.xlu1 %13709  ;;  %v5493_v13 = vsel %vm16043_vm8, %v13656_v11, %v13657_v8 }
 0x566   : > { %v13707_v54 = vunpack.i.h.bf16 %v15155_v20  ;;  %v13706_v30 = vunpack.i.l.bf16 %v15155_v20  ;;  %v13712_v34 = vunpack.i.h.bf16 %v13710_v23  ;;  %v13711_v39 = vunpack.i.l.bf16 %v13710_v23  ;;  %12571 = vmatmul.mubr.msk.f32.vlgmr.msra.gmra.mrb[8].mxu0 %vm2276_vm14, %v12085_v12 }
 0x567   : > { %12951 = vmatpush1.bf16.msra.mxu0 %v12950_v0  ;;  %12989 = vmatpush1.bf16.msra.mxu1 %v12988_v19  ;;  %v5301_v12 = vsel %vm16041_vm15, %v13651_v37, %v13646_v15  ;;  %v6231_v19 = vld [vmem:[#allocation5 + $0xc] sm:$0x7]  ;;  %vm16044_vm15 = vcmask 752640  }
 0x568   : > { %12953 = vmatprep.subr.bf16.mxu0 %v12952_v18  ;;  %5192 = vmatprep.mubr.f32.mxu0 %v14751_v21  ;;  %v6246_v43 = vsel %vm1049_vm4, %v13712_v34, %v13706_v30  ;;  %v6244_v17 = vsel %vm1049_vm4, %v13711_v39, %v13701_v22  ;;  %v6247_v49 = vsel %vm1049_vm4, %v13706_v30, %v13707_v54 }
 0x569   : > { %v15174_v44 = vpop.permute.xlu0 %13714  ;;  %v15176_v45 = vpop.permute.xlu1 %13719  ;;  %12990 = vmatprep.subr.bf16.mxu1 %v14134_v24  ;;  %v12993_v47 = vpack.c.bf16 %v6247_v49, %v6245_v46  ;;  %v12995_v5 = vpack.c.bf16 %v6246_v43, %v6244_v17  ;;  %v12960_v22 = vpack.c.bf16 %v13642_v3, %v13647_v14  ;;  %v5491_v30 = vsel %vm16042_vm10, %v13661_v59, %v13662_v57  ;;  %v15258_v49 = vld [vmem:[#allocation4] sm:$0xff]  ;;  %vm16045_vm10 = vmmov %vm16044_vm15 }
 0x56a   : > { %v13717_v50 = vunpack.i.h.bf16 %v15174_v44  ;;  %v13716_v51 = vunpack.i.l.bf16 %v15174_v44  ;;  %v13722_v52 = vunpack.i.h.bf16 %v15176_v45  ;;  %v13721_v36 = vunpack.i.l.bf16 %v15176_v45  ;;  %12092 = vmatmul.mubr.msk.f32.vlgmr.msra.gmra.mrb[4].mxu0 %vm2276_vm14, %v12090_v28  ;;  %12112 = vmatmul.mubr.msk.f32.vlgmr.msra.gmra.mrb[8].mxu1 %vm2276_vm14, %v6060_v41 }
 0x56b   : > { %12955 = vmatpush3.bf16.msra.mxu0 %v12952_v18  ;;  %12992 = vmatpush3.bf16.msra.mxu1 %v12991_v42  ;;  %v12958_v18 = vpack.c.bf16 %v5303_v55, %v5301_v12  ;;  %v12998_v32 = vpack.c.bf16 %v13707_v54, %v13702_v48  ;;  %v13667_v48 = vunpack.i.h.bf16 %v15063_v38  ;;  %v12964_v54 = vpack.c.bf16 %v5493_v13, %v5491_v30 }
 0x56c   : > { %12957 = vmatprep.subr.bf16.mxu0 %v12956_v33  ;;  %5198 = vmatprep.mubr.f32.mxu0 %v14751_v21  ;;  %v6416_v16 = vsel %vm1236_vm5, %v13716_v51, %v13717_v50  ;;  %v6418_v0 = vsel %vm1236_vm5, %v13721_v36, %v13722_v52  ;;  %v13666_v42 = vunpack.i.l.bf16 %v15063_v38 }
 0x56d   : > { %12994 = vmatprep.subr.bf16.mxu1 %v12993_v47  ;;  %v13725_v35 = vpop.permute.xlu0 %13724  ;;  %v15201_v29 = vpop.permute.xlu1 %13729  ;;  %12612 = vmatprep.mubr.msk.f32.mxu1 %vm14135_vm7, %v14751_v21  ;;  %v13000_v39 = vpack.c.bf16 %v6418_v0, %v6416_v16 }
 0x56e   : > { %v13727_v15 = vunpack.i.h.bf16 %v13725_v35  ;;  %v13726_v53 = vunpack.i.l.bf16 %v13725_v35  ;;  %12093 = vmatmul.mubr.msk.f32.gmra.mrb[6].mxu0 %vm2276_vm14, %v12091_v56  ;;  %12613 = vmatmul.mubr.msk.f32.vlgmr.msra.gmra.mrb[14].mxu1 %vm2276_vm14, %v6060_v41  ;;  %v13732_v23 = vunpack.i.h.bf16 %v15201_v29  ;;  %v13731_v27 = vunpack.i.l.bf16 %v15201_v29 }
 0x56f   : > { %12996 = vmatpush1.bf16.msra.mxu1 %v12995_v5  ;;  %12577 = vmatprep.mubr.msk.f32.mxu0 %vm2276_vm14, %v12090_v28  ;;  %v15275_v5 = vld [vmem:[#allocation5 + $0x10] sm:$0x7] }
 0x570   : > { %6321 = vmatprep.mubr.f32.mxu1 %v14751_v21  ;;  %12997 = vmatprep.subr.bf16.mxu1 %v14134_v24  ;;  %v6415_v21 = vsel %vm1236_vm5, %v13726_v53, %v13716_v51  ;;  %v6417_v3 = vsel %vm1236_vm5, %v13727_v15, %v13721_v36  ;;  %v6587_v62 = vsel %vm16011_vm6, %v13731_v27, %v13732_v23 }
 0x571   : > { %v15238_v14 = vpop.permute.xlu0 %13734  ;;  %v13740_v34 = vpop.permute.xlu1 %13739  ;;  %v13002_v20 = vpack.c.bf16 %v6417_v3, %v6415_v21  ;;  %v12968_v3 = vpack.c.bf16 %v13657_v8, %v13662_v57 }
 0x572   : > { %v13737_v31 = vunpack.i.h.bf16 %v15238_v14  ;;  %v13736_v37 = vunpack.i.l.bf16 %v15238_v14  ;;  %v13742_v28 = vunpack.i.h.bf16 %v13740_v34  ;;  %v13741_v41 = vunpack.i.l.bf16 %v13740_v34  ;;  %12578 = vmatmul.mubr.msk.f32.vlgmr.msra.gmra.mrb[8].mxu0 %vm2276_vm14, %v12091_v56  ;;  %12114 = vmatmul.mubr.msk.f32.vlgmr.msra.gmra.mrb[8].mxu1 %vm2276_vm14, %v6231_v19  ;;  %v12097_v56 = vld [vmem:[%s15996_s5 + $0x78] sm:$0xff] }
 0x573   : > { %12959 = vmatpush1.bf16.msra.mxu0 %v12958_v18  ;;  %12999 = vmatpush3.bf16.msra.mxu1 %v12998_v32 }
 0x574   : > { %12961 = vmatprep.subr.bf16.mxu0 %v12960_v22  ;;  %13001 = vmatprep.subr.bf16.mxu1 %v13000_v39  ;;  %v6588_v33 = vsel %vm16011_vm6, %v13742_v28, %v13736_v37  ;;  %v6586_v43 = vsel %vm16011_vm6, %v13741_v41, %v13731_v27  ;;  %v6589_v51 = vsel %vm16011_vm6, %v13736_v37, %v13737_v31  ;;  %vm16046_vm6 = vmmov %vm16043_vm8  ;;  %v6573_v41 = vld [vmem:[#allocation5 + $0x14] sm:$0x7] }
 0x575   : > { %v15254_v17 = vpop.permute.xlu0 %13744  ;;  %v15256_v46 = vpop.permute.xlu1 %13749  ;;  %5381 = vmatprep.mubr.f32.mxu0 %v15258_v49  ;;  %12619 = vmatprep.mubr.msk.f32.mxu1 %vm14135_vm7, %v15258_v49  ;;  %v13007_v47 = vpack.c.bf16 %v6589_v51, %v6587_v62  ;;  %v13009_v53 = vpack.c.bf16 %v6588_v33, %v6586_v43  ;;  %v13012_v44 = vpack.c.bf16 %v13737_v31, %v13732_v23 }
 0x576   : > { %v13747_v38 = vunpack.i.h.bf16 %v15254_v17  ;;  %v13746_v36 = vunpack.i.l.bf16 %v15254_v17  ;;  %v13752_v55 = vunpack.i.h.bf16 %v15256_v46  ;;  %v13751_v12 = vunpack.i.l.bf16 %v15256_v46  ;;  %12098 = vmatmul.mubr.msk.f32.vlgmr.msra.gmra.mrb[4].mxu0 %vm2276_vm14, %v12096_v10  ;;  %12620 = vmatmul.mubr.msk.f32.vlgmr.msra.gmra.mrb[16].mxu1 %vm2276_vm14, %v6231_v19  ;;  %v7086_v46 = vld [vmem:[#allocation5 + $0x20] sm:$0x7] }
 0x577   : > { %12963 = vmatpush3.bf16.msra.mxu0 %v12960_v22  ;;  %13003 = vmatpush1.bf16.msra.mxu1 %v13002_v20  ;;  %v5490_v19 = vsel %vm16043_vm8, %v13666_v42, %v13661_v59  ;;  %v5492_v22 = vsel %vm16046_vm6, %v13667_v48, %v13656_v11  ;;  %vm16047_vm6 = vmmov %vm16045_vm10 }
 0x578   : > { %12965 = vmatprep.subr.bf16.mxu0 %v12964_v54  ;;  %5387 = vmatprep.mubr.f32.mxu0 %v15258_v49  ;;  %v6758_v35 = vsel %vm16044_vm15, %v13746_v36, %v13747_v38  ;;  %v6760_v15 = vsel %vm16045_vm10, %v13751_v12, %v13752_v55  ;;  %v12966_v21 = vpack.c.bf16 %v5492_v22, %v5490_v19  ;;  %vm16048_vm15 = vmmov %vm16047_vm6  ;;  %vm16049_vm10 = vcmask 744448  }
 0x579   : > { %13008 = vmatprep.subr.bf16.mxu1 %v13007_v47  ;;  %v13755_v16 = vpop.permute.xlu0 %13754  ;;  %v15284_v0 = vpop.permute.xlu1 %13759  ;;  %6492 = vmatprep.mubr.f32.mxu1 %v15258_v49  ;;  %v13014_v18 = vpack.c.bf16 %v6760_v15, %v6758_v35  ;;  %vm16050_vm8 = vmmov %vm16049_vm10  ;;  %v6744_v35 = vld [vmem:[#allocation5 + $0x18] sm:$0x7]  ;;  %v13019_v23 = vpack.c.bf16 %v13752_v55, %v13747_v38 }
 0x57a   : > { %v13757_v27 = vunpack.i.h.bf16 %v13755_v16  ;;  %v13756_v30 = vunpack.i.l.bf16 %v13755_v16  ;;  %12099 = vmatmul.mubr.msk.f32.gmra.mrb[6].mxu0 %vm2276_vm14, %v12097_v56  ;;  %12116 = vmatmul.mubr.msk.f32.vlgmr.msra.gmra.mrb[8].mxu1 %vm2276_vm14, %v15275_v5  ;;  %v13762_v13 = vunpack.i.h.bf16 %v15284_v0  ;;  %v13761_v32 = vunpack.i.l.bf16 %v15284_v0 }
 0x57b   : > { %13010 = vmatpush1.bf16.msra.mxu1 %v13009_v53  ;;  %12584 = vmatprep.mubr.msk.f32.mxu0 %vm2276_vm14, %v12096_v10  ;;  %v13005_v16 = vpack.c.bf16 %v13722_v52, %v13717_v50  ;;  %v6915_v52 = vld [vmem:[#allocation5 + $0x1c] sm:$0x7] }
 0x57c   : > { %13015 = vmatprep.subr.bf16.mxu1 %v13014_v18  ;;  %6663 = vmatprep.mubr.f32.mxu1 %v15258_v49  ;;  %v6757_v34 = vsel %vm16047_vm6, %v13756_v30, %v13746_v36  ;;  %v6759_v39 = vsel %vm16048_vm15, %v13757_v27, %v13751_v12  ;;  %v6929_v26 = vsel %vm16049_vm10, %v13761_v32, %v13762_v13  ;;  %v12103_v36 = vld [vmem:[%s15996_s5 + $0x88] sm:$0xff]  ;;  %vm16051_vm6 = vmmov %vm16050_vm8  ;;  %vm16053_vm10 = vcmask 736256  }
 0x57d   : > { %v15300_v59 = vpop.permute.xlu0 %13764  ;;  %v13770_v11 = vpop.permute.xlu1 %13769  ;;  %v13016_v8 = vpack.c.bf16 %v6759_v39, %v6757_v34  ;;  %vm16052_vm15 = vmmov %vm16051_vm6 }
 0x57e   : > { %v13767_v37 = vunpack.i.h.bf16 %v15300_v59  ;;  %v13766_v28 = vunpack.i.l.bf16 %v15300_v59  ;;  %12585 = vmatmul.mubr.msk.f32.vlgmr.msra.gmra.mrb[8].mxu0 %vm2276_vm14, %v12097_v56  ;;  %v13772_v54 = vunpack.i.h.bf16 %v13770_v11  ;;  %v13771_v62 = vunpack.i.l.bf16 %v13770_v11 }
 0x57f   : > { %12967 = vmatpush1.bf16.msra.mxu0 %v12966_v21  ;;  %5570 = vmatprep.mubr.f32.mxu0 %v15258_v49 }
 0x580   : > { %12969 = vmatprep.subr.bf16.mxu0 %v12968_v3  ;;  %v6931_v57 = vsel %vm16050_vm8, %v13766_v28, %v13767_v37  ;;  %v6930_v12 = vsel %vm16051_vm6, %v13772_v54, %v13766_v28  ;;  %v6928_v47 = vsel %vm16052_vm15, %v13771_v62, %v13761_v32  ;;  %vm16054_vm8 = vmmov %vm16053_vm10  ;;  %v13026_v17 = vpack.c.bf16 %v13767_v37, %v13762_v13 }
 0x581   : > { %v15321_v10 = vpop.permute.xlu0 %13774  ;;  %v15323_v48 = vpop.permute.xlu1 %13779  ;;  %v13021_v20 = vpack.c.bf16 %v6931_v57, %v6929_v26  ;;  %v13023_v18 = vpack.c.bf16 %v6930_v12, %v6928_v47  ;;  %vm16055_vm6 = vmmov %vm16054_vm8 }
 0x582   : > { %12104 = vmatmul.mubr.msk.f32.vlgmr.msra.gmra.mrb[4].mxu0 %vm2276_vm14, %v12102_v25  ;;  %12118 = vmatmul.mubr.msk.f32.vlgmr.msra.gmra.mrb[8].mxu1 %vm2276_vm14, %v6573_v41  ;;  %v13777_v42 = vunpack.i.h.bf16 %v15321_v10  ;;  %v13776_v33 = vunpack.i.l.bf16 %v15321_v10  ;;  %v13782_v43 = vunpack.i.h.bf16 %v15323_v48  ;;  %v13781_v51 = vunpack.i.l.bf16 %v15323_v48  ;;  %vm16056_vm15 = vmmov %vm16055_vm6 }
 0x583   : > { %12971 = vmatpush3.bf16.msra.mxu0 %v12968_v3  ;;  %13017 = vmatpush1.bf16.msra.mxu1 %v13016_v8 }
 0x584   : > { %13022 = vmatprep.subr.bf16.mxu1 %v13021_v20  ;;  %5576 = vmatprep.mubr.f32.mxu0 %v15258_v49  ;;  %v7100_v15 = vsel %vm16053_vm10, %v13776_v33, %v13777_v42  ;;  %v7102_v53 = vsel %vm16054_vm8, %v13781_v51, %v13782_v43  ;;  %v13033_v55 = vpack.c.bf16 %v13782_v43, %v13777_v42 }
 0x585   : > { %13004 = vmatprep.subr.bf16.mxu0 %v14134_v24  ;;  %6834 = vmatprep.mubr.f32.mxu1 %v15258_v49  ;;  %v13785_v56 = vpop.permute.xlu0 %13784  ;;  %v13795_v27 = vpop.permute.xlu1 %13794  ;;  %v13028_v30 = vpack.c.bf16 %v7102_v53, %v7100_v15 }
 0x586   : > { %12105 = vmatmul.mubr.msk.f32.gmra.mrb[6].mxu0 %vm2276_vm14, %v12103_v36  ;;  %v13787_v19 = vunpack.i.h.bf16 %v13785_v56  ;;  %v13786_v22 = vunpack.i.l.bf16 %v13785_v56  ;;  %v13797_v13 = vunpack.i.h.bf16 %v13795_v27  ;;  %v13796_v59 = vunpack.i.l.bf16 %v13795_v27 }
 0x587   : > { %12591 = vmatprep.mubr.msk.f32.mxu0 %vm2276_vm14, %v12102_v25 }
 0x588   : > { %v7099_v45 = vsel %vm16055_vm6, %v13786_v22, %v13776_v33  ;;  %v7101_v50 = vsel %vm16056_vm15, %v13787_v19, %v13781_v51  ;;  %v7411_v51 = vld [vmem:[#allocation7 + $0x4] sm:$0x7]  ;;  %vm16065_vm6 = vcmask 744448  }
 0x589   : > { %v13790_v29 = vpop.permute.xlu0 %13789  ;;  %v13800_v32 = vpop.permute.xlu1 %13799  ;;  %v13030_v14 = vpack.c.bf16 %v7101_v50, %v7099_v45  ;;  %vm16066_vm15 = vmmov %vm16065_vm6 }
 0x58a   : > { %12592 = vmatmul.mubr.msk.f32.vlgmr.msra.gmra.mrb[8].mxu0 %vm2276_vm14, %v12103_v36  ;;  %12120 = vmatmul.mubr.msk.f32.vlgmr.msra.gmra.mrb[8].mxu1 %vm2276_vm14, %v6744_v35  ;;  %v13792_v31 = vunpack.i.h.bf16 %v13790_v29  ;;  %v13802_v11 = vunpack.i.h.bf16 %v13800_v32  ;;  %v13801_v21 = vunpack.i.l.bf16 %v13800_v32 }
 0x58b   : > { %13006 = vmatpush3.bf16.msra.mxu0 %v13005_v16  ;;  %13024 = vmatpush1.bf16.msra.mxu1 %v13023_v18 }
 0x58c   : > { %13029 = vmatprep.subr.bf16.mxu1 %v13028_v30  ;;  %12626 = vmatprep.mubr.msk.f32.mxu0 %vm14135_vm7, %v15258_v49  ;;  %v7430_v34 = vsel %vm515_vm2, %v13796_v59, %v13801_v21  ;;  %v13047_v39 = vpack.c.bf16 %v13792_v31, %v13802_v11 }
 0x58d   : > { %13011 = vmatprep.subr.bf16.mxu0 %v14134_v24  ;;  %7005 = vmatprep.mubr.f32.mxu1 %v15258_v49  ;;  %v13805_v58 = vpop.permute.xlu0 %13804 }
 0x58e   : > { %12627 = vmatmul.mubr.msk.f32.vlgmr.msra.gmra.mrb[10].mxu0 %vm2276_vm14, %v15275_v5  ;;  %v13791_v5 = vunpack.i.l.bf16 %v13790_v29  ;;  %v13807_v30 = vunpack.i.h.bf16 %v13805_v58 }
 0x58f   : > { %13013 = vmatpush3.bf16.msra.mxu0 %v13012_v44  ;;  %12633 = vmatprep.mubr.msk.f32.mxu0 %vm14135_vm7, %v15258_v49  ;;  %v13806_v44 = vunpack.i.l.bf16 %v13805_v58 }
 0x590   : > { %13018 = vmatprep.subr.bf16.mxu0 %v14134_v24  ;;  %v7433_v38 = vsel %vm515_vm2, %v13791_v5, %v13792_v31  ;;  %v7432_v3 = vsel %vm515_vm2, %v13797_v13, %v13791_v5 }
 0x591   : > { %v13044_v37 = vpack.c.bf16 %v7432_v3, %v7430_v34 }
 0x592   : > { %12634 = vmatmul.mubr.msk.f32.vlgmr.msra.gmra.mrb[12].mxu0 %vm2276_vm14, %v6573_v41  ;;  %12122 = vmatmul.mubr.msk.f32.vlgmr.msra.gmra.mrb[8].mxu1 %vm2276_vm14, %v6915_v52 }
 0x593   : > { %13020 = vmatpush3.bf16.msra.mxu0 %v13019_v23  ;;  %13031 = vmatpush1.bf16.msra.mxu1 %v13030_v14  ;;  %v7602_v14 = vsel %vm862_vm3, %v13806_v44, %v13807_v30 }
 0x594   : > { %13036 = vmatprep.subr.bf16.mxu1 %v14842_v1  ;;  %12640 = vmatprep.mubr.msk.f32.mxu0 %vm14135_vm7, %v15258_v49  ;;  %v7431_v1 = vsel %vm515_vm2, %v13801_v21, %v13802_v11 }
 0x595   : > { %13025 = vmatprep.subr.bf16.mxu0 %v14134_v24  ;;  %7176 = vmatprep.mubr.f32.mxu1 %v15258_v49  ;;  %v13042_v0 = vpack.c.bf16 %v7433_v38, %v7431_v1 }
 0x596   : > { %12641 = vmatmul.mubr.msk.f32.vlgmr.msra.gmra.mrb[14].mxu0 %vm2276_vm14, %v6744_v35 }
 0x597   : > { %13027 = vmatpush3.bf16.msra.mxu0 %v13026_v17  ;;  %12647 = vmatprep.mubr.msk.f32.mxu0 %vm14135_vm7, %v15258_v49 }
 0x598   : > { %13032 = vmatprep.subr.bf16.mxu0 %v14134_v24 }
 0x59a   : > { %12648 = vmatmul.mubr.msk.f32.vlgmr.msra.gmra.mrb[16].mxu0 %vm2276_vm14, %v6915_v52  ;;  %12124 = vmatmul.mubr.msk.f32.vlgmr.msra.gmra.mrb[8].mxu1 %vm2276_vm14, %v7086_v46 }
 0x59b   : > { %13034 = vmatpush3.bf16.msra.mxu0 %v13033_v55  ;;  %13038 = vmatpush1.bf16.msra.mxu1 %v14839_v63  ;;  %v7256_v63 = vld [vmem:[#allocation7] sm:$0x7] }
 0x59c   : > { %13043 = vmatprep.subr.bf16.mxu1 %v13042_v0  ;;  %12654 = vmatprep.mubr.msk.f32.mxu0 %vm14135_vm7, %v15258_v49 }
 0x59d   : > { %13039 = vmatprep.subr.bf16.mxu0 %v14134_v24  ;;  %7330 = vmatprep.mubr.f32.mxu1 %v15258_v49 }
 0x59e   : > { %12655 = vmatmul.mubr.msk.f32.vlgmr.msra.gmra.mrb[18].mxu0 %vm2276_vm14, %v7086_v46 }
 0x59f   : > { %13041 = vmatpush3.bf16.msra.mxu0 %v14852_v7  ;;  %12661 = vmatprep.mubr.msk.f32.mxu0 %vm14135_vm7, %v15258_v49 }
 0x5a0   : > { %13046 = vmatprep.subr.bf16.mxu0 %v14134_v24 }
 0x5a2   : > { %12126 = vmatmul.mubr.msk.f32.vlgmr.msra.gmra.mrb[8].mxu1 %vm2276_vm14, %v7256_v63  ;;  %12662 = vmatmul.mubr.msk.f32.vlgmr.msra.gmra.mrb[20].mxu0 %vm2276_vm14, %v7256_v63 }
 0x5a3   : > { %13045 = vmatpush1.bf16.msra.mxu1 %v13044_v37  ;;  %13048 = vmatpush3.bf16.msra.mxu0 %v13047_v39  ;;  %v7588_v37 = vld [vmem:[#allocation7 + $0x8] sm:$0x7] }
 0x5a4   : > { %7507 = vmatprep.mubr.f32.mxu1 %v15258_v49  ;;  %12668 = vmatprep.mubr.msk.f32.mxu0 %vm14135_vm7, %v15258_v49 }
 0x5a5   : > { %13053 = vmatprep.subr.bf16.mxu0 %v14134_v24 }
 0x5a6   : > { %12669 = vmatmul.mubr.msk.f32.vlgmr.msra.gmra.mrb[22].mxu0 %vm2276_vm14, %v7411_v51 }
 0x5a7   : > { %12675 = vmatprep.mubr.msk.f32.mxu0 %vm14135_vm7, %v15258_v49 }
 0x5aa   : > { %12128 = vmatmul.mubr.msk.f32.vlgmr.msra.gmra.mrb[8].mxu1 %vm2276_vm14, %v7411_v51 }
 0x5ab   : > { %7678 = vmatprep.mubr.f32.mxu1 %v15258_v49 }
 0x655   : > { %v5572_v7 = vpop.f32.mrb[4].mxu0 }
 0x656   : > { %v5676_v28 = vadd.f32 %v15115_v40, %v5572_v7  ;;  %v5574_v25 = vpop.f32.mrb[5].mxu0 }
 0x657   : > { %v5677_v41 = vadd.f32 %v15115_v40, %v5574_v25 }
 0x658   : > { %v5682_v26 = vmax.f32 %v5676_v28, 0.0 }
 0x659   : > { %v5683_v57 = vmax.f32 %v5677_v41, 0.0  ;;  %v5578_v8 = vpop.f32.mrb[6].mxu0 }
 0x65a   : > { %v5688_v10 = vsel %vm14577_vm0, %v5682_v26, 0.0  ;;  %v5679_v48 = vadd.f32 %v15117_v60, %v5578_v8  ;;  %v5580_v20 = vpop.f32.mrb[7].mxu0 }
 0x65b   : > { %v5689_v54 = vsel %vm14566_vm12, %v5683_v57, 0.0  ;;  %v5680_v62 = vadd.f32 %v15117_v60, %v5580_v20  ;;  %5706 = vrot.lane.b32.xlu0 %v5688_v10, %s14133_s27 }
 0x65c   : > { %v5685_v42 = vmax.f32 %v5679_v48, 0.0  ;;  %5708 = vrot.lane.b32.xlu1 %v5689_v54, %s14133_s27 }
 0x65d   : > { %v5686_v33 = vmax.f32 %v5680_v62, 0.0  ;;  %v12593_v43 = vpop.f32.mrb[8].mxu0 }
 0x65e   : > { %v5691_v36 = vsel %vm14577_vm0, %v5685_v42, 0.0  ;;  %v5681_v12 = vadd.f32 %v12593_v43, %v15117_v60  ;;  %v5649_v47 = vpop.f32.mrb[9].mxu0 }
 0x65f   : > { %v5692_v56 = vsel %vm14566_vm12, %v5686_v33, 0.0  ;;  %v5678_v35 = vadd.f32 %v15115_v40, %v5649_v47  ;;  %v7759_v33 = vld [vmem:[#allocation7 + $0xc] sm:$0x7] }
 0x660   : > { %v5687_v15 = vmax.f32 %v5681_v12, 0.0  ;;  %5712 = vrot.lane.b32.xlu1 %v5691_v36, %s14133_s27  ;;  %5714 = vrot.lane.b32.xlu0 %v5692_v56, %s14133_s27 }
 0x661   : > { %v5684_v9 = vmax.f32 %v5678_v35, 0.0 }
 0x662   : > { %v5693_v60 = vsel %vm14562_vm11, %v5687_v15, 0.0 }
 0x663   : > { %v5690_v61 = vsel %vm14562_vm11, %v5684_v9, 0.0  ;;  %vm16057_vm11 = vcmask 883712  }
 0x664   : > { %5716 = vrot.lane.b32.xlu1 %v5693_v60, %s14133_s27  ;;  %5710 = vrot.lane.b32.xlu0 %v5690_v61, %s14133_s27  ;;  %vm16058_vm12 = vmmov %vm16057_vm11 }
 0x665   : > { %vm16059_vm0 = vmmov %vm16057_vm11 }
 0x668   : > { %13809 = vrot.lane.b32.xlu1 %v14850_v6, %s14125_s26  ;;  %13814 = vrot.lane.b32.xlu0 %v14844_v2, %s14125_s26 }
 0x66c   : > { %13819 = vrot.lane.b32.xlu1 %v14846_v4, %s14126_s13  ;;  %13824 = vrot.lane.b32.xlu0 %v14850_v6, %s14126_s13 }
 0x670   : > { %13829 = vrot.lane.b32.xlu1 %v14844_v2, %s14126_s13  ;;  %13834 = vrot.lane.b32.xlu0 %v14846_v4, %s14127_s14 }
 0x674   : > { %13839 = vrot.lane.b32.xlu1 %v14850_v6, %s14127_s14  ;;  %13844 = vrot.lane.b32.xlu0 %v14844_v2, %s14127_s14 }
 0x678   : > { %13849 = vrot.lane.b32.xlu1 %v14846_v4, %s14128_s15  ;;  %13854 = vrot.lane.b32.xlu0 %v14850_v6, %s14128_s15 }
 0x67c   : > { %13859 = vrot.lane.b32.xlu1 %v14844_v2, %s14128_s15  ;;  %13864 = vrot.lane.b32.xlu0 %v14846_v4, %s14129_s16 }
 0x680   : > { %13869 = vrot.lane.b32.xlu1 %v14850_v6, %s14129_s16  ;;  %13874 = vrot.lane.b32.xlu0 %v14844_v2, %s14129_s16 }
 0x684   : > { %13879 = vrot.lane.b32.xlu1 %v14846_v4, %s14130_s17  ;;  %13884 = vrot.lane.b32.xlu0 %v14850_v6, %s14130_s17 }
 0x688   : > { %13889 = vrot.lane.b32.xlu1 %v14844_v2, %s14130_s17  ;;  %13894 = vrot.lane.b32.xlu0 %v14846_v4, %s14131_s24 }
 0x68c   : > { %13899 = vrot.lane.b32.xlu1 %v14850_v6, %s14131_s24  ;;  %13904 = vrot.lane.b32.xlu0 %v14844_v2, %s14131_s24 }
 0x6cd   : > { %v5707_v40 = vpop.permute.xlu0 %5706 }
 0x6ce   : > { %5728 = vst.msk [vmem:[#allocation4] sm:$0xff] %vm2229_vm13, %v5707_v40  ;;  %v5709_v53 = vpop.permute.xlu1 %5708 }
 0x6cf   : > { %v15484_v16 = vsel %vm2218_vm1, %v5707_v40, %v5709_v53 }
 0x6d2   : > { %v5713_v18 = vpop.permute.xlu1 %5712  ;;  %v5715_v19 = vpop.permute.xlu0 %5714 }
 0x6d3   : > { %5731 = vst.msk [vmem:[#allocation4 + $0x18] sm:$0xff] %vm2229_vm13, %v5713_v18  ;;  %v15488_v4 = vsel %vm2218_vm1, %v5713_v18, %v5715_v19 }
 0x6d5   : > { %v15520_v20 = vld [vmem:[#allocation4] sm:$0xff] }
 0x6d6   : > { %v5717_v22 = vpop.permute.xlu1 %5716  ;;  %v5711_v6 = vpop.permute.xlu0 %5710 }
 0x6d7   : > { %v5721_v27 = vsel %vm2218_vm1, %v5715_v19, %v5717_v22  ;;  %v5719_v2 = vsel %vm2218_vm1, %v5709_v53, %v5711_v6  ;;  %vm16060_vm1 = vmmov %vm16059_vm0 }
 0x6d8   : > { %5733 = vst.msk [vmem:[#allocation4 + $0x28] sm:$0xff] %vm2232_vm9, %v5721_v27  ;;  %5730 = vst.msk [vmem:[#allocation4 + $0x10] sm:$0xff] %vm2232_vm9, %v5719_v2  ;;  %vm16061_vm9 = vcmask 752640  }
 0x6d9   : > { %vm16062_vm13 = vmmov %vm16061_vm9 }
 0x6da   : > { %v13810_v45 = vpop.permute.xlu1 %13809  ;;  %v13815_v50 = vpop.permute.xlu0 %13814  ;;  %v15513_v41 = vld [vmem:[#allocation4 + $0x18] sm:$0xff]  ;;  %vm16063_vm10 = vmmov %vm16061_vm9 }
 0x6db   : > { %v13812_v52 = vunpack.i.h.bf16 %v13810_v45  ;;  %v13811_v29 = vunpack.i.l.bf16 %v13810_v45  ;;  %v13817_v32 = vunpack.i.h.bf16 %v13815_v50  ;;  %v13816_v23 = vunpack.i.l.bf16 %v13815_v50  ;;  %v7930_v45 = vld [vmem:[#allocation7 + $0x10] sm:$0x7]  ;;  %vm16064_vm8 = vmmov %vm16061_vm9 }
 0x6dc   : > { %v15525_v42 = vpack.i.bf16 %v15513_v41, %v15520_v20 }
 0x6dd   : > { %v13054_v31 = vpack.c.bf16 %v13812_v52, %v13807_v30  ;;  %v7603_v5 = vsel %vm862_vm3, %v13817_v32, %v13811_v29  ;;  %v7601_v11 = vsel %vm862_vm3, %v13816_v23, %v13806_v44  ;;  %v7604_v21 = vsel %vm862_vm3, %v13811_v29, %v13812_v52 }
 0x6de   : > { %v13051_v17 = vpack.c.bf16 %v7603_v5, %v7601_v11  ;;  %v13820_v46 = vpop.permute.xlu1 %13819  ;;  %v13825_v1 = vpop.permute.xlu0 %13824  ;;  %v13049_v38 = vpack.c.bf16 %v7604_v21, %v7602_v14  ;;  %v8101_v11 = vld [vmem:[#allocation7 + $0x14] sm:$0x7] }
 0x6df   : > { %v13822_v55 = vunpack.i.h.bf16 %v13820_v46  ;;  %v13821_v0 = vunpack.i.l.bf16 %v13820_v46  ;;  %v13827_v13 = vunpack.i.h.bf16 %v13825_v1  ;;  %v13826_v59 = vunpack.i.l.bf16 %v13825_v1  ;;  %13055 = vmatpush3.bf16.msra.mxu0 %v13054_v31  ;;  %v15498_v3 = vld [vmem:[#allocation4 + $0x28] sm:$0xff]  ;;  %v15500_v34 = vld [vmem:[#allocation4 + $0x10] sm:$0xff] }
 0x6e0   : > { %13050 = vmatprep.subr.bf16.mxu1 %v13049_v38  ;;  %13060 = vmatprep.subr.bf16.mxu0 %v14134_v24  ;;  %v15505_v63 = vpack.i.bf16 %v15498_v3, %v15488_v4  ;;  %v15509_v39 = vpack.i.bf16 %v15500_v34, %v15484_v16 }
 0x6e1   : > { %v13061_v7 = vpack.c.bf16 %v13827_v13, %v13822_v55  ;;  %13052 = vmatpush1.bf16.msra.mxu1 %v13051_v17  ;;  %v7773_v28 = vsel %vm1049_vm4, %v13821_v0, %v13822_v55  ;;  %v7775_v25 = vsel %vm1049_vm4, %v13826_v59, %v13827_v13 }
 0x6e2   : > { %v13830_v26 = vpop.permute.xlu1 %13829  ;;  %13909 = vrot.lane.b32.xlu0 %v15505_v63, %s14124_s20  ;;  %13914 = vrot.lane.b32.xlu1 %v15509_v39, %s14124_s20  ;;  %v13835_v57 = vpop.permute.xlu0 %13834  ;;  %v13056_v8 = vpack.c.bf16 %v7775_v25, %v7773_v28 }
 0x6e3   : > { %v13832_v10 = vunpack.i.h.bf16 %v13830_v26  ;;  %v13831_v48 = vunpack.i.l.bf16 %v13830_v26  ;;  %12676 = vmatmul.mubr.msk.f32.vlgmr.msra.gmra.mrb[24].mxu0 %vm2276_vm14, %v7588_v37  ;;  %v13837_v54 = vunpack.i.h.bf16 %v13835_v57  ;;  %v13836_v62 = vunpack.i.l.bf16 %v13835_v57 }
 0x6e4   : > { %13062 = vmatpush3.bf16.msra.mxu0 %v13061_v7  ;;  %12130 = vmatmul.mubr.msk.f32.vlgmr.msra.gmra.mrb[8].mxu1 %vm2276_vm14, %v7588_v37 }
 0x6e5   : > { %v7772_v43 = vsel %vm1049_vm4, %v13831_v48, %v13821_v0  ;;  %v7774_v51 = vsel %vm1049_vm4, %v13832_v10, %v13826_v59  ;;  %13057 = vmatprep.subr.bf16.mxu1 %v13056_v8  ;;  %12682 = vmatprep.mubr.msk.f32.mxu0 %vm14135_vm7, %v15258_v49  ;;  %v7944_v60 = vsel %vm1236_vm5, %v13836_v62, %v13837_v54 }
 0x6e6   : > { %v13058_v36 = vpack.c.bf16 %v7774_v51, %v7772_v43  ;;  %v13840_v12 = vpop.permute.xlu1 %13839  ;;  %13929 = vrot.lane.b32.xlu0 %v15509_v39, %s14125_s26  ;;  %13919 = vrot.lane.b32.xlu1 %v15525_v42, %s14124_s20  ;;  %v13845_v47 = vpop.permute.xlu0 %13844 }
 0x6e7   : > { %v13842_v56 = vunpack.i.h.bf16 %v13840_v12  ;;  %v13841_v35 = vunpack.i.l.bf16 %v13840_v12  ;;  %v13847_v15 = vunpack.i.h.bf16 %v13845_v47  ;;  %v13846_v9 = vunpack.i.l.bf16 %v13845_v47  ;;  %12683 = vmatmul.mubr.msk.f32.vlgmr.msra.gmra.mrb[26].mxu0 %vm2276_vm14, %v7759_v33  ;;  %13067 = vmatprep.subr.bf16.mxu0 %v14134_v24 }
 0x6e8   : > { %13059 = vmatpush1.bf16.msra.mxu1 %v13058_v36  ;;  %7849 = vmatprep.mubr.f32.mxu1 %v15258_v49  ;;  %v8272_v36 = vld [vmem:[#allocation7 + $0x18] sm:$0x7] }
 0x6e9   : > { %v13068_v61 = vpack.c.bf16 %v13842_v56, %v13837_v54  ;;  %v7945_v58 = vsel %vm1236_vm5, %v13847_v15, %v13841_v35  ;;  %v7943_v40 = vsel %vm1236_vm5, %v13846_v9, %v13836_v62  ;;  %v7946_v53 = vsel %vm1236_vm5, %v13841_v35, %v13842_v56  ;;  %12689 = vmatprep.mubr.msk.f32.mxu0 %vm14135_vm7, %v15258_v49 }
 0x6ea   : > { %v13065_v18 = vpack.c.bf16 %v7945_v58, %v7943_v40  ;;  %v13850_v19 = vpop.permute.xlu1 %13849  ;;  %13934 = vrot.lane.b32.xlu0 %v15525_v42, %s14125_s26  ;;  %13924 = vrot.lane.b32.xlu1 %v15505_v63, %s14125_s26  ;;  %v13855_v22 = vpop.permute.xlu0 %13854  ;;  %v13063_v6 = vpack.c.bf16 %v7946_v53, %v7944_v60  ;;  %v8443_v40 = vld [vmem:[#allocation7 + $0x1c] sm:$0x7] }
 0x6eb   : > { %v13852_v27 = vunpack.i.h.bf16 %v13850_v19  ;;  %v13851_v2 = vunpack.i.l.bf16 %v13850_v19  ;;  %v13857_v30 = vunpack.i.h.bf16 %v13855_v22  ;;  %v13856_v44 = vunpack.i.l.bf16 %v13855_v22  ;;  %13069 = vmatpush3.bf16.msra.mxu0 %v13068_v61 }
 0x6ec   : > { %12132 = vmatmul.mubr.msk.f32.vlgmr.msra.gmra.mrb[8].mxu1 %vm2276_vm14, %v7759_v33  ;;  %13064 = vmatprep.subr.bf16.mxu1 %v13063_v6 }
 0x6ed   : > { %v13075_v50 = vpack.c.bf16 %v13857_v30, %v13852_v27  ;;  %13066 = vmatpush1.bf16.msra.mxu1 %v13065_v18  ;;  %13074 = vmatprep.subr.bf16.mxu0 %v14134_v24  ;;  %v8115_v52 = vsel %vm16057_vm11, %v13851_v2, %v13852_v27  ;;  %v8117_v29 = vsel %vm16058_vm12, %v13856_v44, %v13857_v30  ;;  %vm16067_vm11 = vmmov %vm16065_vm6 }
 0x6ee   : > { %v13860_v32 = vpop.permute.xlu1 %13859  ;;  %13939 = vrot.lane.b32.xlu0 %v15505_v63, %s14126_s13  ;;  %13944 = vrot.lane.b32.xlu1 %v15509_v39, %s14126_s13  ;;  %v13865_v23 = vpop.permute.xlu0 %13864  ;;  %v13070_v14 = vpack.c.bf16 %v8117_v29, %v8115_v52  ;;  %vm16068_vm12 = vmmov %vm16065_vm6 }
 0x6ef   : > { %v13862_v31 = vunpack.i.h.bf16 %v13860_v32  ;;  %v13861_v5 = vunpack.i.l.bf16 %v13860_v32  ;;  %12690 = vmatmul.mubr.msk.f32.vlgmr.msra.gmra.mrb[28].mxu0 %vm2276_vm14, %v7930_v45  ;;  %8020 = vmatprep.mubr.f32.mxu1 %v15258_v49  ;;  %v13867_v46 = vunpack.i.h.bf16 %v13865_v23  ;;  %v13866_v1 = vunpack.i.l.bf16 %v13865_v23 }
 0x6f0   : > { %13076 = vmatpush3.bf16.msra.mxu0 %v13075_v50  ;;  %13071 = vmatprep.subr.bf16.mxu1 %v13070_v14  ;;  %v8614_v14 = vld [vmem:[#allocation7 + $0x20] sm:$0x7] }
 0x6f1   : > { %v8114_v21 = vsel %vm16059_vm0, %v13861_v5, %v13851_v2  ;;  %v8116_v17 = vsel %vm16060_vm1, %v13862_v31, %v13856_v44  ;;  %12696 = vmatprep.mubr.msk.f32.mxu0 %vm14135_vm7, %v15258_v49  ;;  %13081 = vmatprep.subr.bf16.mxu0 %v14134_v24  ;;  %v8286_v25 = vsel %vm16061_vm9, %v13866_v1, %v13867_v46  ;;  %vm16069_vm0 = vcmask 736256  }
 0x6f2   : > { %v13072_v38 = vpack.c.bf16 %v8116_v17, %v8114_v21  ;;  %v13870_v55 = vpop.permute.xlu1 %13869  ;;  %13959 = vrot.lane.b32.xlu0 %v15509_v39, %s14127_s14  ;;  %13949 = vrot.lane.b32.xlu1 %v15525_v42, %s14126_s13  ;;  %v13875_v0 = vpop.permute.xlu0 %13874  ;;  %vm16070_vm1 = vmmov %vm16069_vm0  ;;  %v13103_v31 = vpack.c.bf16 %v15498_v3, %v15500_v34  ;;  %v8784_v21 = vld [vmem:[%s16000_s9] sm:$0x7]  ;;  %v13098_v34 = vpack.c.bf16 %v15488_v4, %v15484_v16 }
 0x6f3   : > { %v13872_v13 = vunpack.i.h.bf16 %v13870_v55  ;;  %v13871_v59 = vunpack.i.l.bf16 %v13870_v55  ;;  %12697 = vmatmul.mubr.msk.f32.vlgmr.msra.gmra.mrb[30].mxu0 %vm2276_vm14, %v8101_v11  ;;  %v13877_v37 = vunpack.i.h.bf16 %v13875_v0  ;;  %v13876_v7 = vunpack.i.l.bf16 %v13875_v0  ;;  %vm16071_vm9 = vmmov %vm16069_vm0  ;;  %v10473_v17 = vld [vmem:[%s14300_s19] sm:$0x77]  ;;  %v5911_v0 = vpop.f32.mrb[10].mxu1 }
 0x6f4   : > { %12134 = vmatmul.mubr.msk.f32.vlgmr.msra.gmra.mrb[8].mxu1 %vm2276_vm14, %v7930_v45  ;;  %12703 = vmatprep.mubr.msk.f32.mxu0 %vm14135_vm7, %v15258_v49  ;;  %v10641_v16 = vld [vmem:[%s14300_s19] sm:$0x77] }
 0x6f5   : > { %v13082_v28 = vpack.c.bf16 %v13872_v13, %v13867_v46  ;;  %13073 = vmatpush1.bf16.msra.mxu1 %v13072_v38  ;;  %v8288_v26 = vsel %vm16062_vm13, %v13871_v59, %v13872_v13  ;;  %8191 = vmatprep.mubr.f32.mxu1 %v15258_v49  ;;  %v8287_v43 = vsel %vm16063_vm10, %v13877_v37, %v13871_v59  ;;  %vm16072_vm13 = vmmov %vm16069_vm0  ;;  %v10810_v38 = vld [vmem:[%s14300_s19 + $0x8] sm:$0x7]  ;;  %v12600_v13 = vpop.f32.mrb[11].mxu1  ;;  %v11145_v37 = vld [vmem:[%s14300_s19] sm:$0x77]  ;;  %vm16073_vm10 = vcmask 883712  }
 0x6f6   : > { %v13880_v57 = vpop.permute.xlu1 %13879  ;;  %13964 = vrot.lane.b32.xlu0 %v15525_v42, %s14127_s14  ;;  %13954 = vrot.lane.b32.xlu1 %v15505_v63, %s14127_s14  ;;  %v13885_v8 = vpop.permute.xlu0 %13884  ;;  %v13077_v10 = vpack.c.bf16 %v8288_v26, %v8286_v25  ;;  %v8285_v51 = vsel %vm16064_vm8, %v13876_v7, %v13866_v1  ;;  %v10477_v46 = vcombine.high %v10473_v17, %v10473_v17  ;;  %v10978_v59 = vld [vmem:[%s14300_s19 + $0x8] sm:$0x7]  ;;  %v11313_v26 = vld [vmem:[%s14300_s19] sm:$0x77]  ;;  %vm16074_vm8 = vmmov %vm16073_vm10 }
 0x6f7   : > { %v13882_v48 = vunpack.i.h.bf16 %v13880_v57  ;;  %v13881_v54 = vunpack.i.l.bf16 %v13880_v57  ;;  %v13887_v62 = vunpack.i.h.bf16 %v13885_v8  ;;  %v13886_v33 = vunpack.i.l.bf16 %v13885_v8  ;;  %13083 = vmatpush3.bf16.msra.mxu0 %v13082_v28  ;;  %v6055_v7 = vpop.f32.mrb[12].mxu1  ;;  %v11146_v28 = vld [vmem:[%s14300_s19 + $0x8] sm:$0x7] }
 0x6f8   : > { %13078 = vmatprep.subr.bf16.mxu1 %v13077_v10  ;;  %13088 = vmatprep.subr.bf16.mxu0 %v14134_v24  ;;  %v13079_v60 = vpack.c.bf16 %v8287_v43, %v8285_v51  ;;  %v10645_v4 = vcombine.high %v10641_v16, %v10641_v16  ;;  %v13100_v1 = vpack.c.bf16 %v15513_v41, %v15520_v20  ;;  %v10977_v41 = vld [vmem:[%s14300_s19] sm:$0x77]  ;;  %v12607_v8 = vpop.f32.mrb[13].mxu1  ;;  %v6565_v51 = vpop.f32.mrb[10].mxu0 }
 0x6f9   : > { %v13089_v12 = vpack.c.bf16 %v13887_v62, %v13882_v48  ;;  %v8457_v47 = vsel %vm16065_vm6, %v13881_v54, %v13882_v48  ;;  %v8459_v56 = vsel %vm16066_vm15, %v13886_v33, %v13887_v62  ;;  %v10981_v20 = vcombine.high %v10977_v41, %v10977_v41  ;;  %v6223_v10 = vpop.f32.mrb[14].mxu1  ;;  %vm16075_vm6 = vmmov %vm16074_vm8 }
 0x6fa   : > { %v13890_v35 = vpop.permute.xlu1 %13889  ;;  %13969 = vrot.lane.b32.xlu0 %v15505_v63, %s14128_s15  ;;  %13974 = vrot.lane.b32.xlu1 %v15509_v39, %s14128_s15  ;;  %v13895_v15 = vpop.permute.xlu0 %13894  ;;  %v13084_v9 = vpack.c.bf16 %v8459_v56, %v8457_v47  ;;  %v11149_v25 = vcombine.high %v11145_v37, %v11145_v37  ;;  %v6056_v57 = vadd.f32 %v6055_v7, %v5911_v0  ;;  %vm16076_vm15 = vmmov %vm16075_vm6 }
 0x6fb   : > { %12704 = vmatmul.mubr.msk.f32.vlgmr.msra.gmra.mrb[32].mxu0 %vm2276_vm14, %v8272_v36  ;;  %v13892_v61 = vunpack.i.h.bf16 %v13890_v35  ;;  %v13891_v58 = vunpack.i.l.bf16 %v13890_v35  ;;  %v13897_v53 = vunpack.i.h.bf16 %v13895_v15  ;;  %v13896_v18 = vunpack.i.l.bf16 %v13895_v15 }
 0x6fc   : > { %13090 = vmatpush3.bf16.msra.mxu0 %v13089_v12  ;;  %12136 = vmatmul.mubr.msk.f32.vlgmr.msra.gmra.mrb[8].mxu1 %vm2276_vm14, %v8101_v11  ;;  %v6229_v48 = vadd.f32 %v6223_v10, %v6056_v57  ;;  %v11317_v62 = vcombine.high %v11313_v26, %v11313_v26  ;;  %v12628_v12 = vpop.f32.mrb[11].mxu0 }
 0x6fd   : > { %13080 = vmatpush1.bf16.msra.mxu1 %v13079_v60  ;;  %12710 = vmatprep.mubr.msk.f32.mxu0 %vm14135_vm7, %v15258_v49  ;;  %v8456_v27 = vsel %vm16067_vm11, %v13891_v58, %v13881_v54  ;;  %v8458_v2 = vsel %vm16068_vm12, %v13892_v61, %v13886_v33  ;;  %v8628_v45 = vsel %vm16069_vm0, %v13896_v18, %v13897_v53  ;;  %v12614_v54 = vpop.f32.mrb[15].mxu1  ;;  %v6736_v56 = vpop.f32.mrb[12].mxu0  ;;  %v11481_v60 = vld [vmem:[%s14300_s19] sm:$0x77]  ;;  %vm16077_vm11 = vcmask 752640  }
 0x6fe   : > { %13085 = vmatprep.subr.bf16.mxu1 %v13084_v9  ;;  %v13900_v19 = vpop.permute.xlu1 %13899  ;;  %13989 = vrot.lane.b32.xlu0 %v15509_v39, %s14129_s16  ;;  %v13905_v44 = vpop.permute.xlu0 %13904  ;;  %v13086_v29 = vpack.c.bf16 %v8458_v2, %v8456_v27  ;;  %v11314_v9 = vld [vmem:[%s14300_s19 + $0x8] sm:$0x7]  ;;  %vm16078_vm12 = vmmov %vm16077_vm11 }
 0x6ff   : > { %v13902_v22 = vunpack.i.h.bf16 %v13900_v19  ;;  %v13901_v6 = vunpack.i.l.bf16 %v13900_v19  ;;  %13979 = vrot.lane.b32.xlu1 %v15525_v42, %s14128_s15  ;;  %12711 = vmatmul.mubr.msk.f32.vlgmr.msra.gmra.mrb[34].mxu0 %vm2276_vm14, %v8443_v40  ;;  %v13907_v32 = vunpack.i.h.bf16 %v13905_v44  ;;  %v13906_v23 = vunpack.i.l.bf16 %v13905_v44  ;;  %v6394_v33 = vpop.f32.mrb[16].mxu1  ;;  %v12635_v15 = vpop.f32.mrb[13].mxu0  ;;  %vm16079_vm0 = vmmov %vm16077_vm11 }
 0x700   : > { %13095 = vmatprep.subr.bf16.mxu0 %v14134_v24  ;;  %8362 = vmatprep.mubr.f32.mxu1 %v15258_v49  ;;  %v6400_v43 = vadd.f32 %v6394_v33, %v6229_v48  ;;  %v6907_v61 = vpop.f32.mrb[14].mxu0  ;;  %v11485_v19 = vcombine.high %v11481_v60, %v11481_v60 }
 0x701   : > { %v13096_v30 = vpack.c.bf16 %v13902_v22, %v13897_v53  ;;  %v8630_v50 = vsel %vm16070_vm1, %v13901_v6, %v13902_v22  ;;  %12717 = vmatprep.mubr.msk.f32.mxu0 %vm14135_vm7, %v15258_v49  ;;  %v8629_v5 = vsel %vm16071_vm9, %v13907_v32, %v13901_v6  ;;  %v8627_v11 = vsel %vm16072_vm13, %v13906_v23, %v13896_v18  ;;  %v11482_v18 = vld [vmem:[%s14300_s19 + $0x8] sm:$0x7]  ;;  %v11649_v22 = vld [vmem:[%s14300_s19] sm:$0x77]  ;;  %vm16080_vm1 = vmmov %vm16079_vm0 }
 0x702   : > { %13994 = vrot.lane.b32.xlu0 %v15525_v42, %s14129_s16  ;;  %v13091_v52 = vpack.c.bf16 %v8630_v50, %v8628_v45  ;;  %v13093_v3 = vpack.c.bf16 %v8629_v5, %v8627_v11  ;;  %v6571_v47 = vadd.f32 %v6565_v51, %v6400_v43  ;;  %v11653_v45 = vcombine.high %v11649_v22, %v11649_v22  ;;  %v11815_v5 = vld [vmem:[%s16002_s11] sm:$0x7] }
 0x703   : > { %13984 = vrot.lane.b32.xlu1 %v15505_v63, %s14129_s16  ;;  %13097 = vmatpush3.bf16.msra.mxu0 %v13096_v30  ;;  %vm16081_vm9 = vcmask 744448  }
 0x704   : > { %12138 = vmatmul.mubr.msk.f32.vlgmr.msra.gmra.mrb[8].mxu1 %vm2276_vm14, %v8272_v36  ;;  %13102 = vmatprep.subr.bf16.mxu0 %v14134_v24  ;;  %v12621_v36 = vpop.f32.mrb[17].mxu1  ;;  %v6742_v35 = vadd.f32 %v6736_v56, %v6571_v47  ;;  %vm16082_vm13 = vmmov %vm16081_vm9 }
 0x705   : > { %13087 = vmatpush1.bf16.msra.mxu1 %v13086_v29  ;;  %8533 = vmatprep.mubr.f32.mxu1 %v15258_v49 }
 0x706   : > { %13092 = vmatprep.subr.bf16.mxu1 %v13091_v52  ;;  %13999 = vrot.lane.b32.xlu0 %v15505_v63, %s14130_s17  ;;  %v6913_v58 = vadd.f32 %v6907_v61, %v6742_v35 }
 0x707   : > { %14004 = vrot.lane.b32.xlu1 %v15509_v39, %s14130_s17  ;;  %12718 = vmatmul.mubr.msk.f32.vlgmr.msra.gmra.mrb[36].mxu0 %vm2276_vm14, %v8614_v14 }
 0x708   : > { %13104 = vmatpush3.bf16.msra.mxu0 %v13103_v31  ;;  %12724 = vmatprep.mubr.msk.f32.mxu0 %vm14135_vm7, %v15258_v49  ;;  %v11650_v31 = vld [vmem:[%s14300_s19 + $0x8] sm:$0x7] }
 0x709   : > { %13109 = vmatprep.subr.bf16.mxu0 %v14134_v24 }
 0x70a   : > { %14019 = vrot.lane.b32.xlu0 %v15509_v39, %s14131_s24  ;;  %v10474_v39 = vld [vmem:[%s14300_s19 + $0x8] sm:$0x7] }
 0x70b   : > { %14009 = vrot.lane.b32.xlu1 %v15525_v42, %s14130_s17  ;;  %12725 = vmatmul.mubr.msk.f32.vlgmr.msra.gmra.mrb[38].mxu0 %vm2276_vm14, %v8784_v21 }
 0x70c   : > { %12140 = vmatmul.mubr.msk.f32.vlgmr.msra.gmra.mrb[8].mxu1 %vm2276_vm14, %v8443_v40  ;;  %12731 = vmatprep.mubr.msk.f32.mxu0 %vm14135_vm7, %v15258_v49  ;;  %v12642_v40 = vpop.f32.mrb[15].mxu0 }
 0x70d   : > { %13094 = vmatpush1.bf16.msra.mxu1 %v13093_v3  ;;  %8704 = vmatprep.mubr.f32.mxu1 %v15258_v49  ;;  %v7078_v53 = vpop.f32.mrb[16].mxu0 }
 0x70e   : > { %13099 = vmatprep.subr.bf16.mxu1 %v13098_v34  ;;  %14024 = vrot.lane.b32.xlu0 %v15525_v42, %s14131_s24  ;;  %v10809_v42 = vld [vmem:[%s14300_s19] sm:$0x77]  ;;  %v7084_v6 = vadd.f32 %v7078_v53, %v6913_v58  ;;  %v12649_v27 = vpop.f32.mrb[17].mxu0 }
 0x70f   : > { %14014 = vrot.lane.b32.xlu1 %v15505_v63, %s14131_s24  ;;  %v10642_v63 = vld [vmem:[%s14300_s19 + $0x8] sm:$0x7]  ;;  %v10813_v55 = vcombine.high %v10809_v42, %v10809_v42  ;;  %v7249_v2 = vpop.f32.mrb[18].mxu0 }
 0x710   : > { %v7255_v30 = vadd.f32 %v7249_v2, %v7084_v6  ;;  %v12656_v44 = vpop.f32.mrb[19].mxu0  ;;  %v12152_v6 = vld [vmem:[%s16000_s9 + $0xc] sm:$0x7] }
 0x711   : > { %v7403_v50 = vpop.f32.mrb[20].mxu0 }
 0x712   : > { %10482 = vrot.lane.b32.xlu0 %v10474_v39, %s14124_s20  ;;  %v7409_v52 = vadd.f32 %v7403_v50, %v7255_v30  ;;  %v12663_v29 = vpop.f32.mrb[21].mxu0 }
 0x713   : > { %10480 = vrot.lane.b32.xlu1 %v10477_v46, %s14124_s20  ;;  %v7580_v32 = vpop.f32.mrb[22].mxu0 }
 0x714   : > { %12142 = vmatmul.mubr.msk.f32.vlgmr.msra.gmra.mrb[8].mxu1 %vm2276_vm14, %v8614_v14  ;;  %v15682_v23 = vadd.f32 %v7580_v32, %v7409_v52  ;;  %v12670_v14 = vpop.f32.mrb[23].mxu0 }
 0x715   : > { %13101 = vmatpush1.bf16.msra.mxu1 %v13100_v1  ;;  %8858 = vmatprep.mubr.f32.mxu1 %v15258_v49 }
 0x716   : > { %10648 = vrot.lane.b32.xlu0 %v10645_v4, %s14125_s26 }
 0x717   : > { %10478 = vrot.lane.b32.xlu1 %v10473_v17, %s14124_s20 }
 0x71a   : > { %10646 = vrot.lane.b32.xlu0 %v10641_v16, %s14125_s26 }
 0x71b   : > { %10650 = vrot.lane.b32.xlu1 %v10642_v63, %s14125_s26 }
 0x71c   : > { %12144 = vmatmul.mubr.msk.f32.vlgmr.msra.gmra.mrb[8].mxu1 %vm2276_vm14, %v8784_v21 }
 0x71d   : > { %9035 = vmatprep.mubr.f32.mxu1 %v15258_v49 }
 0x71e   : > { %10818 = vrot.lane.b32.xlu0 %v10810_v38, %s14126_s13 }
 0x71f   : > { %10816 = vrot.lane.b32.xlu1 %v10813_v55, %s14126_s13 }
 0x722   : > { %10984 = vrot.lane.b32.xlu0 %v10981_v20, %s14127_s14 }
 0x723   : > { %10814 = vrot.lane.b32.xlu1 %v10809_v42, %s14126_s13 }
 0x726   : > { %10982 = vrot.lane.b32.xlu0 %v10977_v41, %s14127_s14  ;;  %v12146_v41 = vld [vmem:[%s16000_s9 + $0x4] sm:$0x7] }
 0x727   : > { %10986 = vrot.lane.b32.xlu1 %v10978_v59, %s14127_s14 }
 0x72a   : > { %11154 = vrot.lane.b32.xlu0 %v11146_v28, %s14128_s15 }
 0x72b   : > { %11152 = vrot.lane.b32.xlu1 %v11149_v25, %s14128_s15 }
 0x72e   : > { %11320 = vrot.lane.b32.xlu0 %v11317_v62, %s14129_s16 }
 0x72f   : > { %11150 = vrot.lane.b32.xlu1 %v11145_v37, %s14128_s15 }
 0x732   : > { %11318 = vrot.lane.b32.xlu0 %v11313_v26, %s14129_s16 }
 0x733   : > { %11322 = vrot.lane.b32.xlu1 %v11314_v9, %s14129_s16  ;;  %v12149_v9 = vld [vmem:[%s16000_s9 + $0x8] sm:$0x7] }
 0x736   : > { %11490 = vrot.lane.b32.xlu0 %v11482_v18, %s14130_s17 }
 0x737   : > { %11488 = vrot.lane.b32.xlu1 %v11485_v19, %s14130_s17 }
 0x73a   : > { %11656 = vrot.lane.b32.xlu0 %v11653_v45, %s14131_s24 }
 0x73b   : > { %11486 = vrot.lane.b32.xlu1 %v11481_v60, %s14130_s17 }
 0x73e   : > { %11654 = vrot.lane.b32.xlu0 %v11649_v22, %s14131_s24 }
 0x73f   : > { %11658 = vrot.lane.b32.xlu1 %v11650_v31, %s14131_s24 }
 0x743   : > { %11818 = vperm.xlu1 %13427, %v11815_v5  }
 0x754   : > { %v13915_v11 = vpop.permute.xlu1 %13914  ;;  %v13910_v21 = vpop.permute.xlu0 %13909 }
 0x755   : > { %v13917_v3 = vunpack.i.h.bf16 %v13915_v11  ;;  %v13916_v34 = vunpack.i.l.bf16 %v13915_v11  ;;  %v13912_v17 = vunpack.i.h.bf16 %v13910_v21  ;;  %v13911_v39 = vunpack.i.l.bf16 %v13910_v21 }
 0x757   : > { %v13110_v46 = vpack.c.bf16 %v13912_v17, %v13917_v3  ;;  %v8959_v16 = vsel %vm515_vm2, %v13916_v34, %v13917_v3  ;;  %v8961_v4 = vsel %vm515_vm2, %v13911_v39, %v13912_v17 }
 0x758   : > { %v13920_v1 = vpop.permute.xlu1 %13919  ;;  %v13930_v63 = vpop.permute.xlu0 %13929  ;;  %v13105_v42 = vpack.c.bf16 %v8961_v4, %v8959_v16 }
 0x759   : > { %v13922_v38 = vunpack.i.h.bf16 %v13920_v1  ;;  %v13921_v55 = vunpack.i.l.bf16 %v13920_v1  ;;  %13111 = vmatpush3.bf16.msra.mxu0 %v13110_v46  ;;  %v13932_v20 = vunpack.i.h.bf16 %v13930_v63  ;;  %v13931_v0 = vunpack.i.l.bf16 %v13930_v63 }
 0x75a   : > { %13106 = vmatprep.subr.bf16.mxu1 %v13105_v42  ;;  %13116 = vmatprep.subr.bf16.mxu0 %v14134_v24  ;;  %v12155_v42 = vld [vmem:[%s16000_s9 + $0x10] sm:$0x7] }
 0x75b   : > { %v8958_v13 = vsel %vm515_vm2, %v13921_v55, %v13916_v34  ;;  %v8960_v59 = vsel %vm515_vm2, %v13922_v38, %v13911_v39  ;;  %v9130_v10 = vsel %vm862_vm3, %v13931_v0, %v13932_v20 }
 0x75c   : > { %v13107_v37 = vpack.c.bf16 %v8960_v59, %v8958_v13  ;;  %v13925_v7 = vpop.permute.xlu1 %13924  ;;  %v13935_v28 = vpop.permute.xlu0 %13934  ;;  %12732 = vmatmul.mubr.msk.f32.vlgmr.msra.gmra.mrb[40].mxu0 %vm2276_vm14, %v12146_v41 }
 0x75d   : > { %v13927_v25 = vunpack.i.h.bf16 %v13925_v7  ;;  %v13926_v26 = vunpack.i.l.bf16 %v13925_v7  ;;  %v13937_v57 = vunpack.i.h.bf16 %v13935_v28  ;;  %v13936_v8 = vunpack.i.l.bf16 %v13935_v28  ;;  %12738 = vmatprep.mubr.msk.f32.mxu0 %vm14135_vm7, %v15258_v49 }
 0x75e   : > { %13108 = vmatpush1.bf16.msra.mxu1 %v13107_v37  ;;  %v12158_v37 = vld [vmem:[%s16000_s9 + $0x14] sm:$0x7] }
 0x75f   : > { %v13117_v48 = vpack.c.bf16 %v13927_v25, %v13932_v20  ;;  %v9131_v54 = vsel %vm862_vm3, %v13937_v57, %v13926_v26  ;;  %v9129_v62 = vsel %vm862_vm3, %v13936_v8, %v13931_v0  ;;  %v9132_v33 = vsel %vm862_vm3, %v13926_v26, %v13927_v25 }
 0x760   : > { %v13114_v43 = vpack.c.bf16 %v9131_v54, %v9129_v62  ;;  %v13945_v51 = vpop.permute.xlu1 %13944  ;;  %v13940_v36 = vpop.permute.xlu0 %13939  ;;  %v13112_v12 = vpack.c.bf16 %v9132_v33, %v9130_v10 }
 0x761   : > { %v13947_v47 = vunpack.i.h.bf16 %v13945_v51  ;;  %v13946_v56 = vunpack.i.l.bf16 %v13945_v51  ;;  %v13942_v35 = vunpack.i.h.bf16 %v13940_v36  ;;  %v13941_v15 = vunpack.i.l.bf16 %v13940_v36  ;;  %12147 = vmatmul.mubr.msk.f32.vlgmr.msra.gmra.mrb[8].mxu1 %vm2276_vm14, %v12146_v41  ;;  %13118 = vmatpush3.bf16.msra.mxu0 %v13117_v48 }
 0x762   : > { %13113 = vmatprep.subr.bf16.mxu1 %v13112_v12  ;;  %13123 = vmatprep.subr.bf16.mxu0 %v14134_v24 }
 0x763   : > { %v13124_v60 = vpack.c.bf16 %v13942_v35, %v13947_v47  ;;  %13115 = vmatpush1.bf16.msra.mxu1 %v13114_v43  ;;  %v9301_v61 = vsel %vm1049_vm4, %v13946_v56, %v13947_v47  ;;  %v9303_v58 = vsel %vm1049_vm4, %v13941_v15, %v13942_v35  ;;  %9206 = vmatprep.mubr.f32.mxu1 %v15258_v49 }
 0x764   : > { %v13950_v40 = vpop.permute.xlu1 %13949  ;;  %v13960_v53 = vpop.permute.xlu0 %13959  ;;  %12739 = vmatmul.mubr.msk.f32.vlgmr.msra.gmra.mrb[42].mxu0 %vm2276_vm14, %v12149_v9  ;;  %v13119_v18 = vpack.c.bf16 %v9303_v58, %v9301_v61 }
 0x765   : > { %v13952_v19 = vunpack.i.h.bf16 %v13950_v40  ;;  %v13951_v22 = vunpack.i.l.bf16 %v13950_v40  ;;  %13125 = vmatpush3.bf16.msra.mxu0 %v13124_v60  ;;  %12745 = vmatprep.mubr.msk.f32.mxu0 %vm14135_vm7, %v15258_v49  ;;  %v13962_v30 = vunpack.i.h.bf16 %v13960_v53  ;;  %v13961_v44 = vunpack.i.l.bf16 %v13960_v53  ;;  %v12161_v40 = vld [vmem:[%s16000_s9 + $0x18] sm:$0x7] }
 0x766   : > { %13120 = vmatprep.subr.bf16.mxu1 %v13119_v18  ;;  %13130 = vmatprep.subr.bf16.mxu0 %v14134_v24 }
 0x767   : > { %v9300_v27 = vsel %vm1049_vm4, %v13951_v22, %v13946_v56  ;;  %v9302_v2 = vsel %vm1049_vm4, %v13952_v19, %v13941_v15  ;;  %v9472_v11 = vsel %vm1236_vm5, %v13961_v44, %v13962_v30 }
 0x768   : > { %v13121_v45 = vpack.c.bf16 %v9302_v2, %v9300_v27  ;;  %v13955_v50 = vpop.permute.xlu1 %13954  ;;  %v13965_v52 = vpop.permute.xlu0 %13964  ;;  %12746 = vmatmul.mubr.msk.f32.vlgmr.msra.gmra.mrb[44].mxu0 %vm2276_vm14, %v12152_v6  ;;  %v12164_v27 = vld [vmem:[%s16000_s9 + $0x1c] sm:$0x7] }
 0x769   : > { %v13957_v29 = vunpack.i.h.bf16 %v13955_v50  ;;  %v13956_v32 = vunpack.i.l.bf16 %v13955_v50  ;;  %v13967_v14 = vunpack.i.h.bf16 %v13965_v52  ;;  %v13966_v31 = vunpack.i.l.bf16 %v13965_v52  ;;  %12150 = vmatmul.mubr.msk.f32.vlgmr.msra.gmra.mrb[8].mxu1 %vm2276_vm14, %v12149_v9  ;;  %12752 = vmatprep.mubr.msk.f32.mxu0 %vm14135_vm7, %v15258_v49 }
 0x76a   : > { %13122 = vmatpush1.bf16.msra.mxu1 %v13121_v45  ;;  %9377 = vmatprep.mubr.f32.mxu1 %v15258_v49 }
 0x76b   : > { %v13131_v5 = vpack.c.bf16 %v13957_v29, %v13962_v30  ;;  %v9474_v21 = vsel %vm1236_vm5, %v13956_v32, %v13957_v29  ;;  %v9473_v3 = vsel %vm1236_vm5, %v13967_v14, %v13956_v32  ;;  %v9471_v34 = vsel %vm1236_vm5, %v13966_v31, %v13961_v44 }
 0x76c   : > { %v13975_v17 = vpop.permute.xlu1 %13974  ;;  %v13970_v39 = vpop.permute.xlu0 %13969  ;;  %v13126_v46 = vpack.c.bf16 %v9474_v21, %v9472_v11  ;;  %v13128_v20 = vpack.c.bf16 %v9473_v3, %v9471_v34 }
 0x76d   : > { %v13977_v16 = vunpack.i.h.bf16 %v13975_v17  ;;  %v13976_v4 = vunpack.i.l.bf16 %v13975_v17  ;;  %v13972_v1 = vunpack.i.h.bf16 %v13970_v39  ;;  %v13971_v63 = vunpack.i.l.bf16 %v13970_v39  ;;  %13132 = vmatpush3.bf16.msra.mxu0 %v13131_v5  ;;  %v12167_v39 = vld [vmem:[%s16000_s9 + $0x20] sm:$0x7] }
 0x76e   : > { %13127 = vmatprep.subr.bf16.mxu1 %v13126_v46  ;;  %13137 = vmatprep.subr.bf16.mxu0 %v14134_v24 }
 0x76f   : > { %v13138_v38 = vpack.c.bf16 %v13972_v1, %v13977_v16  ;;  %v9643_v55 = vsel %vm16073_vm10, %v13976_v4, %v13977_v16  ;;  %v9645_v41 = vsel %vm16074_vm8, %v13971_v63, %v13972_v1  ;;  %vm16083_vm10 = vmmov %vm16081_vm9  ;;  %v10314_v16 = vld [vmem:[%s14300_s19 + $0x8] sm:$0x7] }
 0x770   : > { %v13990_v0 = vpop.permute.xlu0 %13989  ;;  %12753 = vmatmul.mubr.msk.f32.vlgmr.msra.gmra.mrb[46].mxu0 %vm2276_vm14, %v12155_v42  ;;  %v13133_v13 = vpack.c.bf16 %v9645_v41, %v9643_v55  ;;  %vm16084_vm8 = vmmov %vm16081_vm9 }
 0x771   : > { %v13980_v59 = vpop.permute.xlu1 %13979  ;;  %12153 = vmatmul.mubr.msk.f32.vlgmr.msra.gmra.mrb[8].mxu1 %vm2276_vm14, %v12152_v6  ;;  %13139 = vmatpush3.bf16.msra.mxu0 %v13138_v38  ;;  %v13992_v25 = vunpack.i.h.bf16 %v13990_v0  ;;  %v13991_v26 = vunpack.i.l.bf16 %v13990_v0 }
 0x772   : > { %v13982_v7 = vunpack.i.h.bf16 %v13980_v59  ;;  %v13981_v28 = vunpack.i.l.bf16 %v13980_v59  ;;  %13129 = vmatpush1.bf16.msra.mxu1 %v13128_v20  ;;  %12759 = vmatprep.mubr.msk.f32.mxu0 %vm14135_vm7, %v15258_v49  ;;  %v10312_v20 = vld [vmem:[%s16001_s10] sm:$0x7] }
 0x773   : > { %13134 = vmatprep.subr.bf16.mxu1 %v13133_v13  ;;  %9548 = vmatprep.mubr.f32.mxu1 %v15258_v49  ;;  %v9814_v36 = vsel %vm16077_vm11, %v13991_v26, %v13992_v25  ;;  %vm16087_vm11 = vcmask 1042432  }
 0x774   : > { %v13995_v57 = vpop.permute.xlu0 %13994  ;;  %12760 = vmatmul.mubr.msk.f32.vlgmr.msra.gmra.mrb[48].mxu0 %vm2276_vm14, %v12158_v37  ;;  %13144 = vmatprep.subr.bf16.mxu0 %v14134_v24  ;;  %v9642_v8 = vsel %vm16075_vm6, %v13981_v28, %v13976_v4  ;;  %v9644_v10 = vsel %vm16076_vm15, %v13982_v7, %v13971_v63  ;;  %vm16085_vm6 = vcmask 736256   ;;  %v10313_v7 = vld [vmem:[%s14300_s19] sm:$0x77] }
 0x775   : > { %v13985_v48 = vpop.permute.xlu1 %13984  ;;  %12766 = vmatprep.mubr.msk.f32.mxu0 %vm14135_vm7, %v15258_v49  ;;  %v13135_v33 = vpack.c.bf16 %v9644_v10, %v9642_v8  ;;  %v13997_v47 = vunpack.i.h.bf16 %v13995_v57  ;;  %v13996_v56 = vunpack.i.l.bf16 %v13995_v57  ;;  %vm16086_vm15 = vmmov %vm16085_vm6  ;;  %v15812_v28 = vld [vmem:[%s16001_s10 + $0x4] sm:$0x7]  ;;  %v10317_v57 = vcombine.high %v10313_v7, %v10313_v7  ;;  %v15824_v10 = vld [vmem:[%s16001_s10 + $0x8] sm:$0x7] }
 0x776   : > { %v13987_v54 = vunpack.i.h.bf16 %v13985_v48  ;;  %v13986_v62 = vunpack.i.l.bf16 %v13985_v48 }
 0x777   : > { %v9813_v22 = vsel %vm16080_vm1, %v13996_v56, %v13991_v26  ;;  %vm16090_vm1 = vcmask 23552   ;;  %v15872_v56 = vld [vmem:[%s16001_s10 + $0x14] sm:$0x7] }
 0x778   : > { %v13145_v43 = vpack.c.bf16 %v13987_v54, %v13992_v25  ;;  %v14000_v51 = vpop.permute.xlu0 %13999  ;;  %v9816_v12 = vsel %vm16078_vm12, %v13986_v62, %v13987_v54  ;;  %v9815_v19 = vsel %vm16079_vm0, %v13997_v47, %v13986_v62  ;;  %vm16088_vm12 = vmmov %vm16085_vm6  ;;  %v15841_v62 = vld [vmem:[%s16001_s10 + $0xc] sm:$0x7] }
 0x779   : > { %v14005_v35 = vpop.permute.xlu1 %14004  ;;  %v14002_v15 = vunpack.i.h.bf16 %v14000_v51  ;;  %12156 = vmatmul.mubr.msk.f32.vlgmr.msra.gmra.mrb[8].mxu1 %vm2276_vm14, %v12155_v42  ;;  %v13140_v9 = vpack.c.bf16 %v9816_v12, %v9814_v36  ;;  %v14001_v58 = vunpack.i.l.bf16 %v14000_v51  ;;  %v13142_v44 = vpack.c.bf16 %v9815_v19, %v9813_v22  ;;  %vm16089_vm0 = vmmov %vm16085_vm6  ;;  %v15858_v36 = vld [vmem:[%s16001_s10 + $0x10] sm:$0x7]  ;;  %v15904_v19 = vld [vmem:[%s16001_s10 + $0x1c] sm:$0x7] }
 0x77a   : > { %v14007_v60 = vunpack.i.h.bf16 %v14005_v35  ;;  %v14006_v61 = vunpack.i.l.bf16 %v14005_v35  ;;  %13136 = vmatpush1.bf16.msra.mxu1 %v13135_v33  ;;  %13146 = vmatpush3.bf16.msra.mxu0 %v13145_v43 }
 0x77b   : > { %13141 = vmatprep.subr.bf16.mxu1 %v13140_v9  ;;  %13151 = vmatprep.subr.bf16.mxu0 %v14134_v24  ;;  %v9987_v30 = vsel %vm16082_vm13, %v14001_v58, %v14002_v15  ;;  %vm16092_vm13 = vmmov %vm16090_vm1 }
 0x77c   : > { %v13152_v53 = vpack.c.bf16 %v14002_v15, %v14007_v60  ;;  %v14020_v18 = vpop.permute.xlu0 %14019  ;;  %9719 = vmatprep.mubr.f32.mxu1 %v15258_v49  ;;  %v9985_v2 = vsel %vm16081_vm9, %v14006_v61, %v14007_v60  ;;  %vm16091_vm9 = vmmov %vm16087_vm11 }
 0x77d   : > { %v14010_v6 = vpop.permute.xlu1 %14009  ;;  %12767 = vmatmul.mubr.msk.f32.vlgmr.msra.gmra.mrb[50].mxu0 %vm2276_vm14, %v12161_v40  ;;  %v13147_v32 = vpack.c.bf16 %v9987_v30, %v9985_v2  ;;  %v14022_v14 = vunpack.i.h.bf16 %v14020_v18  ;;  %v15924_v30 = vld [vmem:[%s16001_s10 + $0x20] sm:$0x7] }
 0x77e   : > { %13153 = vmatpush3.bf16.msra.mxu0 %v13152_v53  ;;  %12773 = vmatprep.mubr.msk.f32.mxu0 %vm14135_vm7, %v15258_v49  ;;  %v14012_v50 = vunpack.i.h.bf16 %v14010_v6  ;;  %v14011_v52 = vunpack.i.l.bf16 %v14010_v6 }
 0x77f   : > { %13158 = vmatprep.subr.bf16.mxu0 %v14134_v24  ;;  %v14021_v24 = vunpack.i.l.bf16 %v14020_v18 }
 0x780   : > { %v14025_v45 = vpop.permute.xlu0 %14024  ;;  %v9984_v3 = vsel %vm16083_vm10, %v14011_v52, %v14006_v61  ;;  %v9986_v34 = vsel %vm16084_vm8, %v14012_v50, %v14001_v58  ;;  %vm16093_vm10 = vmmov %vm16091_vm9  ;;  %v15890_v58 = vld [vmem:[%s16001_s10 + $0x18] sm:$0x7] }
 0x781   : > { %v14015_v29 = vpop.permute.xlu1 %14014  ;;  %12774 = vmatmul.mubr.msk.f32.vlgmr.msra.gmra.mrb[52].mxu0 %vm2276_vm14, %v12164_v27  ;;  %12159 = vmatmul.mubr.msk.f32.vlgmr.msra.gmra.mrb[8].mxu1 %vm2276_vm14, %v12158_v37  ;;  %v13149_v4 = vpack.c.bf16 %v9986_v34, %v9984_v3  ;;  %v10156_v63 = vsel %vm16086_vm15, %v14021_v24, %v14022_v14  ;;  %v14027_v42 = vunpack.i.h.bf16 %v14025_v45  ;;  %v14026_v38 = vunpack.i.l.bf16 %v14025_v45  ;;  %vm16094_vm8 = vmmov %vm16091_vm9 }
 0x782   : > { %v14017_v31 = vunpack.i.h.bf16 %v14015_v29  ;;  %v14016_v5 = vunpack.i.l.bf16 %v14015_v29  ;;  %13143 = vmatpush1.bf16.msra.mxu1 %v13142_v44  ;;  %12780 = vmatprep.mubr.msk.f32.mxu0 %vm14135_vm7, %v15258_v49  ;;  %vm16096_vm15 = vmmov %vm16094_vm8 }
 0x783   : > { %13148 = vmatprep.subr.bf16.mxu1 %v13147_v32  ;;  %9890 = vmatprep.mubr.f32.mxu1 %v15258_v49  ;;  %v10155_v59 = vsel %vm16089_vm0, %v14026_v38, %v14021_v24  ;;  %vm16099_vm0 = vmmov %vm16094_vm8 }
 0x784   : > { %v13159_v11 = vpack.c.bf16 %v14017_v31, %v14022_v14  ;;  %v10483_v21 = vpop.permute.xlu0 %10482  ;;  %v10158_v46 = vsel %vm16085_vm6, %v14016_v5, %v14017_v31  ;;  %v10157_v13 = vsel %vm16088_vm12, %v14027_v42, %v14016_v5  ;;  %vm16095_vm6 = vmmov %vm16090_vm1 }
 0x785   : > { %v15779_v17 = vpop.permute.xlu1 %10480  ;;  %v13154_v41 = vpack.c.bf16 %v10158_v46, %v10156_v63  ;;  %v13156_v25 = vpack.c.bf16 %v10157_v13, %v10155_v59  ;;  %vm16098_vm12 = vmmov %vm16094_vm8 }
 0x786   : > { %13160 = vmatpush3.bf16.msra.mxu0 %v13159_v11  ;;  %v10485_v43 = vsel %vm515_vm2, %v15779_v17, %v10483_v21 }
 0x787   : > { %12783 = vmatprep.subr.mxu0 %v15258_v49 }
 0x788   : > { %v15787_v1 = vpop.permute.xlu0 %10648 }
 0x789   : > { %v10479_v55 = vpop.permute.xlu1 %10478  ;;  %12781 = vmatmul.mubr.msk.f32.vlgmr.msra.gmra.mrb[54].mxu0 %vm2276_vm14, %v12167_v39  ;;  %12162 = vmatmul.mubr.msk.f32.vlgmr.msra.gmra.mrb[8].mxu1 %vm2276_vm14, %v12161_v40 }
 0x78a   : > { %13150 = vmatpush1.bf16.msra.mxu1 %v13149_v4  ;;  %12784 = vmatpush3.msk.msra.mxu0 %vm16087_vm11, %v10314_v16  ;;  %vm16097_vm11 = vmmov %vm16090_vm1  ;;  %v10484_v35 = vsel %vm515_vm2, %v10479_v55, %v15779_v17 }
 0x78b   : > { %13155 = vmatprep.subr.bf16.mxu1 %v13154_v41  ;;  %12785 = vmatprep.mubr.msk.f32.mxu0 %vm14135_vm7, %v15258_v49  ;;  %vm16106_vm2 = vmmov %vm16099_vm0 }
 0x78c   : > { %v15798_v0 = vpop.permute.xlu0 %10646  ;;  %12788 = vmatprep.subr.mxu0 %v15258_v49  ;;  %10061 = vmatprep.mubr.f32.mxu1 %v15258_v49 }
 0x78d   : > { %v10651_v37 = vpop.permute.xlu1 %10650  ;;  %12786 = vmatmul.mubr.msk.f32.vlgmr.msra.gmra.mrb[56].mxu0 %vm16090_vm1, %v10312_v20  ;;  %vm16100_vm1 = vmmov %vm16099_vm0  ;;  %v10652_v53 = vsel %vm862_vm3, %v15798_v0, %v15787_v1 }
 0x78e   : > { %12789 = vmatpush3.msk.msra.mxu0 %vm16091_vm9, %v10483_v21  ;;  %12790 = vmatprep.mubr.msk.f32.mxu0 %vm14135_vm7, %v15258_v49  ;;  %vm16102_vm9 = vmmov %vm16099_vm0  ;;  %v10653_v15 = vsel %vm862_vm3, %v15787_v1, %v10651_v37 }
 0x78f   : > { %12793 = vmatprep.subr.mxu0 %v15258_v49 }
 0x790   : > { %v10819_v26 = vpop.permute.xlu0 %10818 }
 0x791   : > { %v15815_v8 = vpop.permute.xlu1 %10816  ;;  %12791 = vmatmul.mubr.msk.f32.vlgmr.msra.gmra.mrb[58].mxu0 %vm16092_vm13, %v15812_v28  ;;  %12165 = vmatmul.mubr.msk.f32.vlgmr.msra.gmra.mrb[8].mxu1 %vm2276_vm14, %v12164_v27  ;;  %vm16103_vm13 = vmmov %vm16095_vm6 }
 0x792   : > { %13157 = vmatpush1.bf16.msra.mxu1 %v13156_v25  ;;  %12794 = vmatpush3.msk.msra.mxu0 %vm16093_vm10, %v10651_v37  ;;  %vm16104_vm10 = vmmov %vm16095_vm6  ;;  %v10821_v22 = vsel %vm1049_vm4, %v15815_v8, %v10819_v26 }
 0x793   : > { %12795 = vmatprep.mubr.msk.f32.mxu0 %vm14135_vm7, %v15258_v49  ;;  %12798 = vmatprep.subr.mxu0 %v15258_v49  ;;  %vm16109_vm3 = vmmov %vm16104_vm10 }
 0x794   : > { %v15829_v48 = vpop.permute.xlu0 %10984  ;;  %10232 = vmatprep.mubr.f32.mxu1 %v15258_v49  ;;  %12170 = vmatprep.subr.msk.mxu1 %vm16094_vm8, %v10317_v57  ;;  %vm16105_vm8 = vmmov %vm16099_vm0 }
 0x795   : > { %v10815_v54 = vpop.permute.xlu1 %10814  ;;  %12796 = vmatmul.mubr.msk.f32.vlgmr.msra.gmra.mrb[60].mxu0 %vm16095_vm6, %v15824_v10 }
 0x796   : > { %12799 = vmatpush3.msk.msra.mxu0 %vm16096_vm15, %v10819_v26  ;;  %12800 = vmatprep.mubr.msk.f32.mxu0 %vm14135_vm7, %v15258_v49  ;;  %vm16108_vm15 = vmmov %vm16104_vm10  ;;  %v10820_v2 = vsel %vm1049_vm4, %v10815_v54, %v15815_v8 }
 0x797   : > { %12803 = vmatprep.subr.mxu0 %v15258_v49 }
 0x798   : > { %v10983_v33 = vpop.permute.xlu0 %10982 }
 0x799   : > { %v15846_v51 = vpop.permute.xlu1 %10986  ;;  %12801 = vmatmul.mubr.msk.f32.vlgmr.msra.gmra.mrb[62].mxu0 %vm16097_vm11, %v15841_v62  ;;  %12168 = vmatmul.mubr.msk.f32.vlgmr.msra.gmra.mrb[8].mxu1 %vm2276_vm14, %v12167_v39  ;;  %vm16101_vm14 = vmmov %vm16095_vm6  ;;  %v15942_v52 = vsel %vm1236_vm5, %v10983_v33, %v15829_v48 }
 0x79a   : > { %12804 = vmatpush3.msk.msra.mxu0 %vm16098_vm12, %v15846_v51  ;;  %12805 = vmatprep.mubr.msk.f32.mxu0 %vm14135_vm7, %v15258_v49  ;;  %vm16107_vm6 = vmmov %vm16099_vm0  ;;  %v15931_v45 = vsel %vm1236_vm5, %v15829_v48, %v15846_v51 }
 0x79b   : > { %12171 = vmatpush1.msk.msra.mxu1 %vm16099_vm0, %v10313_v7  ;;  %12808 = vmatprep.subr.mxu0 %v15258_v49  ;;  %vm16110_vm11 = vmmov %vm16099_vm0 }
 0x79c   : > { %v11155_v12 = vpop.permute.xlu0 %11154  ;;  %10391 = vmatprep.mubr.f32.mxu1 %v15258_v49  ;;  %12176 = vmatprep.subr.msk.mxu1 %vm16100_vm1, %v10485_v43  ;;  %vm16111_vm12 = vmmov %vm16099_vm0 }
 0x79d   : > { %v11153_v47 = vpop.permute.xlu1 %11152  ;;  %12806 = vmatmul.mubr.msk.f32.vlgmr.msra.gmra.mrb[64].mxu0 %vm16101_vm14, %v15858_v36  ;;  %vm16112_vm0 = vmmov %vm16109_vm3 }
 0x79e   : > { %12809 = vmatpush3.msk.msra.mxu0 %vm16102_vm9, %v11155_v12  ;;  %12810 = vmatprep.mubr.msk.f32.mxu0 %vm14135_vm7, %v15258_v49  ;;  %vm16113_vm14 = vmmov %vm16112_vm0 }
 0x79f   : > { %12813 = vmatprep.subr.mxu0 %v15258_v49  ;;  %vm16114_vm9 = vmmov %vm16100_vm1 }
 0x7a0   : > { %v11321_v9 = vpop.permute.xlu0 %11320  ;;  %vm16116_vm4 = vmmov %vm16112_vm0 }
 0x7a1   : > { %v11151_v60 = vpop.permute.xlu1 %11150  ;;  %12811 = vmatmul.mubr.msk.f32.vlgmr.msra.gmra.mrb[66].mxu0 %vm16103_vm13, %v15872_v56  ;;  %12172 = vmatmul.mubr.msk.f32.vlgmr.msra.gmra.mrb[8].mxu1 %vm16104_vm10, %v10312_v20  ;;  %vm16117_vm13 = vmmov %vm16100_vm1  ;;  %vm16118_vm10 = vcmask 883712  }
 0x7a2   : > { %12177 = vmatpush1.msk.msra.mxu1 %vm16105_vm8, %v10484_v35  ;;  %12815 = vmatprep.mubr.msk.f32.mxu0 %vm14135_vm7, %v15258_v49  ;;  %v11157_v14 = vsel %vm16118_vm10, %v11153_v47, %v11155_v12  ;;  %vm16119_vm8 = vmmov %vm16112_vm0 }
 0x7a3   : > { %10559 = vmatprep.mubr.f32.mxu1 %v15258_v49  ;;  %12182 = vmatprep.subr.msk.mxu1 %vm16106_vm2, %v10653_v15  ;;  %vm16120_vm2 = vmmov %vm16100_vm1 }
 0x7a4   : > { %v11319_v61 = vpop.permute.xlu0 %11318  ;;  %vm16122_vm5 = vmmov %vm16118_vm10 }
 0x7a5   : > { %v11323_v40 = vpop.permute.xlu1 %11322  ;;  %v11156_v11 = vsel %vm16122_vm5, %v11151_v60, %v11153_v47 }
 0x7a6   : > { %12814 = vmatpush3.msk.msra.mxu0 %vm16107_vm6, %v11323_v40  ;;  %vm16121_vm6 = vmmov %vm16100_vm1 }
 0x7a7   : > { %12816 = vmatmul.mubr.msk.f32.vlgmr.msra.gmra.mrb[68].mxu0 %vm16108_vm15, %v15890_v58  ;;  %12818 = vmatprep.subr.mxu0 %v15258_v49  ;;  %vm16123_vm15 = vcmask 752640  }
 0x7a8   : > { %v11491_v18 = vpop.permute.xlu0 %11490  ;;  %12820 = vmatprep.mubr.msk.f32.mxu0 %vm14135_vm7, %v15258_v49 }
 0x7a9   : > { %v11489_v6 = vpop.permute.xlu1 %11488  ;;  %12178 = vmatmul.mubr.msk.f32.vlgmr.msra.gmra.mrb[8].mxu1 %vm16109_vm3, %v15812_v28  ;;  %12819 = vmatpush3.msk.msra.mxu0 %vm16110_vm11, %v11491_v18  ;;  %vm16124_vm3 = vmmov %vm16112_vm0 }
 0x7aa   : > { %12183 = vmatpush1.msk.msra.mxu1 %vm16111_vm12, %v10652_v53  ;;  %10727 = vmatprep.mubr.f32.mxu1 %v15258_v49  ;;  %vm16125_vm11 = vmmov %vm16100_vm1 }
 0x7ab   : > { %12821 = vmatmul.mubr.msk.f32.vlgmr.msra.gmra.mrb[70].mxu0 %vm16112_vm0, %v15904_v19  ;;  %12823 = vmatprep.subr.mxu0 %v15258_v49  ;;  %vm16126_vm12 = vmmov %vm16100_vm1 }
 0x7ac   : > { %12188 = vmatprep.subr.msk.mxu1 %vm16100_vm1, %v10821_v22  ;;  %12825 = vmatprep.mubr.msk.f32.mxu0 %vm14135_vm7, %v15258_v49  ;;  %vm16115_vm7 = vmmov %vm16100_vm1  ;;  %vm16128_vm1 = vcmask 744448   ;;  %v11657_v63 = vpop.permute.xlu0 %11656 }
 0x7ad   : > { %v11487_v27 = vpop.permute.xlu1 %11486  ;;  %vm16127_vm0 = vmmov %vm16123_vm15  ;;  %v11493_v4 = vsel %vm16128_vm1, %v11489_v6, %v11491_v18 }
 0x7ae   : > { %v11324_v39 = vsel %vm16127_vm0, %v11319_v61, %v11321_v9  ;;  %vm16134_vm10 = vmmov %vm16124_vm3 }
 0x7af   : > { %vm16137_vm5 = vmmov %vm16124_vm3 }
 0x7b0   : > { %v11655_v59 = vpop.permute.xlu0 %11654 }
 0x7b1   : > { %v11659_v44 = vpop.permute.xlu1 %11658  ;;  %12184 = vmatmul.mubr.msk.f32.vlgmr.msra.gmra.mrb[8].mxu1 %vm16113_vm14, %v15824_v10  ;;  %vm16129_vm14 = vmmov %vm16124_vm3 }
 0x7b2   : > { %12824 = vmatpush3.msk.msra.mxu0 %vm16114_vm9, %v11659_v44  ;;  %12189 = vmatpush1.msk.msra.mxu1 %vm16115_vm7, %v10820_v2  ;;  %vm16130_vm9 = vmmov %vm16120_vm2 }
 0x7b3   : > { %12826 = vmatmul.mubr.msk.f32.vlgmr.msra.gmra.mrb[72].mxu0 %vm16116_vm4, %v15924_v30  ;;  %10895 = vmatprep.mubr.f32.mxu1 %v15258_v49  ;;  %vm16131_vm7 = vmmov %vm16120_vm2 }
 0x7b4   : > { %12194 = vmatprep.subr.msk.mxu1 %vm16117_vm13, %v15931_v45  ;;  %vm16132_vm4 = vmmov %vm16128_vm1  ;;  %vm16133_vm13 = vcmask 736256  }
 0x7b5   : > { %v11492_v42 = vsel %vm16132_vm4, %v11487_v27, %v11489_v6  ;;  %v11661_v41 = vsel %vm16133_vm13, %v11657_v63, %v11659_v44 }
 0x7b6   : > { %v7751_v50 = vpop.f32.mrb[24].mxu0 }
 0x7b7   : > { %v7757_v29 = vadd.f32 %v7751_v50, %v15682_v23  ;;  %v12677_v32 = vpop.f32.mrb[25].mxu0  ;;  %v11325_v23 = vsel %vm16123_vm15, %v11321_v9, %v11323_v40  ;;  %vm16138_vm15 = vmmov %vm16120_vm2 }
 0x7b9   : > { %12190 = vmatmul.mubr.msk.f32.vlgmr.msra.gmra.mrb[8].mxu1 %vm16119_vm8, %v15841_v62  ;;  %vm16135_vm8 = vmmov %vm16120_vm2 }
 0x7ba   : > { %12195 = vmatpush1.msk.msra.mxu1 %vm16120_vm2, %v15942_v52  ;;  %v7922_v31 = vpop.f32.mrb[26].mxu0  ;;  %11063 = vmatprep.mubr.f32.mxu1 %v15258_v49 }
 0x7bb   : > { %v7928_v5 = vadd.f32 %v7922_v31, %v7757_v29  ;;  %v12684_v24 = vpop.f32.mrb[27].mxu0  ;;  %12200 = vmatprep.subr.msk.mxu1 %vm16121_vm6, %v11157_v14  ;;  %vm16136_vm6 = vmmov %vm16133_vm13 }
 0x7bc   : > { %v11660_v37 = vsel %vm16136_vm6, %v11655_v59, %v11657_v63 }
 0x7c1   : > { %12196 = vmatmul.mubr.msk.f32.vlgmr.msra.gmra.mrb[8].mxu1 %vm16124_vm3, %v15858_v36 }
 0x7c2   : > { %v8093_v21 = vpop.f32.mrb[28].mxu0  ;;  %12201 = vmatpush1.msk.msra.mxu1 %vm16125_vm11, %v11156_v11  ;;  %11231 = vmatprep.mubr.f32.mxu1 %v15258_v49  ;;  %vm11835_vm11 = vcmask 256000  }
 0x7c3   : > { %v8099_v3 = vadd.f32 %v8093_v21, %v7928_v5  ;;  %v12691_v34 = vpop.f32.mrb[29].mxu0  ;;  %12206 = vmatprep.subr.msk.mxu1 %vm16126_vm12, %v11325_v23 }
 0x7c6   : > { %v8264_v17 = vpop.f32.mrb[30].mxu0 }
 0x7c7   : > { %v8270_v46 = vadd.f32 %v8264_v17, %v8099_v3  ;;  %v12698_v16 = vpop.f32.mrb[31].mxu0 }
 0x7c9   : > { %12202 = vmatmul.mubr.msk.f32.vlgmr.msra.gmra.mrb[8].mxu1 %vm16129_vm14, %v15872_v56 }
 0x7ca   : > { %12207 = vmatpush1.msk.msra.mxu1 %vm16130_vm9, %v11324_v39  ;;  %11399 = vmatprep.mubr.f32.mxu1 %v15258_v49 }
 0x7cb   : > { %12212 = vmatprep.subr.msk.mxu1 %vm16131_vm7, %v11493_v4 }
 0x7ce   : > { %v8435_v1 = vpop.f32.mrb[32].mxu0 }
 0x7cf   : > { %v8441_v38 = vadd.f32 %v8435_v1, %v8270_v46  ;;  %v12705_v55 = vpop.f32.mrb[33].mxu0 }
 0x7d1   : > { %12208 = vmatmul.mubr.msk.f32.vlgmr.msra.gmra.mrb[8].mxu1 %vm16134_vm10, %v15890_v58 }
 0x7d2   : > { %v8606_v20 = vpop.f32.mrb[34].mxu0  ;;  %12213 = vmatpush1.msk.msra.mxu1 %vm16135_vm8, %v11492_v42  ;;  %11567 = vmatprep.mubr.f32.mxu1 %v15258_v49 }
 0x7d3   : > { %v8612_v0 = vadd.f32 %v8606_v20, %v8441_v38  ;;  %v12712_v13 = vpop.f32.mrb[35].mxu0  ;;  %12218 = vmatprep.subr.msk.mxu1 %vm16120_vm2, %v11661_v41 }
 0x7d9   : > { %12214 = vmatmul.mubr.msk.f32.vlgmr.msra.gmra.mrb[8].mxu1 %vm16137_vm5, %v15904_v19 }
 0x7da   : > { %v8777_v7 = vpop.f32.mrb[36].mxu0  ;;  %12219 = vmatpush1.msk.msra.mxu1 %vm16138_vm15, %v11660_v37  ;;  %11735 = vmatprep.mubr.f32.mxu1 %v15258_v49 }
 0x7db   : > { %v8783_v28 = vadd.f32 %v8777_v7, %v8612_v0  ;;  %v12719_v25 = vpop.f32.mrb[37].mxu0  ;;  %v11819_v0 = vpop.permute.xlu1 %11818 }
 0x7de   : > { %v8931_v26 = vpop.f32.mrb[38].mxu0 }
 0x7df   : > { %v8937_v57 = vadd.f32 %v8931_v26, %v8783_v28  ;;  %v12726_v8 = vpop.f32.mrb[39].mxu0 }
 0x7e1   : > { %12220 = vmatmul.mubr.msk.f32.vlgmr.msra.gmra.mrb[8].mxu1 %vm16124_vm3, %v15924_v30 }
 0x82f   : > { %v9108_v10 = vpop.f32.mrb[40].mxu0 }
 0x830   : > { %v9114_v48 = vadd.f32 %v9108_v10, %v8937_v57  ;;  %v12733_v54 = vpop.f32.mrb[41].mxu0 }
 0x837   : > { %v9279_v62 = vpop.f32.mrb[42].mxu0 }
 0x838   : > { %v9285_v33 = vadd.f32 %v9279_v62, %v9114_v48  ;;  %v12740_v43 = vpop.f32.mrb[43].mxu0 }
 0x83b   : > { %v9450_v36 = vpop.f32.mrb[44].mxu0 }
 0x83c   : > { %v9456_v12 = vadd.f32 %v9450_v36, %v9285_v33  ;;  %v12747_v47 = vpop.f32.mrb[45].mxu0 }
 0x843   : > { %v9621_v56 = vpop.f32.mrb[46].mxu0 }
 0x844   : > { %v9627_v35 = vadd.f32 %v9621_v56, %v9456_v12  ;;  %v12754_v49 = vpop.f32.mrb[47].mxu0 }
 0x847   : > { %v9792_v15 = vpop.f32.mrb[48].mxu0 }
 0x848   : > { %v9798_v9 = vadd.f32 %v9792_v15, %v9627_v35  ;;  %v12761_v60 = vpop.f32.mrb[49].mxu0 }
 0x850   : > { %v9963_v61 = vpop.f32.mrb[50].mxu0 }
 0x851   : > { %v9969_v58 = vadd.f32 %v9963_v61, %v9798_v9  ;;  %v12768_v40 = vpop.f32.mrb[51].mxu0 }
 0x854   : > { %v10134_v53 = vpop.f32.mrb[52].mxu0 }
 0x855   : > { %v10140_v18 = vadd.f32 %v10134_v53, %v9969_v58  ;;  %v12775_v19 = vpop.f32.mrb[53].mxu0 }
 0x85c   : > { %v10305_v22 = vpop.f32.mrb[54].mxu0 }
 0x85d   : > { %v10311_v6 = vadd.f32 %v10305_v22, %v10140_v18  ;;  %v12782_v27 = vpop.f32.mrb[55].mxu0 }
 0x860   : > { %v10464_v2 = vpop.f32.mrb[56].mxu0 }
 0x861   : > { %v10470_v30 = vadd.f32 %v10464_v2, %v10311_v6  ;;  %v12787_v44 = vpop.f32.mrb[57].mxu0 }
 0x864   : > { %v10632_v50 = vpop.f32.mrb[58].mxu0 }
 0x865   : > { %v10638_v29 = vadd.f32 %v10632_v50, %v10470_v30  ;;  %v12792_v32 = vpop.f32.mrb[59].mxu0 }
 0x868   : > { %v10800_v14 = vpop.f32.mrb[60].mxu0 }
 0x869   : > { %v10806_v31 = vadd.f32 %v10800_v14, %v10638_v29  ;;  %v12797_v5 = vpop.f32.mrb[61].mxu0 }
 0x86c   : > { %v10968_v24 = vpop.f32.mrb[62].mxu0 }
 0x86d   : > { %v10974_v11 = vadd.f32 %v10968_v24, %v10806_v31  ;;  %v12802_v23 = vpop.f32.mrb[63].mxu0 }
 0x870   : > { %v11136_v21 = vpop.f32.mrb[64].mxu0 }
 0x871   : > { %v11142_v3 = vadd.f32 %v11136_v21, %v10974_v11  ;;  %v12807_v34 = vpop.f32.mrb[65].mxu0 }
 0x874   : > { %v11304_v17 = vpop.f32.mrb[66].mxu0 }
 0x875   : > { %v11310_v39 = vadd.f32 %v11304_v17, %v11142_v3  ;;  %v12812_v46 = vpop.f32.mrb[67].mxu0 }
 0x87a   : > { %v11472_v16 = vpop.f32.mrb[68].mxu0 }
 0x87b   : > { %v11478_v4 = vadd.f32 %v11472_v16, %v11310_v39  ;;  %v12817_v1 = vpop.f32.mrb[69].mxu0 }
 0x87e   : > { %v11640_v63 = vpop.f32.mrb[70].mxu0 }
 0x87f   : > { %v11646_v42 = vadd.f32 %v11640_v63, %v11478_v4  ;;  %v12822_v38 = vpop.f32.mrb[71].mxu0 }
 0x886   : > { %v11808_v55 = vpop.f32.mrb[72].mxu0 }
 0x887   : > { %v11814_v41 = vadd.f32 %v11808_v55, %v11646_v42  ;;  %v12827_v20 = vpop.f32.mrb[73].mxu0 }
 0x889   : > { %v11823_v13 = vadd.f32 %v11819_v0, %v11814_v41 }
 0x88b   : > { %v11829_v59 = vadd.f32 %v11823_v13, %v15846_v51 }
 0x88d   : > { %11836 = vst.msk [vmem:[%s443_s29 + $0x8] sm:$0x7] %vm11835_vm11, %v11829_v59 }
 0x8b4   : > { %v11737_v37 = vpop.f32.mrb[8].mxu1 }
 0x8b5   : > { %v11821_v7 = vadd.f32 %v11819_v0, %v11737_v37  ;;  %v11739_v28 = vpop.f32.mrb[9].mxu1 }
 0x8b6   : > { %v11822_v25 = vadd.f32 %v11819_v0, %v11739_v28 }
 0x8b7   : > { %v11827_v26 = vadd.f32 %v11821_v7, %v15942_v52 }
 0x8b8   : > { %v11828_v57 = vadd.f32 %v11822_v25, %v15931_v45 }
 0x8ba   : > { %v11832_v8 = vcombine.low %v11827_v26, %v11828_v57 }
 0x8bc   : > { %11834 = vst [vmem:[%s443_s29] sm:$0x77] %v11832_v8 }
 0x8bd PF: > { %s24_s21 = sadd.s32 1, %s14117_s21  }
 0x8be   : > { %p21_p5 = scmp.ge.s32.totalorder %s24_s21, 4  }
 0x8c0   :  { %23 = sbr.rel (!%p21_p5) target bundleno = 2 (0x2), region = 163 }
 0x8c7   :  { %11858 = vsyncpa [#allocation6], 1 }
 0x8c8   :  { %11860 = vsyncpa [#allocation6 + $0x1], 1 }
 0x8c9   :  { %11861 = vsyncpa [#allocation8], 1 }

</bundles_post_ra>
